<compile_context>
chip_gen: v6e
topology: v6e:2x2x1
jax: 0.10.0
libtpu: 0.0.40
codegen_flags: <defaults>
</compile_context>

<pallas_src>
import jax
import jax.numpy as jnp
from jax import lax
from jax.experimental import pallas as pl
from jax.experimental.pallas import tpu as pltpu

LANES = 128                 # pad matmul output columns to a full lane register
ROW_ALIGN = 16              # sublane alignment safe for both bf16 and f32 tiles
VMEM_LIMIT = 32 * 1024 * 1024


def _round_up(x, m):
    return ((x + m - 1) // m) * m


def _pad_last(a, n):
    pad = n - a.shape[-1]
    if pad == 0:
        return a
    return jnp.pad(a, [(0, 0)] * (a.ndim - 1) + [(0, pad)])


# ------------------------------- Pallas kernels --------------------------------

def _conv_bn_relu_pool_kernel(x_ref, w_ref, scale_ref, shift_ref, o_ref):
    """x_ref: (4, TG, K) bf16 patch rows, one set per 2x2 pool position.

    Computes  max_j relu((x_j @ w) * scale + shift)  ->  (TG, 128).
    """
    w = w_ref[...]
    scale = scale_ref[...]
    shift = shift_ref[...]

    def pos(j):
        acc = jnp.dot(x_ref[j], w, preferred_element_type=jnp.float32)
        return jnp.maximum(acc * scale + shift, 0.0)

    y = jnp.maximum(jnp.maximum(pos(0), pos(1)), jnp.maximum(pos(2), pos(3)))
    o_ref[...] = y.astype(o_ref.dtype)


def conv_bn_relu_pool(patches4, w_mat, scale, shift, *, tile_g=128):
    """Fused conv(as matmul) + BN + ReLU + 2x2 max-pool.

    patches4: (4, G, K) bf16, G = N*Ho*Wo pooled pixels, K = kh*kw*Cin.
    w_mat: (K, 128) bf16 (lane padded), scale/shift: (1, 128) f32.
    Returns (G, 128) bf16 pooled activations (valid channels in the low lanes).
    """
    _, G, K = patches4.shape
    n_pad = w_mat.shape[1]
    tile_g = min(tile_g, _round_up(G, ROW_ALIGN))
    gp = _round_up(G, tile_g)
    if gp != G:
        patches4 = jnp.pad(patches4, ((0, 0), (0, gp - G), (0, 0)))

    out = pl.pallas_call(
        _conv_bn_relu_pool_kernel,
        out_shape=jax.ShapeDtypeStruct((gp, n_pad), jnp.bfloat16),
        grid=(gp // tile_g,),
        in_specs=[
            pl.BlockSpec((4, tile_g, K), lambda i: (0, i, 0)),
            pl.BlockSpec((K, n_pad), lambda i: (0, 0)),      # VMEM-resident weight
            pl.BlockSpec((1, n_pad), lambda i: (0, 0)),      # BN scale
            pl.BlockSpec((1, n_pad), lambda i: (0, 0)),      # BN shift (+conv bias)
        ],
        out_specs=pl.BlockSpec((tile_g, n_pad), lambda i: (i, 0)),
        compiler_params=pltpu.CompilerParams(
            dimension_semantics=("parallel",),
            vmem_limit_bytes=VMEM_LIMIT,
        ),
        cost_estimate=pl.CostEstimate(
            flops=2 * 4 * gp * K * n_pad,
            transcendentals=0,
            bytes_accessed=4 * gp * K * 2 + K * n_pad * 2 + 2 * n_pad * 4
                           + gp * n_pad * 2,
        ),
    )(patches4, w_mat, scale, shift)
    return out[:G]


def _linear_kernel(x_ref, w_ref, b_ref, o_ref):
    acc = jnp.dot(x_ref[...], w_ref[...], preferred_element_type=jnp.float32)
    o_ref[...] = (acc + b_ref[...]).astype(o_ref.dtype)


def fused_linear(x, w, b, *, tile_m=256):
    """x @ w + b with lane-padded w/b; returns f32 (M, 128)."""
    M, K = x.shape
    n_pad = w.shape[1]
    tile_m = min(tile_m, _round_up(M, ROW_ALIGN))
    mp = _round_up(M, tile_m)
    if mp != M:
        x = jnp.pad(x, ((0, mp - M), (0, 0)))

    out = pl.pallas_call(
        _linear_kernel,
        out_shape=jax.ShapeDtypeStruct((mp, n_pad), jnp.float32),
        grid=(mp // tile_m,),
        in_specs=[
            pl.BlockSpec((tile_m, K), lambda i: (i, 0)),
            pl.BlockSpec((K, n_pad), lambda i: (0, 0)),
            pl.BlockSpec((1, n_pad), lambda i: (0, 0)),
        ],
        out_specs=pl.BlockSpec((tile_m, n_pad), lambda i: (i, 0)),
        compiler_params=pltpu.CompilerParams(
            dimension_semantics=("parallel",),
            vmem_limit_bytes=VMEM_LIMIT,
        ),
        cost_estimate=pl.CostEstimate(
            flops=2 * mp * K * n_pad,
            transcendentals=0,
            bytes_accessed=mp * K * x.dtype.itemsize + K * n_pad * w.dtype.itemsize
                           + n_pad * 4 + mp * n_pad * 4,
        ),
    )(x, w, b)
    return out[:M]


# --------------------------------- JAX glue ------------------------------------

def pool_patch_sets(x_nhwc, k=5):
    """5x5 'same' patches of the four 2x2-pool positions, extracted with stride 2.

    Returns (4, N*Ho*Wo, k*k*Cin) bf16; set j = 2*dy+dx holds, for every pooled
    output pixel (n, ho, wo), the patch centred on conv-output pixel
    (2*ho+dy, 2*wo+dx).  Built directly from the (small) layer input, so no extra
    re-layout pass over the 25x-blown-up patch array is needed.
    """
    N, H, W, _ = x_nhwc.shape
    ho, wo = H // 2, W // 2
    r = k // 2
    sets = []
    for dy in (0, 1):
        for dx in (0, 1):
            pat = lax.conv_general_dilated_patches(
                x_nhwc, (k, k), (2, 2),
                [(r - dy, r - 1 + dy), (r - dx, r - 1 + dx)],
                dimension_numbers=("NHWC", "HWIO", "NHWC"))
            sets.append(pat.reshape(N * ho * wo, -1))
    return jnp.stack(sets, axis=0).astype(jnp.bfloat16)


def prepare_params(p, eps=1e-5):
    """One-time conversion of PyTorch-layout parameters into kernel constants."""

    def conv_weight_matrix(w_oihw):
        # Build the (kh*kw*Cin, Cout) matmul weight whose feature ordering matches
        # lax.conv_general_dilated_patches *by construction*: run the same patch
        # extractor over the weight tensor itself and read the centre patch.
        cout, cin, kh, kw = w_oihw.shape
        w_img = jnp.transpose(w_oihw, (0, 2, 3, 1))            # (Cout, kh, kw, Cin)
        pat = lax.conv_general_dilated_patches(
            w_img, (kh, kw), (1, 1),
            [(kh // 2, kh // 2), (kw // 2, kw // 2)],
            dimension_numbers=("NHWC", "HWIO", "NHWC"))
        return pat[:, kh // 2, kw // 2, :].T                   # (kh*kw*Cin, Cout)

    def bn_fold(b, g, be, m, v):
        s = g / jnp.sqrt(v + eps)
        return s, (b - m) * s + be

    s1, sh1 = bn_fold(p["b1"], p["g1"], p["be1"], p["m1"], p["v1"])
    s2, sh2 = bn_fold(p["b2"], p["g2"], p["be2"], p["m2"], p["v2"])

    # fc: PyTorch flattens (C, H, W); our activations arrive flattened (H, W, C).
    # Fold that permutation plus the transpose into the constant weight once.
    fc_w = p["fc_w"].reshape(10, 32, 7, 7)
    fc_w = jnp.transpose(fc_w, (0, 2, 3, 1)).reshape(10, 7 * 7 * 32)

    return {
        "w1": _pad_last(conv_weight_matrix(p["w1"]), LANES).astype(jnp.bfloat16),
        "s1": _pad_last(s1[None, :], LANES).astype(jnp.float32),
        "sh1": _pad_last(sh1[None, :], LANES).astype(jnp.float32),
        "w2": _pad_last(conv_weight_matrix(p["w2"]), LANES).astype(jnp.bfloat16),
        "s2": _pad_last(s2[None, :], LANES).astype(jnp.float32),
        "sh2": _pad_last(sh2[None, :], LANES).astype(jnp.float32),
        "fc_w": _pad_last(fc_w.T, LANES).astype(jnp.bfloat16),    # (1568, 128)
        "fc_b": _pad_last(p["fc_b"][None, :], LANES).astype(jnp.float32),
    }


@jax.jit
def cnn_fashion_mnist_forward(x_nchw, kp):
    x = jnp.transpose(x_nchw, (0, 2, 3, 1)).astype(jnp.float32)    # NCHW -> NHWC
    n = x.shape[0]

    # layer1: conv(1->16, k5, p2) + BN + ReLU + maxpool2   (one fused kernel)
    p1 = pool_patch_sets(x)                                        # (4, n*196, 25)
    y1 = conv_bn_relu_pool(p1, kp["w1"], kp["s1"], kp["sh1"])      # (n*196, 128)
    y1 = y1[:, :16].reshape(n, 14, 14, 16)

    # layer2: conv(16->32, k5, p2) + BN + ReLU + maxpool2  (one fused kernel)
    p2 = pool_patch_sets(y1)                                       # (4, n*49, 400)
    y2 = conv_bn_relu_pool(p2, kp["w2"], kp["s2"], kp["sh2"])      # (n*49, 128)
    y2 = y2[:, :32].reshape(n, 7 * 7 * 32)                         # (h, w, c) order

    # fc (weight columns pre-permuted to (h, w, c) order, lane-padded to 128)
    logits = fused_linear(y2, kp["fc_w"], kp["fc_b"])              # (n, 128) f32
    return logits[:, :10]


# ----------------------------- reference (pure JAX) ----------------------------

def reference_forward(x_nchw, p, eps=1e-5):
    def conv(x, w, b):
        y = lax.conv_general_dilated(x, w, (1, 1), [(2, 2), (2, 2)],
                                     dimension_numbers=("NCHW", "OIHW", "NCHW"))
        return y + b.reshape(1, -1, 1, 1)

    def bn(x, g, be, m, v):
        return ((x - m.reshape(1, -1, 1, 1)) / jnp.sqrt(v.reshape(1, -1, 1, 1) + eps)
                * g.reshape(1, -1, 1, 1) + be.reshape(1, -1, 1, 1))

    def pool(x):
        N, C, H, W = x.shape
        return x.reshape(N, C, H // 2, 2, W // 2, 2).max(axis=(3, 5))

    y = pool(jnp.maximum(bn(conv(x_nchw, p["w1"], p["b1"]),
                            p["g1"], p["be1"], p["m1"], p["v1"]), 0.0))
    y = pool(jnp.maximum(bn(conv(y, p["w2"], p["b2"]),
                            p["g2"], p["be2"], p["m2"], p["v2"]), 0.0))
    y = y.reshape(y.shape[0], -1)
    return y @ p["fc_w"].T + p["fc_b"]


# ----------------------------------- main ---------------------------------------

def make_params(key):
    ks = jax.random.split(key, 10)
    return {
        "w1": 0.05 * jax.random.normal(ks[0], (16, 1, 5, 5), jnp.float32),
        "b1": 0.05 * jax.random.normal(ks[1], (16,), jnp.float32),
        "g1": 1.0 + 0.1 * jax.random.normal(ks[2], (16,), jnp.float32),
        "be1": 0.1 * jax.random.normal(ks[3], (16,), jnp.float32),
        "m1": 0.05 * jax.random.normal(ks[4], (16,), jnp.float32),
        "v1": 1.0 + 0.1 * jax.random.uniform(ks[4], (16,), jnp.float32),
        "w2": 0.05 * jax.random.normal(ks[5], (32, 16, 5, 5), jnp.float32),
        "b2": 0.05 * jax.random.normal(ks[6], (32,), jnp.float32),
        "g2": 1.0 + 0.1 * jax.random.normal(ks[7], (32,), jnp.float32),
        "be2": 0.1 * jax.random.normal(ks[8], (32,), jnp.float32),
        "m2": 0.05 * jax.random.normal(ks[9], (32,), jnp.float32),
        "v2": 1.0 + 0.1 * jax.random.uniform(ks[9], (32,), jnp.float32),
        "fc_w": 0.02 * jax.random.normal(ks[0], (10, 7 * 7 * 32), jnp.float32),
        "fc_b": 0.02 * jax.random.normal(ks[1], (10,), jnp.float32),
    }


if __name__ == "__main__":
    key = jax.random.PRNGKey(0)
    kx, kp = jax.random.split(key)
    # Fashion-MNIST shape is forced by the fc layer (7*7*32): 28x28, 1 channel.
    x = jax.random.normal(kx, (2, 1, 28, 28), jnp.float32)
    params = make_params(kp)
    kparams = prepare_params(params)

    out = jax.block_until_ready(cnn_fashion_mnist_forward(x, kparams))
    ref = jax.block_until_ready(reference_forward(x, params))

    assert out.shape == (2, 10), out.shape
    # bf16 MXU inputs for the conv/fc matmuls -> slightly looser tolerance than f32.
    err = float(jnp.max(jnp.abs(out - ref)))
    assert jnp.allclose(out, ref, rtol=2e-2, atol=2e-2), (err, out, ref)
    print("KERNEL_OK")
</pallas_src>

<mosaic_0001>
module attributes {stable_mosaic.version = 11 : i64} {
  func.func @_conv_bn_relu_pool_kernel(%arg0: i32, %arg1: memref<4x128x25xbf16, #tpu.memory_space<vmem>>, %arg2: memref<25x128xbf16, #tpu.memory_space<vmem>>, %arg3: memref<1x128xf32, #tpu.memory_space<vmem>>, %arg4: memref<1x128xf32, #tpu.memory_space<vmem>>, %arg5: memref<128x128xbf16, #tpu.memory_space<vmem>>) attributes {dimension_semantics = [#tpu.dimension_semantics<parallel>], iteration_bounds = array<i64: 4>, scalar_prefetch = 0 : i64, scratch_operands = 0 : i64, tpu.core_type = #tpu.core_type<tc>, window_params = [{transform_indices = @transform_0, window_bounds = array<i64: 4, 128, 25>}, {pipeline_mode = #tpu.pipeline_mode<synchronous>, transform_indices = @transform_1, window_bounds = array<i64: 25, 128>}, {pipeline_mode = #tpu.pipeline_mode<synchronous>, transform_indices = @transform_2, window_bounds = array<i64: 1, 128>}, {pipeline_mode = #tpu.pipeline_mode<synchronous>, transform_indices = @transform_3, window_bounds = array<i64: 1, 128>}, {transform_indices = @transform_4, window_bounds = array<i64: 128, 128>}]} {
    %c0 = arith.constant 0 : index
    %c0_0 = arith.constant 0 : index
    %0 = vector.load %arg2[%c0, %c0_0] : memref<25x128xbf16, #tpu.memory_space<vmem>>, vector<25x128xbf16>
    %c0_1 = arith.constant 0 : index
    %c0_2 = arith.constant 0 : index
    %1 = vector.load %arg3[%c0_1, %c0_2] : memref<1x128xf32, #tpu.memory_space<vmem>>, vector<1x128xf32>
    %c0_3 = arith.constant 0 : index
    %c0_4 = arith.constant 0 : index
    %2 = vector.load %arg4[%c0_3, %c0_4] : memref<1x128xf32, #tpu.memory_space<vmem>>, vector<1x128xf32>
    %c0_5 = arith.constant 0 : index
    %c0_6 = arith.constant 0 : index
    %c0_7 = arith.constant 0 : index
    %3 = vector.load %arg1[%c0_5, %c0_6, %c0_7] : memref<4x128x25xbf16, #tpu.memory_space<vmem>>, vector<1x128x25xbf16>
    %4 = vector.shape_cast %3 : vector<1x128x25xbf16> to vector<128x25xbf16>
    %cst = arith.constant dense<0.000000e+00> : vector<128x128xf32>
    %5 = tpu.matmul %4, %0, %cst {dimension_numbers = #tpu.dot_dimension_numbers<[1], [0], [0], [1], [0, 0, 1, 1], [], []>} : vector<128x25xbf16>, vector<25x128xbf16>, vector<128x128xf32> -> vector<128x128xf32>
    %6 = vector.broadcast %1 : vector<1x128xf32> to vector<128x128xf32>
    %7 = arith.mulf %5, %6 : vector<128x128xf32>
    %8 = vector.broadcast %2 : vector<1x128xf32> to vector<128x128xf32>
    %9 = arith.addf %7, %8 : vector<128x128xf32>
    %cst_8 = arith.constant 0.000000e+00 : f32
    %10 = vector.broadcast %cst_8 : f32 to vector<128x128xf32>
    %11 = arith.maximumf %9, %10 : vector<128x128xf32>
    %c1 = arith.constant 1 : index
    %c0_9 = arith.constant 0 : index
    %c0_10 = arith.constant 0 : index
    %12 = vector.load %arg1[%c1, %c0_9, %c0_10] : memref<4x128x25xbf16, #tpu.memory_space<vmem>>, vector<1x128x25xbf16>
    %13 = vector.shape_cast %12 : vector<1x128x25xbf16> to vector<128x25xbf16>
    %cst_11 = arith.constant dense<0.000000e+00> : vector<128x128xf32>
    %14 = tpu.matmul %13, %0, %cst_11 {dimension_numbers = #tpu.dot_dimension_numbers<[1], [0], [0], [1], [0, 0, 1, 1], [], []>} : vector<128x25xbf16>, vector<25x128xbf16>, vector<128x128xf32> -> vector<128x128xf32>
    %15 = vector.broadcast %1 : vector<1x128xf32> to vector<128x128xf32>
    %16 = arith.mulf %14, %15 : vector<128x128xf32>
    %17 = vector.broadcast %2 : vector<1x128xf32> to vector<128x128xf32>
    %18 = arith.addf %16, %17 : vector<128x128xf32>
    %cst_12 = arith.constant 0.000000e+00 : f32
    %19 = vector.broadcast %cst_12 : f32 to vector<128x128xf32>
    %20 = arith.maximumf %18, %19 : vector<128x128xf32>
    %21 = arith.maximumf %11, %20 : vector<128x128xf32>
    %c2 = arith.constant 2 : index
    %c0_13 = arith.constant 0 : index
    %c0_14 = arith.constant 0 : index
    %22 = vector.load %arg1[%c2, %c0_13, %c0_14] : memref<4x128x25xbf16, #tpu.memory_space<vmem>>, vector<1x128x25xbf16>
    %23 = vector.shape_cast %22 : vector<1x128x25xbf16> to vector<128x25xbf16>
    %cst_15 = arith.constant dense<0.000000e+00> : vector<128x128xf32>
    %24 = tpu.matmul %23, %0, %cst_15 {dimension_numbers = #tpu.dot_dimension_numbers<[1], [0], [0], [1], [0, 0, 1, 1], [], []>} : vector<128x25xbf16>, vector<25x128xbf16>, vector<128x128xf32> -> vector<128x128xf32>
    %25 = vector.broadcast %1 : vector<1x128xf32> to vector<128x128xf32>
    %26 = arith.mulf %24, %25 : vector<128x128xf32>
    %27 = vector.broadcast %2 : vector<1x128xf32> to vector<128x128xf32>
    %28 = arith.addf %26, %27 : vector<128x128xf32>
    %cst_16 = arith.constant 0.000000e+00 : f32
    %29 = vector.broadcast %cst_16 : f32 to vector<128x128xf32>
    %30 = arith.maximumf %28, %29 : vector<128x128xf32>
    %c3 = arith.constant 3 : index
    %c0_17 = arith.constant 0 : index
    %c0_18 = arith.constant 0 : index
    %31 = vector.load %arg1[%c3, %c0_17, %c0_18] : memref<4x128x25xbf16, #tpu.memory_space<vmem>>, vector<1x128x25xbf16>
    %32 = vector.shape_cast %31 : vector<1x128x25xbf16> to vector<128x25xbf16>
    %cst_19 = arith.constant dense<0.000000e+00> : vector<128x128xf32>
    %33 = tpu.matmul %32, %0, %cst_19 {dimension_numbers = #tpu.dot_dimension_numbers<[1], [0], [0], [1], [0, 0, 1, 1], [], []>} : vector<128x25xbf16>, vector<25x128xbf16>, vector<128x128xf32> -> vector<128x128xf32>
    %34 = vector.broadcast %1 : vector<1x128xf32> to vector<128x128xf32>
    %35 = arith.mulf %33, %34 : vector<128x128xf32>
    %36 = vector.broadcast %2 : vector<1x128xf32> to vector<128x128xf32>
    %37 = arith.addf %35, %36 : vector<128x128xf32>
    %cst_20 = arith.constant 0.000000e+00 : f32
    %38 = vector.broadcast %cst_20 : f32 to vector<128x128xf32>
    %39 = arith.maximumf %37, %38 : vector<128x128xf32>
    %40 = arith.maximumf %30, %39 : vector<128x128xf32>
    %41 = arith.maximumf %21, %40 : vector<128x128xf32>
    %42 = arith.truncf %41 : vector<128x128xf32> to vector<128x128xbf16>
    %c0_21 = arith.constant 0 : index
    %c0_22 = arith.constant 0 : index
    %43 = vector.load %arg5[%c0_21, %c0_22] : memref<128x128xbf16, #tpu.memory_space<vmem>>, vector<128x128xbf16>
    tpu.vector_store %arg5[%c0_21, %c0_22], %42 {strides = array<i32>} : memref<128x128xbf16, #tpu.memory_space<vmem>>, vector<128x128xbf16>,
    return
  }
  func.func @transform_0(%arg0: i32) -> (i32, i32, i32) {
    %c0_i32 = arith.constant 0 : i32
    %c0_i32_0 = arith.constant 0 : i32
    %c0_i32_1 = arith.constant 0 : i32
    return %c0_i32, %arg0, %c0_i32_0 : i32, i32, i32
  }
  func.func @transform_1(%arg0: i32) -> (i32, i32) {
    %c0_i32 = arith.constant 0 : i32
    %c0_i32_0 = arith.constant 0 : i32
    %c0_i32_1 = arith.constant 0 : i32
    return %c0_i32, %c0_i32_0 : i32, i32
  }
  func.func @transform_2(%arg0: i32) -> (i32, i32) {
    %c0_i32 = arith.constant 0 : i32
    %c0_i32_0 = arith.constant 0 : i32
    %c0_i32_1 = arith.constant 0 : i32
    return %c0_i32, %c0_i32_0 : i32, i32
  }
  func.func @transform_3(%arg0: i32) -> (i32, i32) {
    %c0_i32 = arith.constant 0 : i32
    %c0_i32_0 = arith.constant 0 : i32
    %c0_i32_1 = arith.constant 0 : i32
    return %c0_i32, %c0_i32_0 : i32, i32
  }
  func.func @transform_4(%arg0: i32) -> (i32, i32) {
    %c0_i32 = arith.constant 0 : i32
    %c0_i32_0 = arith.constant 0 : i32
    return %arg0, %c0_i32 : i32, i32
  }
}

module attributes {stable_mosaic.version = 11 : i64} {
  func.func @_conv_bn_relu_pool_kernel(%arg0: i32, %arg1: memref<4x112x400xbf16, #tpu.memory_space<vmem>>, %arg2: memref<400x128xbf16, #tpu.memory_space<vmem>>, %arg3: memref<1x128xf32, #tpu.memory_space<vmem>>, %arg4: memref<1x128xf32, #tpu.memory_space<vmem>>, %arg5: memref<112x128xbf16, #tpu.memory_space<vmem>>) attributes {dimension_semantics = [#tpu.dimension_semantics<parallel>], iteration_bounds = array<i64: 1>, scalar_prefetch = 0 : i64, scratch_operands = 0 : i64, tpu.core_type = #tpu.core_type<tc>, window_params = [{transform_indices = @transform_0, window_bounds = array<i64: 4, 112, 400>}, {pipeline_mode = #tpu.pipeline_mode<synchronous>, transform_indices = @transform_1, window_bounds = array<i64: 400, 128>}, {pipeline_mode = #tpu.pipeline_mode<synchronous>, transform_indices = @transform_2, window_bounds = array<i64: 1, 128>}, {pipeline_mode = #tpu.pipeline_mode<synchronous>, transform_indices = @transform_3, window_bounds = array<i64: 1, 128>}, {transform_indices = @transform_4, window_bounds = array<i64: 112, 128>}]} {
    %c0 = arith.constant 0 : index
    %c0_0 = arith.constant 0 : index
    %0 = vector.load %arg2[%c0, %c0_0] : memref<400x128xbf16, #tpu.memory_space<vmem>>, vector<400x128xbf16>
    %c0_1 = arith.constant 0 : index
    %c0_2 = arith.constant 0 : index
    %1 = vector.load %arg3[%c0_1, %c0_2] : memref<1x128xf32, #tpu.memory_space<vmem>>, vector<1x128xf32>
    %c0_3 = arith.constant 0 : index
    %c0_4 = arith.constant 0 : index
    %2 = vector.load %arg4[%c0_3, %c0_4] : memref<1x128xf32, #tpu.memory_space<vmem>>, vector<1x128xf32>
    %c0_5 = arith.constant 0 : index
    %c0_6 = arith.constant 0 : index
    %c0_7 = arith.constant 0 : index
    %3 = vector.load %arg1[%c0_5, %c0_6, %c0_7] : memref<4x112x400xbf16, #tpu.memory_space<vmem>>, vector<1x112x400xbf16>
    %4 = vector.shape_cast %3 : vector<1x112x400xbf16> to vector<112x400xbf16>
    %cst = arith.constant dense<0.000000e+00> : vector<112x128xf32>
    %5 = tpu.matmul %4, %0, %cst {dimension_numbers = #tpu.dot_dimension_numbers<[1], [0], [0], [1], [0, 0, 1, 1], [], []>} : vector<112x400xbf16>, vector<400x128xbf16>, vector<112x128xf32> -> vector<112x128xf32>
    %6 = vector.broadcast %1 : vector<1x128xf32> to vector<112x128xf32>
    %7 = arith.mulf %5, %6 : vector<112x128xf32>
    %8 = vector.broadcast %2 : vector<1x128xf32> to vector<112x128xf32>
    %9 = arith.addf %7, %8 : vector<112x128xf32>
    %cst_8 = arith.constant 0.000000e+00 : f32
    %10 = vector.broadcast %cst_8 : f32 to vector<112x128xf32>
    %11 = arith.maximumf %9, %10 : vector<112x128xf32>
    %c1 = arith.constant 1 : index
    %c0_9 = arith.constant 0 : index
    %c0_10 = arith.constant 0 : index
    %12 = vector.load %arg1[%c1, %c0_9, %c0_10] : memref<4x112x400xbf16, #tpu.memory_space<vmem>>, vector<1x112x400xbf16>
    %13 = vector.shape_cast %12 : vector<1x112x400xbf16> to vector<112x400xbf16>
    %cst_11 = arith.constant dense<0.000000e+00> : vector<112x128xf32>
    %14 = tpu.matmul %13, %0, %cst_11 {dimension_numbers = #tpu.dot_dimension_numbers<[1], [0], [0], [1], [0, 0, 1, 1], [], []>} : vector<112x400xbf16>, vector<400x128xbf16>, vector<112x128xf32> -> vector<112x128xf32>
    %15 = vector.broadcast %1 : vector<1x128xf32> to vector<112x128xf32>
    %16 = arith.mulf %14, %15 : vector<112x128xf32>
    %17 = vector.broadcast %2 : vector<1x128xf32> to vector<112x128xf32>
    %18 = arith.addf %16, %17 : vector<112x128xf32>
    %cst_12 = arith.constant 0.000000e+00 : f32
    %19 = vector.broadcast %cst_12 : f32 to vector<112x128xf32>
    %20 = arith.maximumf %18, %19 : vector<112x128xf32>
    %21 = arith.maximumf %11, %20 : vector<112x128xf32>
    %c2 = arith.constant 2 : index
    %c0_13 = arith.constant 0 : index
    %c0_14 = arith.constant 0 : index
    %22 = vector.load %arg1[%c2, %c0_13, %c0_14] : memref<4x112x400xbf16, #tpu.memory_space<vmem>>, vector<1x112x400xbf16>
    %23 = vector.shape_cast %22 : vector<1x112x400xbf16> to vector<112x400xbf16>
    %cst_15 = arith.constant dense<0.000000e+00> : vector<112x128xf32>
    %24 = tpu.matmul %23, %0, %cst_15 {dimension_numbers = #tpu.dot_dimension_numbers<[1], [0], [0], [1], [0, 0, 1, 1], [], []>} : vector<112x400xbf16>, vector<400x128xbf16>, vector<112x128xf32> -> vector<112x128xf32>
    %25 = vector.broadcast %1 : vector<1x128xf32> to vector<112x128xf32>
    %26 = arith.mulf %24, %25 : vector<112x128xf32>
    %27 = vector.broadcast %2 : vector<1x128xf32> to vector<112x128xf32>
    %28 = arith.addf %26, %27 : vector<112x128xf32>
    %cst_16 = arith.constant 0.000000e+00 : f32
    %29 = vector.broadcast %cst_16 : f32 to vector<112x128xf32>
    %30 = arith.maximumf %28, %29 : vector<112x128xf32>
    %c3 = arith.constant 3 : index
    %c0_17 = arith.constant 0 : index
    %c0_18 = arith.constant 0 : index
    %31 = vector.load %arg1[%c3, %c0_17, %c0_18] : memref<4x112x400xbf16, #tpu.memory_space<vmem>>, vector<1x112x400xbf16>
    %32 = vector.shape_cast %31 : vector<1x112x400xbf16> to vector<112x400xbf16>
    %cst_19 = arith.constant dense<0.000000e+00> : vector<112x128xf32>
    %33 = tpu.matmul %32, %0, %cst_19 {dimension_numbers = #tpu.dot_dimension_numbers<[1], [0], [0], [1], [0, 0, 1, 1], [], []>} : vector<112x400xbf16>, vector<400x128xbf16>, vector<112x128xf32> -> vector<112x128xf32>
    %34 = vector.broadcast %1 : vector<1x128xf32> to vector<112x128xf32>
    %35 = arith.mulf %33, %34 : vector<112x128xf32>
    %36 = vector.broadcast %2 : vector<1x128xf32> to vector<112x128xf32>
    %37 = arith.addf %35, %36 : vector<112x128xf32>
    %cst_20 = arith.constant 0.000000e+00 : f32
    %38 = vector.broadcast %cst_20 : f32 to vector<112x128xf32>
    %39 = arith.maximumf %37, %38 : vector<112x128xf32>
    %40 = arith.maximumf %30, %39 : vector<112x128xf32>
    %41 = arith.maximumf %21, %40 : vector<112x128xf32>
    %42 = arith.truncf %41 : vector<112x128xf32> to vector<112x128xbf16>
    %c0_21 = arith.constant 0 : index
    %c0_22 = arith.constant 0 : index
    %43 = vector.load %arg5[%c0_21, %c0_22] : memref<112x128xbf16, #tpu.memory_space<vmem>>, vector<112x128xbf16>
    tpu.vector_store %arg5[%c0_21, %c0_22], %42 {strides = array<i32>} : memref<112x128xbf16, #tpu.memory_space<vmem>>, vector<112x128xbf16>,
    return
  }
  func.func @transform_0(%arg0: i32) -> (i32, i32, i32) {
    %c0_i32 = arith.constant 0 : i32
    %c0_i32_0 = arith.constant 0 : i32
    %c0_i32_1 = arith.constant 0 : i32
    return %c0_i32, %arg0, %c0_i32_0 : i32, i32, i32
  }
  func.func @transform_1(%arg0: i32) -> (i32, i32) {
    %c0_i32 = arith.constant 0 : i32
    %c0_i32_0 = arith.constant 0 : i32
    %c0_i32_1 = arith.constant 0 : i32
    return %c0_i32, %c0_i32_0 : i32, i32
  }
  func.func @transform_2(%arg0: i32) -> (i32, i32) {
    %c0_i32 = arith.constant 0 : i32
    %c0_i32_0 = arith.constant 0 : i32
    %c0_i32_1 = arith.constant 0 : i32
    return %c0_i32, %c0_i32_0 : i32, i32
  }
  func.func @transform_3(%arg0: i32) -> (i32, i32) {
    %c0_i32 = arith.constant 0 : i32
    %c0_i32_0 = arith.constant 0 : i32
    %c0_i32_1 = arith.constant 0 : i32
    return %c0_i32, %c0_i32_0 : i32, i32
  }
  func.func @transform_4(%arg0: i32) -> (i32, i32) {
    %c0_i32 = arith.constant 0 : i32
    %c0_i32_0 = arith.constant 0 : i32
    return %arg0, %c0_i32 : i32, i32
  }
}

module attributes {stable_mosaic.version = 11 : i64} {
  func.func @_linear_kernel(%arg0: i32, %arg1: memref<16x1568xbf16, #tpu.memory_space<vmem>>, %arg2: memref<1568x128xbf16, #tpu.memory_space<vmem>>, %arg3: memref<1x128xf32, #tpu.memory_space<vmem>>, %arg4: memref<16x128xf32, #tpu.memory_space<vmem>>) attributes {dimension_semantics = [#tpu.dimension_semantics<parallel>], iteration_bounds = array<i64: 1>, scalar_prefetch = 0 : i64, scratch_operands = 0 : i64, tpu.core_type = #tpu.core_type<tc>, window_params = [{transform_indices = @transform_0, window_bounds = array<i64: 16, 1568>}, {pipeline_mode = #tpu.pipeline_mode<synchronous>, transform_indices = @transform_1, window_bounds = array<i64: 1568, 128>}, {pipeline_mode = #tpu.pipeline_mode<synchronous>, transform_indices = @transform_2, window_bounds = array<i64: 1, 128>}, {transform_indices = @transform_3, window_bounds = array<i64: 16, 128>}]} {
    %c0 = arith.constant 0 : index
    %c0_0 = arith.constant 0 : index
    %0 = vector.load %arg1[%c0, %c0_0] : memref<16x1568xbf16, #tpu.memory_space<vmem>>, vector<16x1568xbf16>
    %c0_1 = arith.constant 0 : index
    %c0_2 = arith.constant 0 : index
    %1 = vector.load %arg2[%c0_1, %c0_2] : memref<1568x128xbf16, #tpu.memory_space<vmem>>, vector<1568x128xbf16>
    %cst = arith.constant dense<0.000000e+00> : vector<16x128xf32>
    %2 = tpu.matmul %0, %1, %cst {dimension_numbers = #tpu.dot_dimension_numbers<[1], [0], [0], [1], [0, 0, 1, 1], [], []>} : vector<16x1568xbf16>, vector<1568x128xbf16>, vector<16x128xf32> -> vector<16x128xf32>
    %c0_3 = arith.constant 0 : index
    %c0_4 = arith.constant 0 : index
    %3 = vector.load %arg3[%c0_3, %c0_4] : memref<1x128xf32, #tpu.memory_space<vmem>>, vector<1x128xf32>
    %4 = vector.broadcast %3 : vector<1x128xf32> to vector<16x128xf32>
    %5 = arith.addf %2, %4 : vector<16x128xf32>
    %c0_5 = arith.constant 0 : index
    %c0_6 = arith.constant 0 : index
    %6 = vector.load %arg4[%c0_5, %c0_6] : memref<16x128xf32, #tpu.memory_space<vmem>>, vector<16x128xf32>
    tpu.vector_store %arg4[%c0_5, %c0_6], %5 {strides = array<i32>} : memref<16x128xf32, #tpu.memory_space<vmem>>, vector<16x128xf32>,
    return
  }
  func.func @transform_0(%arg0: i32) -> (i32, i32) {
    %c0_i32 = arith.constant 0 : i32
    %c0_i32_0 = arith.constant 0 : i32
    return %arg0, %c0_i32 : i32, i32
  }
  func.func @transform_1(%arg0: i32) -> (i32, i32) {
    %c0_i32 = arith.constant 0 : i32
    %c0_i32_0 = arith.constant 0 : i32
    %c0_i32_1 = arith.constant 0 : i32
    return %c0_i32, %c0_i32_0 : i32, i32
  }
  func.func @transform_2(%arg0: i32) -> (i32, i32) {
    %c0_i32 = arith.constant 0 : i32
    %c0_i32_0 = arith.constant 0 : i32
    %c0_i32_1 = arith.constant 0 : i32
    return %c0_i32, %c0_i32_0 : i32, i32
  }
  func.func @transform_3(%arg0: i32) -> (i32, i32) {
    %c0_i32 = arith.constant 0 : i32
    %c0_i32_0 = arith.constant 0 : i32
    return %arg0, %c0_i32 : i32, i32
  }
}

</mosaic_0001>

<bundles_post_ra>
// kernel: cnn_fashion_mnist_forward.3
= control target key start
LH: loop header
LB: loop body
LE: loop exit
PB: predicated region body
PF: predicated region fallthrough
CT: control target
= control target key end

     0   :  { %s2065_s15 = smov 0   ;;  %s2067_s16 = smov 0   ;;  %s2483_s0 = inlined_call_operand.vmem [shape: bf16[4,512,25], index: 0, kind: input, shape index: {}]   ;;  %s2484_s1 = inlined_call_operand.vmem [shape: bf16[25,128], index: 1, kind: input, shape index: {}]   ;;  %s2485_s2 = inlined_call_operand.vmem [shape: f32[1,128], index: 2, kind: input, shape index: {}]   ;;  %s2486_s3 = inlined_call_operand.vmem [shape: f32[1,128], index: 3, kind: input, shape index: {}]   ;;  %s2487_s4 = inlined_call_operand.vmem [shape: bf16[512,128], index: 4, kind: output, shape index: {}]  }
   0x1   :  { %s2069_s17 = smov 0  }
   0x2 LB: > { %s1627_s18 = sadd.s32 4294967295, %s2037_s17   ;;  %s2082_s19 = sadd.s32 1, %s2037_s17   ;;  %s2037_s17 = sphi %s2069_s17, %s2490_s17   ;;  %s2033_s16 = sphi %s2067_s16, %s2489_s16   ;;  %s2029_s15 = sphi %s2065_s15, %s2488_s15  }
   0x3   : > { %s18_s20 = ssub.s32 %s2037_s17, %s2082_s19  ;;  %s21_s21 = sadd.s32 1, %s2033_s16 }
   0x4   : > { %p19_p0 = scmp.eq.s32.totalorder %s18_s20, 0  ;;  %p28_p1 = scmp.ne.s32.totalorder %s2033_s16, %s2029_s15 }
   0x5   : > { %p29_p2 = scmp.eq.s32.totalorder %s2037_s17, 0  ;;  %p1630_p4 = scmp.ge.s32.totalorder %s2037_s17, 4 }
   0x6   : > { %s2091_s22 = scalar_select %p19_p0, %s2033_s16, %s21_s21  }
   0x7   : > { %p30_p3 = por %p29_p2, %p28_p1  ;;  %152 = sbr.rel (%p1630_p4) target bundleno = 32 (0x20), region = 28 }
   0xc   : > { %155 = sbr.rel (!%p30_p3) target bundleno = 32 (0x20), region = 32  ;;  %s157_s23 = sand.u32 (%p30_p3), 1, %s2033_s16  }
   0xd   : > { %s1772_s24 = sshll.u32 (%p30_p3), %s2037_s17, 6  ;;  %s1631_s25 = sshll.u32 (%p30_p3), %s157_s23, 8 }
   0xe   : > { %s2099_s28 = scalar_lea.vmem (%p30_p3), %s2483_s0, %s1772_s24  ;;  %s2104_s29 = scalar_lea.vmem (%p30_p3), [#allocation2], %s1631_s25 }
   0xf   : > { %v179_v0 = vld [vmem:[%s2099_s28] sm:$0xff] (%p30_p3)   ;;  %v183_v1 = vld [vmem:[%s2099_s28 + $0x8] sm:$0xff] (%p30_p3)   ;;  %v187_v2 = vld [vmem:[%s2099_s28 + $0x10] sm:$0xff] (%p30_p3)  }
  0x10   : > { %180 = vst [vmem:[%s2104_s29] sm:$0xff] (%p30_p3), %v179_v0   ;;  %184 = vst [vmem:[%s2104_s29 + $0x8] sm:$0xff] (%p30_p3), %v183_v1   ;;  %v191_v3 = vld [vmem:[%s2099_s28 + $0x18] sm:$0xff] (%p30_p3)   ;;  %v195_v4 = vld [vmem:[%s2099_s28 + $0x20] sm:$0xff] (%p30_p3)  }
  0x11   : > { %188 = vst [vmem:[%s2104_s29 + $0x10] sm:$0xff] %v187_v2   ;;  %v199_v5 = vld [vmem:[%s2099_s28 + $0x28] sm:$0xff]   ;;  %192 = vst [vmem:[%s2104_s29 + $0x18] sm:$0xff] %v191_v3   ;;  %v203_v6 = vld [vmem:[%s2099_s28 + $0x30] sm:$0xff]  }
  0x12   : > { %196 = vst [vmem:[%s2104_s29 + $0x20] sm:$0xff] %v195_v4   ;;  %200 = vst [vmem:[%s2104_s29 + $0x28] sm:$0xff] %v199_v5   ;;  %v207_v7 = vld [vmem:[%s2099_s28 + $0x38] sm:$0xff]   ;;  %v211_v8 = vld [vmem:[%s2099_s28 + $0x100] sm:$0xff]  }
  0x13   : > { %204 = vst [vmem:[%s2104_s29 + $0x30] sm:$0xff] %v203_v6   ;;  %208 = vst [vmem:[%s2104_s29 + $0x38] sm:$0xff] %v207_v7   ;;  %v215_v9 = vld [vmem:[%s2099_s28 + $0x108] sm:$0xff]   ;;  %v219_v10 = vld [vmem:[%s2099_s28 + $0x110] sm:$0xff]  }
  0x14   : > { %212 = vst [vmem:[%s2104_s29 + $0x40] sm:$0xff] %v211_v8   ;;  %v223_v11 = vld [vmem:[%s2099_s28 + $0x118] sm:$0xff]   ;;  %216 = vst [vmem:[%s2104_s29 + $0x48] sm:$0xff] %v215_v9   ;;  %v227_v12 = vld [vmem:[%s2099_s28 + $0x120] sm:$0xff]  }
  0x15   : > { %220 = vst [vmem:[%s2104_s29 + $0x50] sm:$0xff] %v219_v10   ;;  %224 = vst [vmem:[%s2104_s29 + $0x58] sm:$0xff] %v223_v11   ;;  %v231_v13 = vld [vmem:[%s2099_s28 + $0x128] sm:$0xff]   ;;  %v235_v14 = vld [vmem:[%s2099_s28 + $0x130] sm:$0xff]  }
  0x16   : > { %228 = vst [vmem:[%s2104_s29 + $0x60] sm:$0xff] %v227_v12   ;;  %232 = vst [vmem:[%s2104_s29 + $0x68] sm:$0xff] %v231_v13   ;;  %v239_v15 = vld [vmem:[%s2099_s28 + $0x138] sm:$0xff]   ;;  %v243_v16 = vld [vmem:[%s2099_s28 + $0x200] sm:$0xff]  }
  0x17   : > { %236 = vst [vmem:[%s2104_s29 + $0x70] sm:$0xff] %v235_v14   ;;  %v247_v17 = vld [vmem:[%s2099_s28 + $0x208] sm:$0xff]   ;;  %240 = vst [vmem:[%s2104_s29 + $0x78] sm:$0xff] %v239_v15   ;;  %v251_v18 = vld [vmem:[%s2099_s28 + $0x210] sm:$0xff]  }
  0x18   : > { %244 = vst [vmem:[%s2104_s29 + $0x80] sm:$0xff] %v243_v16   ;;  %248 = vst [vmem:[%s2104_s29 + $0x88] sm:$0xff] %v247_v17   ;;  %v255_v19 = vld [vmem:[%s2099_s28 + $0x218] sm:$0xff]   ;;  %v259_v20 = vld [vmem:[%s2099_s28 + $0x220] sm:$0xff]  }
  0x19   : > { %252 = vst [vmem:[%s2104_s29 + $0x90] sm:$0xff] %v251_v18   ;;  %256 = vst [vmem:[%s2104_s29 + $0x98] sm:$0xff] %v255_v19   ;;  %v263_v21 = vld [vmem:[%s2099_s28 + $0x228] sm:$0xff]   ;;  %v267_v22 = vld [vmem:[%s2099_s28 + $0x230] sm:$0xff]  }
  0x1a   : > { %260 = vst [vmem:[%s2104_s29 + $0xa0] sm:$0xff] %v259_v20   ;;  %v271_v23 = vld [vmem:[%s2099_s28 + $0x238] sm:$0xff]   ;;  %264 = vst [vmem:[%s2104_s29 + $0xa8] sm:$0xff] %v263_v21   ;;  %v275_v24 = vld [vmem:[%s2099_s28 + $0x300] sm:$0xff]  }
  0x1b   : > { %268 = vst [vmem:[%s2104_s29 + $0xb0] sm:$0xff] %v267_v22   ;;  %272 = vst [vmem:[%s2104_s29 + $0xb8] sm:$0xff] %v271_v23   ;;  %v279_v25 = vld [vmem:[%s2099_s28 + $0x308] sm:$0xff]   ;;  %v283_v26 = vld [vmem:[%s2099_s28 + $0x310] sm:$0xff]  }
  0x1c   : > { %276 = vst [vmem:[%s2104_s29 + $0xc0] sm:$0xff] %v275_v24   ;;  %280 = vst [vmem:[%s2104_s29 + $0xc8] sm:$0xff] %v279_v25   ;;  %v287_v27 = vld [vmem:[%s2099_s28 + $0x318] sm:$0xff]   ;;  %v291_v28 = vld [vmem:[%s2099_s28 + $0x320] sm:$0xff]  }
  0x1d   : > { %284 = vst [vmem:[%s2104_s29 + $0xd0] sm:$0xff] %v283_v26   ;;  %v295_v29 = vld [vmem:[%s2099_s28 + $0x328] sm:$0xff]   ;;  %288 = vst [vmem:[%s2104_s29 + $0xd8] sm:$0xff] %v287_v27   ;;  %v299_v30 = vld [vmem:[%s2099_s28 + $0x330] sm:$0xff]  }
  0x1e   : > { %292 = vst [vmem:[%s2104_s29 + $0xe0] sm:$0xff] %v291_v28   ;;  %296 = vst [vmem:[%s2104_s29 + $0xe8] sm:$0xff] %v295_v29   ;;  %v303_v31 = vld [vmem:[%s2099_s28 + $0x338] sm:$0xff]  }
  0x1f   : > { %300 = vst [vmem:[%s2104_s29 + $0xf0] sm:$0xff] %v299_v30   ;;  %304 = vst [vmem:[%s2104_s29 + $0xf8] sm:$0xff] %v303_v31  }
  0x20 PF: > { %p1634_p5 = scmp.ge.s32.totalorder %s2037_s17, 1  ;;  %p457_p6 = scmp.lt.s32.totalorder %s2037_s17, 5 }
  0x22   : > { %p458_p7 = pnand %p1634_p5, %p457_p6 }
  0x23   : > { %s464_s6 = sand.u32 (!%p458_p7), 1, %s2029_s15   ;;  %s2346_s15 = sshll.u32 (!%p458_p7), %s1627_s18, 4 }
  0x24   : > { %461 = sbr.rel (%p458_p7) target bundleno = 324 (0x144), region = 73  ;;  %s1635_s7 = sshll.u32 (!%p458_p7), %s464_s6, 8 }
  0x25   : > { %s2176_s10 = scalar_lea.vmem (!%p458_p7), [#allocation2], %s1635_s7  ;;  %p491_p8 = scmp.lt.s32.totalorder (!%p458_p7), %s2346_s15, 63 }
  0x29   : > { %v1981_v32 = vld [vmem:[%s2484_s1 + $0x8] sm:$0x1f]   ;;  %vm595_vm0 = vcmask 1043456   ;;  %vm596_vm1 = vcmask 1044480   ;;  %v2039_v33 = vmov 65535   ;;  %v1982_v37 = vld [vmem:[%s2484_s1] sm:$0xff]  }
  0x2a   : > { %v597_v34 = vsel %vm595_vm0, 4294967295, %v2039_v33  ;;  %v1983_v38 = vld [vmem:[%s2176_s10] sm:$0xff]   ;;  %vm570_vm2 = vcmask 203776   ;;  %v1985_v40 = vld [vmem:[%s2176_s10 + $0x8] sm:$0xff]   ;;  %v1987_v42 = vld [vmem:[%s2176_s10 + $0x10] sm:$0xff]   ;;  %s2492_s15 = smov (!%p491_p8, %s2346_s15), 63 }
  0x2b   : > { %v598_v35 = vsel %vm596_vm1, %v597_v34, 0  ;;  %v1984_v39 = vld [vmem:[%s2176_s10 + $0x40] sm:$0xff]   ;;  %1880 = vmatprep.mubr.msk.bf16.mxu0 %vm570_vm2, %v1983_v38  ;;  %v1986_v41 = vld [vmem:[%s2176_s10 + $0x48] sm:$0xff]   ;;  %v1988_v43 = vld [vmem:[%s2176_s10 + $0x50] sm:$0xff]   ;;  %s1637_s17 = sshll.u32 %s2492_s15, 2 }
  0x2c   : > { %v600_v36 = vand.u32 %v1981_v32, %v598_v35  ;;  %1900 = vmatprep.mubr.msk.bf16.mxu1 %vm570_vm2, %v1984_v39  ;;  %v1989_v44 = vld [vmem:[%s2176_s10 + $0x18] sm:$0xff]   ;;  %v1991_v46 = vld [vmem:[%s2176_s10 + $0x20] sm:$0xff]   ;;  %v1993_v48 = vld [vmem:[%s2176_s10 + $0x28] sm:$0xff]   ;;  %s2406_s21 = scalar_lea.vmem %s2487_s4, %s1637_s17 }
  0x2d   : > { %v1990_v45 = vld [vmem:[%s2176_s10 + $0x58] sm:$0xff]   ;;  %v1992_v47 = vld [vmem:[%s2176_s10 + $0x60] sm:$0xff]   ;;  %v1994_v49 = vld [vmem:[%s2176_s10 + $0x68] sm:$0xff]  }
  0x2e   : > { %1876 = vmatprep.subr.bf16.mxu0 %v600_v36  ;;  %1896 = vmatprep.subr.bf16.mxu1 %v600_v36  ;;  %v1995_v50 = vld [vmem:[%s2176_s10 + $0x30] sm:$0xff]   ;;  %v1997_v52 = vld [vmem:[%s2176_s10 + $0x38] sm:$0xff]   ;;  %v1999_v54 = vld [vmem:[%s2176_s10 + $0x80] sm:$0xff]  }
  0x2f   : > { %1877 = vmatpush3.bf16.msra.mxu0 %v600_v36  ;;  %1897 = vmatpush3.bf16.msra.mxu1 %v600_v36  ;;  %v1996_v51 = vld [vmem:[%s2176_s10 + $0x70] sm:$0xff]   ;;  %v1998_v53 = vld [vmem:[%s2176_s10 + $0x78] sm:$0xff]   ;;  %v2000_v55 = vld [vmem:[%s2176_s10 + $0xc0] sm:$0xff]  }
  0x30   : > { %1878 = vmatprep.subr.bf16.mxu0 %v1982_v37  ;;  %1898 = vmatprep.subr.bf16.mxu1 %v1982_v37  ;;  %v2001_v56 = vld [vmem:[%s2176_s10 + $0x88] sm:$0xff]   ;;  %v2003_v58 = vld [vmem:[%s2176_s10 + $0x90] sm:$0xff]   ;;  %v2005_v60 = vld [vmem:[%s2176_s10 + $0x98] sm:$0xff]  }
  0x31   : > { %v2002_v57 = vld [vmem:[%s2176_s10 + $0xc8] sm:$0xff]   ;;  %v2004_v59 = vld [vmem:[%s2176_s10 + $0xd0] sm:$0xff]   ;;  %v2006_v61 = vld [vmem:[%s2176_s10 + $0xd8] sm:$0xff]  }
  0x32   : > { %v2007_v62 = vld [vmem:[%s2176_s10 + $0xa0] sm:$0xff]   ;;  %v2009_v0 = vld [vmem:[%s2176_s10 + $0xa8] sm:$0xff]   ;;  %v2011_v2 = vld [vmem:[%s2176_s10 + $0xb0] sm:$0xff]  }
  0x33   : > { %1879 = vmatpush3.bf16.msra.mxu0 %v1982_v37  ;;  %1899 = vmatpush3.bf16.msra.mxu1 %v1982_v37  ;;  %v2008_v63 = vld [vmem:[%s2176_s10 + $0xe0] sm:$0xff]   ;;  %v2010_v1 = vld [vmem:[%s2176_s10 + $0xe8] sm:$0xff]   ;;  %v2012_v3 = vld [vmem:[%s2176_s10 + $0xf0] sm:$0xff]  }
  0x34   : > { %1916 = vmatprep.subr.bf16.mxu0 %v600_v36  ;;  %1936 = vmatprep.subr.bf16.mxu1 %v600_v36  ;;  %v2013_v4 = vld [vmem:[%s2176_s10 + $0xb8] sm:$0xff]   ;;  %v2245_v10 = vld [vmem:[%s2485_s2] ss:$0 sm:$0xff] }
  0x35   : > { %v2014_v5 = vld [vmem:[%s2176_s10 + $0xf8] sm:$0xff]   ;;  %v2252_v17 = vld [vmem:[%s2486_s3] ss:$0 sm:$0xff] }
  0x36   : > { %1881 = vmatmul.mubr.msk.bf16.vlgmr.msra.gmra.mxu0 %vm570_vm2, %v1985_v40  ;;  %1901 = vmatmul.mubr.msk.bf16.vlgmr.msra.gmra.mxu1 %vm570_vm2, %v1986_v41 }
  0x37   : > { %1917 = vmatpush3.bf16.msra.mxu0 %v600_v36  ;;  %1937 = vmatpush3.bf16.msra.mxu1 %v600_v36 }
  0x38   : > { %1884 = vmatprep.mubr.msk.bf16.mxu0 %vm570_vm2, %v1987_v42  ;;  %1904 = vmatprep.mubr.msk.bf16.mxu1 %vm570_vm2, %v1988_v43 }
  0x39   : > { %1918 = vmatprep.subr.bf16.mxu0 %v1982_v37  ;;  %1938 = vmatprep.subr.bf16.mxu1 %v1982_v37 }
  0x3b   : > { %1919 = vmatpush3.bf16.msra.mxu0 %v1982_v37  ;;  %1939 = vmatpush3.bf16.msra.mxu1 %v1982_v37 }
  0x3e   : > { %1885 = vmatmul.mubr.msk.bf16.gmra.mxu0 %vm570_vm2, %v1989_v44  ;;  %1905 = vmatmul.mubr.msk.bf16.gmra.mxu1 %vm570_vm2, %v1990_v45 }
  0x3f   : > { %1888 = vmatprep.mubr.msk.bf16.mxu0 %vm570_vm2, %v1991_v46  ;;  %1908 = vmatprep.mubr.msk.bf16.mxu1 %vm570_vm2, %v1992_v47 }
  0x46   : > { %1889 = vmatmul.mubr.msk.bf16.gmra.mxu0 %vm570_vm2, %v1993_v48  ;;  %1909 = vmatmul.mubr.msk.bf16.gmra.mxu1 %vm570_vm2, %v1994_v49 }
  0x47   : > { %1892 = vmatprep.mubr.msk.bf16.mxu0 %vm570_vm2, %v1995_v50  ;;  %1912 = vmatprep.mubr.msk.bf16.mxu1 %vm570_vm2, %v1996_v51 }
  0x4e   : > { %1893 = vmatmul.mubr.msk.bf16.gmra.mxu0 %vm570_vm2, %v1997_v52  ;;  %1913 = vmatmul.mubr.msk.bf16.gmra.mxu1 %vm570_vm2, %v1998_v53 }
  0x4f   : > { %1920 = vmatprep.mubr.msk.bf16.mxu0 %vm570_vm2, %v1999_v54  ;;  %1940 = vmatprep.mubr.msk.bf16.mxu1 %vm570_vm2, %v2000_v55 }
  0x56   : > { %1921 = vmatmul.mubr.msk.bf16.vlgmr.msra.gmra.mxu0 %vm570_vm2, %v2001_v56  ;;  %1941 = vmatmul.mubr.msk.bf16.vlgmr.msra.gmra.mxu1 %vm570_vm2, %v2002_v57 }
  0x57   : > { %1924 = vmatprep.mubr.msk.bf16.mxu0 %vm570_vm2, %v2003_v58  ;;  %1944 = vmatprep.mubr.msk.bf16.mxu1 %vm570_vm2, %v2004_v59 }
  0x5e   : > { %1925 = vmatmul.mubr.msk.bf16.gmra.mxu0 %vm570_vm2, %v2005_v60  ;;  %1945 = vmatmul.mubr.msk.bf16.gmra.mxu1 %vm570_vm2, %v2006_v61 }
  0x5f   : > { %1928 = vmatprep.mubr.msk.bf16.mxu0 %vm570_vm2, %v2007_v62  ;;  %1948 = vmatprep.mubr.msk.bf16.mxu1 %vm570_vm2, %v2008_v63 }
  0x66   : > { %1929 = vmatmul.mubr.msk.bf16.gmra.mxu0 %vm570_vm2, %v2009_v0  ;;  %1949 = vmatmul.mubr.msk.bf16.gmra.mxu1 %vm570_vm2, %v2010_v1 }
  0x67   : > { %1932 = vmatprep.mubr.msk.bf16.mxu0 %vm570_vm2, %v2011_v2  ;;  %1952 = vmatprep.mubr.msk.bf16.mxu1 %vm570_vm2, %v2012_v3 }
  0x6e   : > { %1933 = vmatmul.mubr.msk.bf16.gmra.mxu0 %vm570_vm2, %v2013_v4  ;;  %1953 = vmatmul.mubr.msk.bf16.gmra.mxu1 %vm570_vm2, %v2014_v5 }
  0xf6   : > { %v1882_v6 = vpop.f32.mrf.mxu0  ;;  %v1902_v7 = vpop.f32.mrf.mxu1 }
  0xf7   : > { %v707_v13 = vmul.f32 %v1882_v6, %v2245_v10  ;;  %v939_v14 = vmul.f32 %v1902_v7, %v2245_v10 }
  0xf8   : > { %v636_v8 = vpop.f32.mrf.mxu0  ;;  %v874_v9 = vpop.f32.mrf.mxu1 }
  0xf9   : > { %v705_v18 = vmul.f32 %v2245_v10, %v636_v8  ;;  %v937_v19 = vmul.f32 %v2245_v10, %v874_v9  ;;  %v729_v28 = vadd.f32 %v2252_v17, %v707_v13  ;;  %v955_v29 = vadd.f32 %v2252_v17, %v939_v14 }
  0xfa   : > { %v1883_v11 = vpop.f32.mrf.mxu0  ;;  %v1903_v12 = vpop.f32.mrf.mxu1 }
  0xfb   : > { %v708_v20 = vmul.f32 %v1883_v11, %v2245_v10  ;;  %v940_v21 = vmul.f32 %v1903_v12, %v2245_v10  ;;  %v727_v32 = vadd.f32 %v2252_v17, %v705_v18  ;;  %v953_v33 = vadd.f32 %v2252_v17, %v937_v19 }
  0xfc   : > { %v639_v15 = vpop.f32.mrf.mxu0  ;;  %v877_v16 = vpop.f32.mrf.mxu1  ;;  %v745_v43 = vmax.f32 %v729_v28, 0.0  ;;  %v971_v44 = vmax.f32 %v955_v29, 0.0 }
  0xfd   : > { %v706_v22 = vmul.f32 %v2245_v10, %v639_v15  ;;  %v938_v25 = vmul.f32 %v2245_v10, %v877_v16  ;;  %v730_v34 = vadd.f32 %v2252_v17, %v708_v20  ;;  %v956_v35 = vadd.f32 %v2252_v17, %v940_v21 }
  0xfe   : > { %v1886_v23 = vpop.f32.mrf.mxu0  ;;  %v1906_v24 = vpop.f32.mrf.mxu1  ;;  %v743_v48 = vmax.f32 %v727_v32, 0.0  ;;  %v969_v49 = vmax.f32 %v953_v33, 0.0  ;;  %v2277_v59 = vmax.f32 %v745_v43, %v971_v44 }
  0xff   : > { %v711_v26 = vmul.f32 %v1886_v23, %v2245_v10  ;;  %v943_v27 = vmul.f32 %v1906_v24, %v2245_v10  ;;  %v728_v36 = vadd.f32 %v2252_v17, %v706_v22  ;;  %v954_v39 = vadd.f32 %v2252_v17, %v938_v25 }
 0x100   : > { %v652_v30 = vpop.f32.mrf.mxu0  ;;  %v890_v31 = vpop.f32.mrf.mxu1  ;;  %v746_v50 = vmax.f32 %v730_v34, 0.0  ;;  %v972_v51 = vmax.f32 %v956_v35, 0.0  ;;  %v2284_v1 = vmax.f32 %v743_v48, %v969_v49 }
 0x101   : > { %v733_v40 = vadd.f32 %v2252_v17, %v711_v26  ;;  %v959_v41 = vadd.f32 %v2252_v17, %v943_v27  ;;  %v709_v42 = vmul.f32 %v2245_v10, %v652_v30  ;;  %v941_v45 = vmul.f32 %v2245_v10, %v890_v31 }
 0x102   : > { %v1887_v37 = vpop.f32.mrf.mxu0  ;;  %v1907_v38 = vpop.f32.mrf.mxu1  ;;  %v744_v52 = vmax.f32 %v728_v36, 0.0  ;;  %v970_v55 = vmax.f32 %v954_v39, 0.0  ;;  %v2289_v5 = vmax.f32 %v746_v50, %v972_v51 }
 0x103   : > { %v749_v56 = vmax.f32 %v733_v40, 0.0  ;;  %v975_v57 = vmax.f32 %v959_v41, 0.0  ;;  %v2275_v58 = vadd.f32 %v2252_v17, %v709_v42  ;;  %v2280_v60 = vadd.f32 %v2252_v17, %v941_v45 }
 0x104   : > { %v655_v46 = vpop.f32.mrf.mxu0  ;;  %v893_v47 = vpop.f32.mrf.mxu1  ;;  %v712_v61 = vmul.f32 %v1887_v37, %v2245_v10  ;;  %v944_v62 = vmul.f32 %v1907_v38, %v2245_v10  ;;  %v2294_v12 = vmax.f32 %v744_v52, %v970_v55 }
 0x105   : > { %v710_v2 = vmul.f32 %v2245_v10, %v655_v46  ;;  %v942_v3 = vmul.f32 %v2245_v10, %v893_v47  ;;  %v2296_v13 = vmax.f32 %v749_v56, %v975_v57  ;;  %v747_v14 = vmax.f32 %v2275_v58, 0.0 }
 0x106   : > { %v1890_v53 = vpop.f32.mrf.mxu0  ;;  %v1910_v54 = vpop.f32.mrf.mxu1  ;;  %v973_v16 = vmax.f32 %v2280_v60, 0.0  ;;  %v734_v18 = vadd.f32 %v2252_v17, %v712_v61  ;;  %v960_v19 = vadd.f32 %v2252_v17, %v944_v62 }
 0x107   : > { %v715_v4 = vmul.f32 %v1890_v53, %v2245_v10  ;;  %v947_v6 = vmul.f32 %v1910_v54, %v2245_v10  ;;  %v732_v23 = vadd.f32 %v2252_v17, %v710_v2  ;;  %v958_v24 = vadd.f32 %v2252_v17, %v942_v3 }
 0x108   : > { %v668_v63 = vpop.f32.mrf.mxu0  ;;  %v906_v0 = vpop.f32.mrf.mxu1  ;;  %v750_v37 = vmax.f32 %v734_v18, 0.0  ;;  %v976_v38 = vmax.f32 %v960_v19, 0.0 }
 0x109   : > { %v713_v7 = vmul.f32 %v2245_v10, %v668_v63  ;;  %v945_v8 = vmul.f32 %v2245_v10, %v906_v0  ;;  %v737_v25 = vadd.f32 %v2252_v17, %v715_v4  ;;  %v963_v27 = vadd.f32 %v2252_v17, %v947_v6 }
 0x10a   : > { %v1891_v9 = vpop.f32.mrf.mxu0  ;;  %v1911_v11 = vpop.f32.mrf.mxu1  ;;  %v748_v43 = vmax.f32 %v732_v23, 0.0  ;;  %v974_v44 = vmax.f32 %v958_v24, 0.0  ;;  %v2324_v0 = vmax.f32 %v747_v14, %v973_v16  ;;  %v2326_v2 = vmax.f32 %v750_v37, %v976_v38 }
 0x10b   : > { %v716_v15 = vmul.f32 %v1891_v9, %v2245_v10  ;;  %v948_v20 = vmul.f32 %v1911_v11, %v2245_v10  ;;  %v735_v28 = vadd.f32 %v2252_v17, %v713_v7  ;;  %v961_v29 = vadd.f32 %v2252_v17, %v945_v8 }
 0x10c   : > { %v671_v21 = vpop.f32.mrf.mxu0  ;;  %v909_v22 = vpop.f32.mrf.mxu1  ;;  %v753_v47 = vmax.f32 %v737_v25, 0.0  ;;  %v979_v48 = vmax.f32 %v963_v27, 0.0  ;;  %v2328_v6 = vmax.f32 %v748_v43, %v974_v44 }
 0x10d   : > { %v714_v26 = vmul.f32 %v2245_v10, %v671_v21  ;;  %v946_v30 = vmul.f32 %v2245_v10, %v909_v22  ;;  %v738_v33 = vadd.f32 %v2252_v17, %v716_v15  ;;  %v964_v34 = vadd.f32 %v2252_v17, %v948_v20 }
 0x10e   : > { %v1894_v31 = vpop.f32.mrf.mxu0  ;;  %v1914_v32 = vpop.f32.mrf.mxu1  ;;  %v751_v49 = vmax.f32 %v735_v28, 0.0  ;;  %v977_v53 = vmax.f32 %v961_v29, 0.0  ;;  %v2330_v7 = vmax.f32 %v753_v47, %v979_v48 }
 0x10f   : > { %v719_v35 = vmul.f32 %v1894_v31, %v2245_v10  ;;  %v951_v36 = vmul.f32 %v1914_v32, %v2245_v10  ;;  %v736_v39 = vadd.f32 %v2252_v17, %v714_v26  ;;  %v962_v40 = vadd.f32 %v2252_v17, %v946_v30 }
 0x110   : > { %v684_v41 = vpop.f32.mrf.mxu0  ;;  %v922_v42 = vpop.f32.mrf.mxu1  ;;  %v754_v54 = vmax.f32 %v738_v33, 0.0  ;;  %v980_v55 = vmax.f32 %v964_v34, 0.0  ;;  %v2338_v18 = vmax.f32 %v751_v49, %v977_v53 }
 0x111   : > { %v741_v45 = vadd.f32 %v2252_v17, %v719_v35  ;;  %v967_v46 = vadd.f32 %v2252_v17, %v951_v36  ;;  %v717_v50 = vmul.f32 %v2245_v10, %v684_v41  ;;  %v752_v57 = vmax.f32 %v736_v39, 0.0 }
 0x112   : > { %v1895_v51 = vpop.f32.mrf.mxu0  ;;  %v1915_v52 = vpop.f32.mrf.mxu1  ;;  %v978_v58 = vmax.f32 %v962_v40, 0.0  ;;  %v949_v60 = vmul.f32 %v2245_v10, %v922_v42  ;;  %v2340_v14 = vmax.f32 %v754_v54, %v980_v55 }
 0x113   : > { %v720_v56 = vmul.f32 %v1895_v51, %v2245_v10  ;;  %v952_v61 = vmul.f32 %v1915_v52, %v2245_v10  ;;  %v757_v3 = vmax.f32 %v741_v45, 0.0  ;;  %v983_v4 = vmax.f32 %v967_v46, 0.0 }
 0x114   : > { %v687_v62 = vpop.f32.mrf.mxu0  ;;  %v925_v63 = vpop.f32.mrf.mxu1  ;;  %v2333_v8 = vadd.f32 %v2252_v17, %v717_v50  ;;  %v2348_v20 = vmax.f32 %v752_v57, %v978_v58  ;;  %v2351_v21 = vadd.f32 %v2252_v17, %v949_v60 }
 0x115   : > { %v2336_v9 = vadd.f32 %v2252_v17, %v720_v56  ;;  %v2354_v22 = vadd.f32 %v2252_v17, %v952_v61  ;;  %v718_v23 = vmul.f32 %v2245_v10, %v687_v62  ;;  %v2357_v26 = vmax.f32 %v757_v3, %v983_v4 }
 0x116   : > { %v1922_v11 = vpop.f32.mrf.mxu0  ;;  %v1942_v15 = vpop.f32.mrf.mxu1  ;;  %v755_v30 = vmax.f32 %v2333_v8, 0.0  ;;  %v950_v32 = vmul.f32 %v2245_v10, %v925_v63 }
 0x117   : > { %v1181_v16 = vmul.f32 %v1922_v11, %v2245_v10  ;;  %v1407_v19 = vmul.f32 %v1942_v15, %v2245_v10  ;;  %v758_v31 = vmax.f32 %v2336_v9, 0.0  ;;  %v984_v40 = vmax.f32 %v2354_v22, 0.0 }
 0x118   : > { %v1116_v24 = vpop.f32.mrf.mxu0  ;;  %v1342_v25 = vpop.f32.mrf.mxu1  ;;  %v2371_v41 = vadd.f32 %v2252_v17, %v718_v23  ;;  %v2378_v50 = vadd.f32 %v2252_v17, %v950_v32 }
 0x119   : > { %v1197_v27 = vadd.f32 %v2252_v17, %v1181_v16  ;;  %v1423_v28 = vadd.f32 %v2252_v17, %v1407_v19  ;;  %v1179_v29 = vmul.f32 %v2245_v10, %v1116_v24  ;;  %v1405_v33 = vmul.f32 %v2245_v10, %v1342_v25 }
 0x11a   : > { %v1923_v34 = vpop.f32.mrf.mxu0  ;;  %v1943_v35 = vpop.f32.mrf.mxu1 }
 0x11b   : > { %v1213_v36 = vmax.f32 %v1197_v27, 0.0  ;;  %v1439_v37 = vmax.f32 %v1423_v28, 0.0  ;;  %v1195_v38 = vadd.f32 %v2252_v17, %v1179_v29  ;;  %v1182_v39 = vmul.f32 %v1923_v34, %v2245_v10 }
 0x11c   : > { %v1421_v42 = vadd.f32 %v2252_v17, %v1405_v33  ;;  %v1408_v43 = vmul.f32 %v1943_v35, %v2245_v10  ;;  %v1119_v44 = vpop.f32.mrf.mxu0  ;;  %v1345_v45 = vpop.f32.mrf.mxu1 }
 0x11d   : > { %v1455_v46 = vmax.f32 %v1213_v36, %v1439_v37  ;;  %v1211_v47 = vmax.f32 %v1195_v38, 0.0  ;;  %v1198_v48 = vadd.f32 %v2252_v17, %v1182_v39  ;;  %v1180_v49 = vmul.f32 %v2245_v10, %v1119_v44 }
 0x11e   : > { %v1437_v51 = vmax.f32 %v1421_v42, 0.0  ;;  %v1424_v52 = vadd.f32 %v2252_v17, %v1408_v43  ;;  %v1406_v53 = vmul.f32 %v2245_v10, %v1345_v45  ;;  %v1926_v54 = vpop.f32.mrf.mxu0  ;;  %v1946_v55 = vpop.f32.mrf.mxu1 }
 0x11f   : > { %v1471_v56 = vmax.f32 %v2277_v59, %v1455_v46  ;;  %v1214_v57 = vmax.f32 %v1198_v48, 0.0  ;;  %v1196_v58 = vadd.f32 %v2252_v17, %v1180_v49  ;;  %v1185_v60 = vmul.f32 %v1926_v54, %v2245_v10 }
 0x120   : > { %v1453_v61 = vmax.f32 %v1211_v47, %v1437_v51  ;;  %v1440_v62 = vmax.f32 %v1424_v52, 0.0  ;;  %v1422_v63 = vadd.f32 %v2252_v17, %v1406_v53  ;;  %v1411_v3 = vmul.f32 %v1946_v55, %v2245_v10  ;;  %v1132_v4 = vpop.f32.mrf.mxu0  ;;  %v1358_v11 = vpop.f32.mrf.mxu1 }
 0x121   : > { %v1212_v15 = vmax.f32 %v1196_v58, 0.0  ;;  %v1201_v16 = vadd.f32 %v2252_v17, %v1185_v60  ;;  %v1183_v19 = vmul.f32 %v2245_v10, %v1132_v4  ;;  %v1409_v59 = vmul.f32 %v2245_v10, %v1358_v11 }
 0x122   : > { %v1469_v23 = vmax.f32 %v2284_v1, %v1453_v61  ;;  %v1456_v24 = vmax.f32 %v1214_v57, %v1440_v62  ;;  %v1438_v25 = vmax.f32 %v1422_v63, 0.0  ;;  %v1427_v27 = vadd.f32 %v2252_v17, %v1411_v3  ;;  %v1927_v28 = vpop.f32.mrf.mxu0  ;;  %v1947_v29 = vpop.f32.mrf.mxu1 }
 0x123   : > { %v1217_v32 = vmax.f32 %v1201_v16, 0.0  ;;  %v1199_v33 = vadd.f32 %v2252_v17, %v1183_v19  ;;  %v1425_v34 = vadd.f32 %v2252_v17, %v1409_v59  ;;  %v1186_v35 = vmul.f32 %v1927_v28, %v2245_v10 }
 0x124   : > { %v1472_v36 = vmax.f32 %v2289_v5, %v1456_v24  ;;  %v1454_v37 = vmax.f32 %v1212_v15, %v1438_v25  ;;  %v1443_v38 = vmax.f32 %v1427_v27, 0.0  ;;  %v1412_v1 = vmul.f32 %v1947_v29, %v2245_v10  ;;  %v1135_v39 = vpop.f32.mrf.mxu0  ;;  %v1361_v42 = vpop.f32.mrf.mxu1 }
 0x125   : > { %v1215_v43 = vmax.f32 %v1199_v33, 0.0  ;;  %v1441_v44 = vmax.f32 %v1425_v34, 0.0  ;;  %v1202_v45 = vadd.f32 %v2252_v17, %v1186_v35  ;;  %v1184_v46 = vmul.f32 %v2245_v10, %v1135_v39 }
 0x126   : > { %v1797_v47 = vpack.c.bf16 %v1472_v36, %v1471_v56  ;;  %v1470_v5 = vmax.f32 %v2294_v12, %v1454_v37  ;;  %v1459_v48 = vmax.f32 %v1217_v32, %v1443_v38  ;;  %v1428_v49 = vadd.f32 %v2252_v17, %v1412_v1  ;;  %v1930_v51 = vpop.f32.mrf.mxu0  ;;  %v1950_v52 = vpop.f32.mrf.mxu1 }
 0x127   : > { %v1457_v53 = vmax.f32 %v1215_v43, %v1441_v44  ;;  %v1218_v54 = vmax.f32 %v1202_v45, 0.0  ;;  %v1200_v55 = vadd.f32 %v2252_v17, %v1184_v46  ;;  %v1410_v57 = vmul.f32 %v2245_v10, %v1361_v42 }
 0x128   : > { %1829 = vst [vmem:[%s2406_s21 + $0x8] sm:$0xff] %v1797_v47   ;;  %v1792_v58 = vpack.c.bf16 %v1470_v5, %v1469_v23  ;;  %v1475_v60 = vmax.f32 %v2296_v13, %v1459_v48  ;;  %v1444_v61 = vmax.f32 %v1428_v49, 0.0  ;;  %v1189_v56 = vmul.f32 %v1930_v51, %v2245_v10  ;;  %v1148_v12 = vpop.f32.mrf.mxu0  ;;  %v1374_v62 = vpop.f32.mrf.mxu1 }
 0x129   : > { %v1473_v63 = vmax.f32 %v2324_v0, %v1457_v53  ;;  %v1216_v3 = vmax.f32 %v1200_v55, 0.0  ;;  %v1426_v4 = vadd.f32 %v2252_v17, %v1410_v57  ;;  %v1415_v11 = vmul.f32 %v1950_v52, %v2245_v10 }
 0x12a   : > { %1793 = vst [vmem:[%s2406_s21] sm:$0xff] %v1792_v58   ;;  %v1460_v15 = vmax.f32 %v1218_v54, %v1444_v61  ;;  %v1205_v16 = vadd.f32 %v2252_v17, %v1189_v56  ;;  %v1187_v19 = vmul.f32 %v2245_v10, %v1148_v12  ;;  %v1413_v13 = vmul.f32 %v2245_v10, %v1374_v62  ;;  %v1931_v59 = vpop.f32.mrf.mxu0  ;;  %v1951_v23 = vpop.f32.mrf.mxu1 }
 0x12b   : > { %v1442_v24 = vmax.f32 %v1426_v4, 0.0  ;;  %v1431_v25 = vadd.f32 %v2252_v17, %v1415_v11  ;;  %v1190_v0 = vmul.f32 %v1931_v59, %v2245_v10  ;;  %v1416_v27 = vmul.f32 %v1951_v23, %v2245_v10 }
 0x12c   : > { %v1476_v28 = vmax.f32 %v2326_v2, %v1460_v15  ;;  %v1221_v29 = vmax.f32 %v1205_v16, 0.0  ;;  %v1203_v32 = vadd.f32 %v2252_v17, %v1187_v19  ;;  %v1429_v33 = vadd.f32 %v2252_v17, %v1413_v13  ;;  %v1151_v34 = vpop.f32.mrf.mxu0  ;;  %v1377_v35 = vpop.f32.mrf.mxu1 }
 0x12d   : > { %v1458_v36 = vmax.f32 %v1216_v3, %v1442_v24  ;;  %v1447_v37 = vmax.f32 %v1431_v25, 0.0  ;;  %v1206_v38 = vadd.f32 %v2252_v17, %v1190_v0  ;;  %v1432_v1 = vadd.f32 %v2252_v17, %v1416_v27 }
 0x12e   : > { %v1807_v39 = vpack.c.bf16 %v1476_v28, %v1475_v60  ;;  %v1219_v42 = vmax.f32 %v1203_v32, 0.0  ;;  %v1445_v43 = vmax.f32 %v1429_v33, 0.0  ;;  %v1188_v44 = vmul.f32 %v2245_v10, %v1151_v34  ;;  %v1934_v2 = vpop.f32.mrf.mxu0  ;;  %v1954_v45 = vpop.f32.mrf.mxu1 }
 0x12f   : > { %v1474_v46 = vmax.f32 %v2328_v6, %v1458_v36  ;;  %v1463_v47 = vmax.f32 %v1221_v29, %v1447_v37  ;;  %v1222_v5 = vmax.f32 %v1206_v38, 0.0  ;;  %v1448_v48 = vmax.f32 %v1432_v1, 0.0 }
 0x130   : > { %1831 = vst [vmem:[%s2406_s21 + $0x18] sm:$0xff] %v1807_v39   ;;  %v1461_v49 = vmax.f32 %v1219_v42, %v1445_v43  ;;  %v1204_v51 = vadd.f32 %v2252_v17, %v1188_v44  ;;  %v1414_v52 = vmul.f32 %v2245_v10, %v1377_v35  ;;  %v1193_v53 = vmul.f32 %v1934_v2, %v2245_v10  ;;  %v1164_v54 = vpop.f32.mrf.mxu0  ;;  %v1390_v55 = vpop.f32.mrf.mxu1 }
 0x131   : > { %v1802_v57 = vpack.c.bf16 %v1474_v46, %v1473_v63  ;;  %v1479_v58 = vmax.f32 %v2330_v7, %v1463_v47  ;;  %v1464_v60 = vmax.f32 %v1222_v5, %v1448_v48  ;;  %v1419_v6 = vmul.f32 %v1954_v45, %v2245_v10 }
 0x132   : > { %v1477_v61 = vmax.f32 %v2338_v18, %v1461_v49  ;;  %v1220_v56 = vmax.f32 %v1204_v51, 0.0  ;;  %v1430_v12 = vadd.f32 %v2252_v17, %v1414_v52  ;;  %v1209_v62 = vadd.f32 %v2252_v17, %v1193_v53  ;;  %v1935_v3 = vpop.f32.mrf.mxu0  ;;  %v1955_v4 = vpop.f32.mrf.mxu1 }
 0x133   : > { %1830 = vst [vmem:[%s2406_s21 + $0x10] sm:$0xff] %v1802_v57   ;;  %v1480_v11 = vmax.f32 %v2340_v14, %v1464_v60  ;;  %v1435_v15 = vadd.f32 %v2252_v17, %v1419_v6  ;;  %v1191_v63 = vmul.f32 %v2245_v10, %v1164_v54  ;;  %v1417_v7 = vmul.f32 %v2245_v10, %v1390_v55 }
 0x134   : > { %v1446_v16 = vmax.f32 %v1430_v12, 0.0  ;;  %v1225_v19 = vmax.f32 %v1209_v62, 0.0  ;;  %v1194_v18 = vmul.f32 %v1935_v3, %v2245_v10  ;;  %v1420_v13 = vmul.f32 %v1955_v4, %v2245_v10  ;;  %v1167_v59 = vpop.f32.mrf.mxu0  ;;  %v1393_v23 = vpop.f32.mrf.mxu1 }
 0x135   : > { %v1817_v24 = vpack.c.bf16 %v1480_v11, %v1479_v58  ;;  %v1451_v25 = vmax.f32 %v1435_v15, 0.0  ;;  %v1207_v0 = vadd.f32 %v2252_v17, %v1191_v63  ;;  %v1433_v14 = vadd.f32 %v2252_v17, %v1417_v7 }
 0x136   : > { %v1462_v27 = vmax.f32 %v1220_v56, %v1446_v16  ;;  %v1210_v28 = vadd.f32 %v2252_v17, %v1194_v18  ;;  %v1436_v29 = vadd.f32 %v2252_v17, %v1420_v13  ;;  %v1192_v32 = vmul.f32 %v2245_v10, %v1167_v59 }
 0x137   : > { %1833 = vst [vmem:[%s2406_s21 + $0x28] sm:$0xff] %v1817_v24   ;;  %v1467_v33 = vmax.f32 %v1225_v19, %v1451_v25  ;;  %v1223_v34 = vmax.f32 %v1207_v0, 0.0  ;;  %v1449_v35 = vmax.f32 %v1433_v14, 0.0  ;;  %v1418_v36 = vmul.f32 %v2245_v10, %v1393_v23 }
 0x138   : > { %v1478_v37 = vmax.f32 %v2348_v20, %v1462_v27  ;;  %v1226_v38 = vmax.f32 %v1210_v28, 0.0  ;;  %v1452_v1 = vmax.f32 %v1436_v29, 0.0  ;;  %v1208_v39 = vadd.f32 %v2252_v17, %v1192_v32 }
 0x139   : > { %v981_v42 = vmax.f32 %v2351_v21, 0.0  ;;  %v756_v43 = vmax.f32 %v2371_v41, 0.0  ;;  %v982_v44 = vmax.f32 %v2378_v50, 0.0  ;;  %v1434_v2 = vadd.f32 %v2252_v17, %v1418_v36 }
 0x13a   : > { %v1000_v10 = vmax.f32 %v758_v31, %v984_v40  ;;  %v1812_v45 = vpack.c.bf16 %v1478_v37, %v1477_v61  ;;  %v1468_v20 = vmax.f32 %v1226_v38, %v1452_v1  ;;  %v1224_v46 = vmax.f32 %v1208_v39, 0.0 }
 0x13b   : > { %v1465_v47 = vmax.f32 %v1223_v34, %v1449_v35  ;;  %v1450_v5 = vmax.f32 %v1434_v2, 0.0  ;;  %v1483_v21 = vmax.f32 %v2357_v26, %v1467_v33  ;;  %v997_v50 = vmax.f32 %v755_v30, %v981_v42 }
 0x13c   : > { %1832 = vst [vmem:[%s2406_s21 + $0x20] sm:$0xff] %v1812_v45   ;;  %v1484_v41 = vmax.f32 %v1000_v10, %v1468_v20  ;;  %v998_v17 = vmax.f32 %v756_v43, %v982_v44 }
 0x13d   : > { %v1466_v48 = vmax.f32 %v1224_v46, %v1450_v5  ;;  %v1481_v49 = vmax.f32 %v997_v50, %v1465_v47 }
 0x13e   : > { %v1827_v22 = vpack.c.bf16 %v1484_v41, %v1483_v21 }
 0x13f   : > { %v1482_v9 = vmax.f32 %v998_v17, %v1466_v48 }
 0x140   : > { %1835 = vst [vmem:[%s2406_s21 + $0x38] sm:$0xff] %v1827_v22  }
 0x141   : > { %v1822_v31 = vpack.c.bf16 %v1482_v9, %v1481_v49 }
 0x143   : > { %1834 = vst [vmem:[%s2406_s21 + $0x30] sm:$0xff] %v1822_v31  }
 0x144 PF: > { %p11_p9 = scmp.ge.s32.totalorder %s2082_s19, 6   ;;  %s2488_s15 = smov %s2033_s16 }
 0x145   : > { %s2489_s16 = smov %s2091_s22  ;;  %s2490_s17 = smov %s2082_s19 }
 0x146   :  { %13 = sbr.rel (!%p11_p9) target bundleno = 2 (0x2), region = 115 }

// kernel: cnn_fashion_mnist_forward.4
= control target key start
LH: loop header
LB: loop body
LE: loop exit
PB: predicated region body
PF: predicated region fallthrough
CT: control target
= control target key end

     0   :  { %v2706_v0 = vmov 0   ;;  %vm381_vm0 = vcmask 130048   ;;  %s3683_s1 = inlined_call_operand.vmem [shape: bf16[400,128], index: 1, kind: input, shape index: {}]   ;;  %s3684_s0 = inlined_call_operand.vmem [shape: bf16[4,112,400], index: 0, kind: input, shape index: {}]   ;;  %s3685_s2 = inlined_call_operand.vmem [shape: f32[1,128], index: 2, kind: input, shape index: {}]   ;;  %s3686_s3 = inlined_call_operand.vmem [shape: f32[1,128], index: 3, kind: input, shape index: {}]   ;;  %s3687_s4 = inlined_call_operand.vmem [shape: bf16[112,128], index: 4, kind: output, shape index: {}]  }
   0x1   :  { %492 = vmatprep.subr.bf16.mxu1 %v2706_v0  ;;  %v2736_v1 = vld [vmem:[%s3683_s1 + $0x78] sm:$0xff]   ;;  %v2753_v4 = vld [vmem:[%s3683_s1 + $0x70] sm:$0xff]   ;;  %v2771_v7 = vld [vmem:[%s3683_s1 + $0x68] sm:$0xff]  }
   0x2   :  { %v2741_v2 = vld [vmem:[%s3683_s1 + $0xb8] sm:$0xff]   ;;  %2280 = vmatprep.subr.bf16.mxu0 %v2736_v1  ;;  %v2760_v5 = vld [vmem:[%s3683_s1 + $0xb0] sm:$0xff]   ;;  %v2777_v8 = vld [vmem:[%s3683_s1 + $0xa8] sm:$0xff]  }
   0x3   :  { %v2747_v3 = vld [vmem:[%s3683_s1 + $0x38] sm:$0xff]   ;;  %493 = vmatpush1.bf16.msra.mxu1 %v2741_v2  ;;  %v2766_v6 = vld [vmem:[%s3683_s1 + $0x30] sm:$0xff]   ;;  %v2784_v9 = vld [vmem:[%s3683_s1 + $0x28] sm:$0xff]  }
   0x4   :  { %2281 = vmatpush3.bf16.msra.mxu0 %v2747_v3  ;;  %494 = vmatprep.subr.bf16.mxu1 %v2706_v0  ;;  %v2790_v10 = vld [vmem:[%s3683_s1 + $0x60] sm:$0xff]   ;;  %v2809_v13 = vld [vmem:[%s3683_s1 + $0x58] sm:$0xff]   ;;  %v2828_v16 = vld [vmem:[%s3683_s1 + $0x50] sm:$0xff]  }
   0x5   :  { %2282 = vmatprep.subr.bf16.mxu0 %v2753_v4  ;;  %v2796_v11 = vld [vmem:[%s3683_s1 + $0xa0] sm:$0xff]   ;;  %v2815_v14 = vld [vmem:[%s3683_s1 + $0x98] sm:$0xff]   ;;  %v2834_v17 = vld [vmem:[%s3683_s1 + $0x90] sm:$0xff]  }
   0x6   :  { %v2803_v12 = vld [vmem:[%s3683_s1 + $0x20] sm:$0xff]   ;;  %v2822_v15 = vld [vmem:[%s3683_s1 + $0x18] sm:$0xff]   ;;  %v2841_v18 = vld [vmem:[%s3683_s1 + $0x10] sm:$0xff]  }
   0x7   :  { %495 = vmatpush1.bf16.msra.mxu1 %v2760_v5  ;;  %v2847_v19 = vld [vmem:[%s3683_s1 + $0x48] sm:$0xff]   ;;  %v2865_v22 = vld [vmem:[%s3683_s1 + $0x40] sm:$0xff]  }
   0x8   :  { %2283 = vmatpush3.bf16.msra.mxu0 %v2766_v6  ;;  %496 = vmatprep.subr.bf16.mxu1 %v2706_v0  ;;  %v2852_v20 = vld [vmem:[%s3683_s1 + $0x88] sm:$0xff]   ;;  %v2539_v23 = vld [vmem:[%s3684_s0 + $0x4] ss:$16 sps:$4 sm:$0xff]   ;;  %v2537_v27 = vld [vmem:[%s3684_s0] ss:$16 sps:$4 sm:$0xff]  }
   0x9   :  { %2284 = vmatprep.subr.bf16.mxu0 %v2771_v7  ;;  %v2858_v21 = vld [vmem:[%s3683_s1 + $0x8] sm:$0xff]   ;;  %v2875_v24 = vld [vmem:[%s3683_s1 + $0x80] sm:$0xff]   ;;  %435 = vmatprep.mubr.bf16.mxu0 %v2539_v23 }
   0xa   :  { %v2543_v25 = vld [vmem:[%s3684_s0 + $0xc] ss:$16 sps:$4 sm:$0xff]   ;;  %v2885_v26 = vld [vmem:[%s3683_s1] sm:$0xff]   ;;  %v2541_v30 = vld [vmem:[%s3684_s0 + $0x8] ss:$16 sps:$4 sm:$0xff]  }
   0xb   :  { %497 = vmatpush1.bf16.msra.mxu1 %v2777_v8  ;;  %2013 = vmatprep.mubr.msk.bf16.mxu1 %vm381_vm0, %v2543_v25  ;;  %v2896_v28 = vld [vmem:[%s3683_s1 + $0xc0] sm:$0xff]   ;;  %v2547_v31 = vld [vmem:[%s3684_s0 + $0x2c] ss:$16 sps:$4 sm:$0xff]   ;;  %v2549_v34 = vld [vmem:[%s3684_s0 + $0x28] ss:$16 sps:$4 sm:$0xff]  }
   0xc   :  { %2285 = vmatpush3.bf16.msra.mxu0 %v2784_v9  ;;  %498 = vmatprep.subr.bf16.mxu1 %v2706_v0  ;;  %v2544_v29 = vld [vmem:[%s3684_s0 + $0x24] ss:$16 sps:$4 sm:$0xff]   ;;  %v2546_v32 = vld [vmem:[%s3684_s0 + $0x20] ss:$16 sps:$4 sm:$0xff]   ;;  %v2553_v35 = vld [vmem:[%s3684_s0 + $0x4c] ss:$16 sps:$4 sm:$0xff]  }
   0xd   :  { %2286 = vmatprep.subr.bf16.mxu0 %v2790_v10  ;;  %v2550_v33 = vld [vmem:[%s3684_s0 + $0x44] ss:$16 sps:$4 sm:$0xff]   ;;  %v2552_v36 = vld [vmem:[%s3684_s0 + $0x40] ss:$16 sps:$4 sm:$0xff]   ;;  %v2555_v38 = vld [vmem:[%s3684_s0 + $0x48] ss:$16 sps:$4 sm:$0xff]  }
   0xe   :  { %v2556_v37 = vld [vmem:[%s3684_s0 + $0x64] ss:$16 sps:$4 sm:$0xff]   ;;  %v2559_v39 = vld [vmem:[%s3684_s0 + $0x6c] ss:$16 sps:$4 sm:$0xff]   ;;  %v2558_v40 = vld [vmem:[%s3684_s0 + $0x60] ss:$16 sps:$4 sm:$0xff]  }
   0xf   :  { %499 = vmatpush1.bf16.msra.mxu1 %v2796_v11  ;;  %v2562_v41 = vld [vmem:[%s3684_s0 + $0x84] ss:$16 sps:$4 sm:$0xff]   ;;  %v2561_v42 = vld [vmem:[%s3684_s0 + $0x68] ss:$16 sps:$4 sm:$0xff]   ;;  %v2565_v43 = vld [vmem:[%s3684_s0 + $0x8c] ss:$16 sps:$4 sm:$0xff]  }
  0x10   :  { %2287 = vmatpush3.bf16.msra.mxu0 %v2803_v12  ;;  %500 = vmatprep.subr.bf16.mxu1 %v2706_v0  ;;  %v2564_v44 = vld [vmem:[%s3684_s0 + $0x80] ss:$16 sps:$4 sm:$0xff]   ;;  %v2568_v45 = vld [vmem:[%s3684_s0 + $0xa4] ss:$16 sps:$4 sm:$0xff]   ;;  %v2567_v46 = vld [vmem:[%s3684_s0 + $0x88] ss:$16 sps:$4 sm:$0xff]  }
  0x11   :  { %2288 = vmatprep.subr.bf16.mxu0 %v2809_v13  ;;  %v2571_v47 = vld [vmem:[%s3684_s0 + $0xac] ss:$16 sps:$4 sm:$0xff]   ;;  %v2570_v48 = vld [vmem:[%s3684_s0 + $0xa0] ss:$16 sps:$4 sm:$0xff]   ;;  %v2574_v49 = vld [vmem:[%s3684_s0 + $0xc4] ss:$16 sps:$4 sm:$0xff]  }
  0x12   :  { %v2573_v50 = vld [vmem:[%s3684_s0 + $0xa8] ss:$16 sps:$4 sm:$0xff]   ;;  %v2577_v51 = vld [vmem:[%s3684_s0 + $0xcc] ss:$16 sps:$4 sm:$0xff]   ;;  %v2576_v52 = vld [vmem:[%s3684_s0 + $0xc0] ss:$16 sps:$4 sm:$0xff]  }
  0x13   :  { %501 = vmatpush1.bf16.msra.mxu1 %v2815_v14  ;;  %v2582_v53 = vld [vmem:[%s3684_s0 + $0xe4] ss:$16 sps:$4 sm:$0xff]   ;;  %v2579_v54 = vld [vmem:[%s3684_s0 + $0xc8] ss:$16 sps:$4 sm:$0xff]   ;;  %v2585_v55 = vld [vmem:[%s3684_s0 + $0xec] ss:$16 sps:$4 sm:$0xff]  }
  0x14   :  { %2289 = vmatpush3.bf16.msra.mxu0 %v2822_v15  ;;  %502 = vmatprep.subr.bf16.mxu1 %v2706_v0  ;;  %v2580_v56 = vld [vmem:[%s3684_s0 + $0xe0] ss:$16 sps:$4 sm:$0xff]   ;;  %v2586_v57 = vld [vmem:[%s3684_s0 + $0x104] ss:$16 sps:$4 sm:$0xff]   ;;  %v2583_v58 = vld [vmem:[%s3684_s0 + $0xe8] ss:$16 sps:$4 sm:$0xff]  }
  0x15   :  { %2290 = vmatprep.subr.bf16.mxu0 %v2828_v16  ;;  %v2589_v59 = vld [vmem:[%s3684_s0 + $0x10c] ss:$16 sps:$4 sm:$0xff]   ;;  %v2588_v60 = vld [vmem:[%s3684_s0 + $0x100] ss:$16 sps:$4 sm:$0xff]   ;;  %v2592_v61 = vld [vmem:[%s3684_s0 + $0x124] ss:$16 sps:$4 sm:$0xff]  }
  0x16   :  { %v2591_v62 = vld [vmem:[%s3684_s0 + $0x108] ss:$16 sps:$4 sm:$0xff]   ;;  %v2595_v63 = vld [vmem:[%s3684_s0 + $0x12c] ss:$16 sps:$4 sm:$0xff]   ;;  %v2594_v23 = vld [vmem:[%s3684_s0 + $0x120] ss:$16 sps:$4 sm:$0xff]  }
  0x17   :  { %503 = vmatpush1.bf16.msra.mxu1 %v2834_v17  ;;  %v2598_v25 = vld [vmem:[%s3684_s0 + $0x144] ss:$16 sps:$4 sm:$0xff]  }
  0x18   :  { %2291 = vmatpush3.bf16.msra.mxu0 %v2841_v18  ;;  %504 = vmatprep.subr.bf16.mxu1 %v2706_v0 }
  0x19   :  { %2292 = vmatprep.subr.bf16.mxu0 %v2847_v19 }
  0x1b   :  { %505 = vmatpush1.bf16.msra.mxu1 %v2852_v20 }
  0x1c   :  { %2293 = vmatpush3.bf16.msra.mxu0 %v2858_v21  ;;  %506 = vmatprep.subr.bf16.mxu1 %v2706_v0 }
  0x1d   :  { %2294 = vmatprep.subr.bf16.mxu0 %v2865_v22 }
  0x1f   :  { %507 = vmatpush1.bf16.msra.mxu1 %v2875_v24 }
  0x20   :  { %2295 = vmatpush3.bf16.msra.mxu0 %v2885_v26  ;;  %522 = vmatprep.subr.bf16.mxu1 %v2706_v0 }
  0x21   :  { %2338 = vmatprep.subr.bf16.mxu0 %v2736_v1 }
  0x23   :  { %436 = vmatmul.mubr.bf16.vlgmr.msra.gmra.mxu0 %v2537_v27  ;;  %523 = vmatpush2.bf16.msra.mxu1 %v2896_v28  ;;  %v2597_v27 = vld [vmem:[%s3684_s0 + $0x128] ss:$16 sps:$4 sm:$0xff]  }
  0x24   :  { %2339 = vmatpush3.bf16.msra.mxu0 %v2747_v3  ;;  %907 = vmatprep.subr.bf16.mxu1 %v2706_v0 }
  0x25   :  { %443 = vmatprep.mubr.bf16.mxu0 %v2544_v29  ;;  %2340 = vmatprep.subr.bf16.mxu0 %v2753_v4  ;;  %v2601_v29 = vld [vmem:[%s3684_s0 + $0x14c] ss:$16 sps:$4 sm:$0xff]  }
  0x26   :  { %525 = vmatmul.mubr.bf16.vlgmr.msra.gmra.mxu1 %v2541_v30  ;;  %v2600_v30 = vld [vmem:[%s3684_s0 + $0x140] ss:$16 sps:$4 sm:$0xff]  }
  0x27   :  { %908 = vmatpush1.bf16.msra.mxu1 %v2741_v2  ;;  %2014 = vmatprep.mubr.msk.bf16.mxu1 %vm381_vm0, %v2547_v31  ;;  %v2604_v31 = vld [vmem:[%s3684_s0 + $0x164] ss:$16 sps:$4 sm:$0xff]  }
  0x28   :  { %2341 = vmatpush3.bf16.msra.mxu0 %v2766_v6  ;;  %909 = vmatprep.subr.bf16.mxu1 %v2706_v0 }
  0x29   :  { %2342 = vmatprep.subr.bf16.mxu0 %v2771_v7 }
  0x2b   :  { %444 = vmatmul.mubr.bf16.gmra.mxu0 %v2546_v32  ;;  %910 = vmatpush1.bf16.msra.mxu1 %v2760_v5  ;;  %v2603_v32 = vld [vmem:[%s3684_s0 + $0x148] ss:$16 sps:$4 sm:$0xff]  }
  0x2c   :  { %451 = vmatprep.mubr.bf16.mxu0 %v2550_v33  ;;  %2343 = vmatpush3.bf16.msra.mxu0 %v2784_v9  ;;  %v2607_v33 = vld [vmem:[%s3684_s0 + $0x16c] ss:$16 sps:$4 sm:$0xff]  }
  0x2d   :  { %911 = vmatprep.subr.bf16.mxu1 %v2706_v0  ;;  %2344 = vmatprep.subr.bf16.mxu0 %v2790_v10 }
  0x2e   :  { %533 = vmatmul.mubr.bf16.gmra.mxu1 %v2549_v34  ;;  %v2606_v34 = vld [vmem:[%s3684_s0 + $0x160] ss:$16 sps:$4 sm:$0xff]  }
  0x2f   :  { %2015 = vmatprep.mubr.msk.bf16.mxu1 %vm381_vm0, %v2553_v35  ;;  %912 = vmatpush1.bf16.msra.mxu1 %v2777_v8  ;;  %v2610_v35 = vld [vmem:[%s3684_s0 + $0x184] ss:$16 sps:$4 sm:$0xff]  }
  0x30   :  { %2345 = vmatpush3.bf16.msra.mxu0 %v2803_v12  ;;  %913 = vmatprep.subr.bf16.mxu1 %v2706_v0 }
  0x31   :  { %2346 = vmatprep.subr.bf16.mxu0 %v2809_v13 }
  0x33   :  { %452 = vmatmul.mubr.bf16.gmra.mxu0 %v2552_v36  ;;  %914 = vmatpush1.bf16.msra.mxu1 %v2796_v11  ;;  %v2609_v36 = vld [vmem:[%s3684_s0 + $0x168] ss:$16 sps:$4 sm:$0xff]  }
  0x34   :  { %459 = vmatprep.mubr.bf16.mxu0 %v2556_v37  ;;  %2347 = vmatpush3.bf16.msra.mxu0 %v2822_v15  ;;  %v2613_v37 = vld [vmem:[%s3684_s0 + $0x18c] ss:$16 sps:$4 sm:$0xff]  }
  0x35   :  { %915 = vmatprep.subr.bf16.mxu1 %v2706_v0  ;;  %2348 = vmatprep.subr.bf16.mxu0 %v2828_v16 }
  0x36   :  { %541 = vmatmul.mubr.bf16.gmra.mxu1 %v2555_v38  ;;  %v2612_v38 = vld [vmem:[%s3684_s0 + $0x180] ss:$16 sps:$4 sm:$0xff]  }
  0x37   :  { %2016 = vmatprep.mubr.msk.bf16.mxu1 %vm381_vm0, %v2559_v39  ;;  %916 = vmatpush1.bf16.msra.mxu1 %v2815_v14  ;;  %v2615_v39 = vld [vmem:[%s3684_s0 + $0x188] ss:$16 sps:$4 sm:$0xff]  }
  0x38   :  { %2349 = vmatpush3.bf16.msra.mxu0 %v2841_v18  ;;  %917 = vmatprep.subr.bf16.mxu1 %v2706_v0 }
  0x39   :  { %2350 = vmatprep.subr.bf16.mxu0 %v2847_v19 }
  0x3b   :  { %460 = vmatmul.mubr.bf16.gmra.mxu0 %v2558_v40  ;;  %918 = vmatpush1.bf16.msra.mxu1 %v2834_v17  ;;  %v2619_v40 = vld [vmem:[%s3684_s0 + $0x1ac] ss:$16 sps:$4 sm:$0xff]  }
  0x3c   :  { %467 = vmatprep.mubr.bf16.mxu0 %v2562_v41  ;;  %919 = vmatprep.subr.bf16.mxu1 %v2706_v0  ;;  %v2618_v41 = vld [vmem:[%s3684_s0 + $0x1a0] ss:$16 sps:$4 sm:$0xff]  }
  0x3d   :  { %2351 = vmatpush3.bf16.msra.mxu0 %v2858_v21 }
  0x3e   :  { %549 = vmatmul.mubr.bf16.gmra.mxu1 %v2561_v42  ;;  %2352 = vmatprep.subr.bf16.mxu0 %v2865_v22  ;;  %v2624_v42 = vld [vmem:[%s3684_s0 + $0x1c4] ss:$16 sps:$4 sm:$0xff]  }
  0x3f   :  { %2017 = vmatprep.mubr.msk.bf16.mxu1 %vm381_vm0, %v2565_v43  ;;  %920 = vmatpush1.bf16.msra.mxu1 %v2852_v20  ;;  %v2621_v43 = vld [vmem:[%s3684_s0 + $0x1a8] ss:$16 sps:$4 sm:$0xff]  }
  0x40   :  { %921 = vmatprep.subr.bf16.mxu1 %v2706_v0 }
  0x41   :  { %2353 = vmatpush3.bf16.msra.mxu0 %v2885_v26 }
  0x42   :  { %2396 = vmatprep.subr.bf16.mxu0 %v2736_v1 }
  0x43   :  { %468 = vmatmul.mubr.bf16.gmra.mxu0 %v2564_v44  ;;  %922 = vmatpush1.bf16.msra.mxu1 %v2875_v24  ;;  %v2627_v44 = vld [vmem:[%s3684_s0 + $0x1cc] ss:$16 sps:$4 sm:$0xff]  }
  0x44   :  { %475 = vmatprep.mubr.bf16.mxu0 %v2568_v45  ;;  %937 = vmatprep.subr.bf16.mxu1 %v2706_v0  ;;  %v2622_v45 = vld [vmem:[%s3684_s0 + $0x1c0] ss:$16 sps:$4 sm:$0xff]  }
  0x46   :  { %557 = vmatmul.mubr.bf16.gmra.mxu1 %v2567_v46  ;;  %v2628_v46 = vld [vmem:[%s3684_s0 + $0x1e4] ss:$16 sps:$4 sm:$0xff]  }
  0x47   :  { %2018 = vmatprep.mubr.msk.bf16.mxu1 %vm381_vm0, %v2571_v47  ;;  %938 = vmatpush2.bf16.msra.mxu1 %v2896_v28  ;;  %v2625_v47 = vld [vmem:[%s3684_s0 + $0x1c8] ss:$16 sps:$4 sm:$0xff]  }
  0x48   :  { %1324 = vmatprep.subr.bf16.mxu1 %v2706_v0 }
  0x4b   :  { %476 = vmatmul.mubr.bf16.gmra.mxu0 %v2570_v48  ;;  %v2631_v48 = vld [vmem:[%s3684_s0 + $0x1ec] ss:$16 sps:$4 sm:$0xff]  }
  0x4c   :  { %483 = vmatprep.mubr.bf16.mxu0 %v2574_v49  ;;  %v2630_v49 = vld [vmem:[%s3684_s0 + $0x1e0] ss:$16 sps:$4 sm:$0xff]  }
  0x4e   :  { %565 = vmatmul.mubr.bf16.gmra.mxu1 %v2573_v50  ;;  %v2667_v50 = vld [vmem:[%s3684_s0 + $0x2a8] ss:$16 sps:$4 sm:$0xff]  }
  0x4f   :  { %2019 = vmatprep.mubr.msk.bf16.mxu1 %vm381_vm0, %v2577_v51  ;;  %v2673_v51 = vld [vmem:[%s3684_s0 + $0x2cc] ss:$16 sps:$4 sm:$0xff]  }
  0x53   :  { %484 = vmatmul.mubr.bf16.gmra.mxu0 %v2576_v52  ;;  %v2672_v52 = vld [vmem:[%s3684_s0 + $0x2c0] ss:$16 sps:$4 sm:$0xff]  }
  0x54   :  { %850 = vmatprep.mubr.bf16.mxu0 %v2582_v53  ;;  %v2676_v53 = vld [vmem:[%s3684_s0 + $0x2e4] ss:$16 sps:$4 sm:$0xff]  }
  0x56   :  { %573 = vmatmul.mubr.bf16.gmra.mxu1 %v2579_v54  ;;  %v2675_v54 = vld [vmem:[%s3684_s0 + $0x2c8] ss:$16 sps:$4 sm:$0xff]  }
  0x57   :  { %2078 = vmatprep.mubr.msk.bf16.mxu1 %vm381_vm0, %v2585_v55  ;;  %v2679_v55 = vld [vmem:[%s3684_s0 + $0x2ec] ss:$16 sps:$4 sm:$0xff]  }
  0x5b   :  { %851 = vmatmul.mubr.bf16.vlgmr.msra.gmra.mxu0 %v2580_v56  ;;  %v2678_v56 = vld [vmem:[%s3684_s0 + $0x2e0] ss:$16 sps:$4 sm:$0xff]  }
  0x5c   :  { %2397 = vmatpush3.bf16.msra.mxu0 %v2747_v3  ;;  %858 = vmatprep.mubr.bf16.mxu0 %v2586_v57  ;;  %v2682_v57 = vld [vmem:[%s3684_s0 + $0x304] ss:$16 sps:$4 sm:$0xff]  }
  0x5d   :  { %2398 = vmatprep.subr.bf16.mxu0 %v2753_v4 }
  0x5e   :  { %940 = vmatmul.mubr.bf16.vlgmr.msra.gmra.mxu1 %v2583_v58  ;;  %v2681_v58 = vld [vmem:[%s3684_s0 + $0x2e8] ss:$16 sps:$4 sm:$0xff]  }
  0x5f   :  { %1325 = vmatpush1.bf16.msra.mxu1 %v2741_v2  ;;  %2079 = vmatprep.mubr.msk.bf16.mxu1 %vm381_vm0, %v2589_v59  ;;  %v2685_v59 = vld [vmem:[%s3684_s0 + $0x30c] ss:$16 sps:$4 sm:$0xff]  }
  0x60   :  { %2399 = vmatpush3.bf16.msra.mxu0 %v2766_v6  ;;  %1326 = vmatprep.subr.bf16.mxu1 %v2706_v0 }
  0x61   :  { %2400 = vmatprep.subr.bf16.mxu0 %v2771_v7 }
  0x63   :  { %859 = vmatmul.mubr.bf16.gmra.mxu0 %v2588_v60  ;;  %1327 = vmatpush1.bf16.msra.mxu1 %v2760_v5  ;;  %v2684_v60 = vld [vmem:[%s3684_s0 + $0x300] ss:$16 sps:$4 sm:$0xff]  }
  0x64   :  { %866 = vmatprep.mubr.bf16.mxu0 %v2592_v61  ;;  %2401 = vmatpush3.bf16.msra.mxu0 %v2784_v9  ;;  %v2688_v61 = vld [vmem:[%s3684_s0 + $0x324] ss:$16 sps:$4 sm:$0xff]  }
  0x65   :  { %1328 = vmatprep.subr.bf16.mxu1 %v2706_v0  ;;  %2402 = vmatprep.subr.bf16.mxu0 %v2790_v10 }
  0x66   :  { %948 = vmatmul.mubr.bf16.gmra.mxu1 %v2591_v62  ;;  %v2687_v62 = vld [vmem:[%s3684_s0 + $0x308] ss:$16 sps:$4 sm:$0xff]  }
  0x67   :  { %2080 = vmatprep.mubr.msk.bf16.mxu1 %vm381_vm0, %v2595_v63  ;;  %1329 = vmatpush1.bf16.msra.mxu1 %v2777_v8 }
  0x68   :  { %2403 = vmatpush3.bf16.msra.mxu0 %v2803_v12  ;;  %1330 = vmatprep.subr.bf16.mxu1 %v2706_v0 }
  0x69   :  { %2404 = vmatprep.subr.bf16.mxu0 %v2809_v13 }
  0x6b   :  { %867 = vmatmul.mubr.bf16.gmra.mxu0 %v2594_v23  ;;  %1331 = vmatpush1.bf16.msra.mxu1 %v2796_v11  ;;  %v2691_v23 = vld [vmem:[%s3684_s0 + $0x32c] ss:$16 sps:$4 sm:$0xff]  }
  0x6c   :  { %874 = vmatprep.mubr.bf16.mxu0 %v2598_v25  ;;  %2405 = vmatpush3.bf16.msra.mxu0 %v2822_v15 }
  0x6d   :  { %1332 = vmatprep.subr.bf16.mxu1 %v2706_v0  ;;  %2406 = vmatprep.subr.bf16.mxu0 %v2828_v16 }
  0x6e   :  { %956 = vmatmul.mubr.bf16.gmra.mxu1 %v2597_v27 }
  0x6f   :  { %2081 = vmatprep.mubr.msk.bf16.mxu1 %vm381_vm0, %v2601_v29  ;;  %1333 = vmatpush1.bf16.msra.mxu1 %v2815_v14 }
  0x70   :  { %2407 = vmatpush3.bf16.msra.mxu0 %v2841_v18  ;;  %1334 = vmatprep.subr.bf16.mxu1 %v2706_v0 }
  0x71   :  { %2408 = vmatprep.subr.bf16.mxu0 %v2847_v19 }
  0x73   :  { %875 = vmatmul.mubr.bf16.gmra.mxu0 %v2600_v30  ;;  %1335 = vmatpush1.bf16.msra.mxu1 %v2834_v17 }
  0x74   :  { %882 = vmatprep.mubr.bf16.mxu0 %v2604_v31  ;;  %1336 = vmatprep.subr.bf16.mxu1 %v2706_v0  ;;  %v2690_v31 = vld [vmem:[%s3684_s0 + $0x320] ss:$16 sps:$4 sm:$0xff]  }
  0x75   :  { %2409 = vmatpush3.bf16.msra.mxu0 %v2858_v21 }
  0x76   :  { %964 = vmatmul.mubr.bf16.gmra.mxu1 %v2603_v32  ;;  %2410 = vmatprep.subr.bf16.mxu0 %v2865_v22 }
  0x77   :  { %2082 = vmatprep.mubr.msk.bf16.mxu1 %vm381_vm0, %v2607_v33  ;;  %1337 = vmatpush1.bf16.msra.mxu1 %v2852_v20 }
  0x78   :  { %1338 = vmatprep.subr.bf16.mxu1 %v2706_v0 }
  0x79   :  { %2411 = vmatpush3.bf16.msra.mxu0 %v2885_v26 }
  0x7a   :  { %2454 = vmatprep.subr.bf16.mxu0 %v2736_v1  ;;  %v2616_v1 = vld [vmem:[%s3684_s0 + $0x1a4] ss:$16 sps:$4 sm:$0xff]  }
  0x7b   :  { %883 = vmatmul.mubr.bf16.gmra.mxu0 %v2606_v34  ;;  %1339 = vmatpush1.bf16.msra.mxu1 %v2875_v24  ;;  %v2694_v34 = vld [vmem:[%s3684_s0 + $0x344] ss:$16 sps:$4 sm:$0xff]  }
  0x7c   :  { %890 = vmatprep.mubr.bf16.mxu0 %v2610_v35  ;;  %1354 = vmatprep.subr.bf16.mxu1 %v2706_v0 }
  0x7e   :  { %972 = vmatmul.mubr.bf16.gmra.mxu1 %v2609_v36 }
  0x7f   :  { %2083 = vmatprep.mubr.msk.bf16.mxu1 %vm381_vm0, %v2613_v37  ;;  %1355 = vmatpush2.bf16.msra.mxu1 %v2896_v28 }
  0x80   :  { %1727 = vmatprep.subr.bf16.mxu1 %v2706_v0 }
  0x83   :  { %891 = vmatmul.mubr.bf16.gmra.mxu0 %v2612_v38  ;;  %v2693_v38 = vld [vmem:[%s3684_s0 + $0x328] ss:$16 sps:$4 sm:$0xff]  }
  0x84   :  { %898 = vmatprep.mubr.bf16.mxu0 %v2616_v1 }
  0x86   :  { %980 = vmatmul.mubr.bf16.gmra.mxu1 %v2615_v39  ;;  %v2697_v39 = vld [vmem:[%s3684_s0 + $0x34c] ss:$16 sps:$4 sm:$0xff]  }
  0x87   :  { %2084 = vmatprep.mubr.msk.bf16.mxu1 %vm381_vm0, %v2619_v40 }
  0x8b   :  { %899 = vmatmul.mubr.bf16.gmra.mxu0 %v2618_v41 }
  0x8c   :  { %1267 = vmatprep.mubr.bf16.mxu0 %v2624_v42 }
  0x8e   :  { %988 = vmatmul.mubr.bf16.gmra.mxu1 %v2621_v43 }
  0x8f   :  { %2141 = vmatprep.mubr.msk.bf16.mxu1 %vm381_vm0, %v2627_v44 }
  0x93   :  { %1268 = vmatmul.mubr.bf16.vlgmr.msra.gmra.mxu0 %v2622_v45 }
  0x94   :  { %2455 = vmatpush3.bf16.msra.mxu0 %v2747_v3  ;;  %1275 = vmatprep.mubr.bf16.mxu0 %v2628_v46  ;;  %v2634_v3 = vld [vmem:[%s3684_s0 + $0x204] ss:$16 sps:$4 sm:$0xff]   ;;  %v2696_v46 = vld [vmem:[%s3684_s0 + $0x340] ss:$16 sps:$4 sm:$0xff]  }
  0x95   :  { %2456 = vmatprep.subr.bf16.mxu0 %v2753_v4  ;;  %v2637_v4 = vld [vmem:[%s3684_s0 + $0x20c] ss:$16 sps:$4 sm:$0xff]  }
  0x96   :  { %1357 = vmatmul.mubr.bf16.vlgmr.msra.gmra.mxu1 %v2625_v47 }
  0x97   :  { %1728 = vmatpush1.bf16.msra.mxu1 %v2741_v2  ;;  %2142 = vmatprep.mubr.msk.bf16.mxu1 %vm381_vm0, %v2631_v48  ;;  %v2633_v2 = vld [vmem:[%s3684_s0 + $0x1e8] ss:$16 sps:$4 sm:$0xff]  }
  0x98   :  { %2457 = vmatpush3.bf16.msra.mxu0 %v2766_v6  ;;  %1729 = vmatprep.subr.bf16.mxu1 %v2706_v0  ;;  %v2636_v6 = vld [vmem:[%s3684_s0 + $0x200] ss:$16 sps:$4 sm:$0xff]  }
  0x99   :  { %2458 = vmatprep.subr.bf16.mxu0 %v2771_v7  ;;  %v2639_v7 = vld [vmem:[%s3684_s0 + $0x208] ss:$16 sps:$4 sm:$0xff]  }
  0x9b   :  { %1276 = vmatmul.mubr.bf16.gmra.mxu0 %v2630_v49  ;;  %1730 = vmatpush1.bf16.msra.mxu1 %v2760_v5  ;;  %v2640_v5 = vld [vmem:[%s3684_s0 + $0x224] ss:$16 sps:$4 sm:$0xff]  }
  0x9c   :  { %1283 = vmatprep.mubr.bf16.mxu0 %v2634_v3  ;;  %2459 = vmatpush3.bf16.msra.mxu0 %v2784_v9  ;;  %v2642_v9 = vld [vmem:[%s3684_s0 + $0x220] ss:$16 sps:$4 sm:$0xff]   ;;  %v2700_v49 = vld [vmem:[%s3684_s0 + $0x364] ss:$16 sps:$4 sm:$0xff]  }
  0x9d   :  { %1731 = vmatprep.subr.bf16.mxu1 %v2706_v0  ;;  %2460 = vmatprep.subr.bf16.mxu0 %v2790_v10  ;;  %v2646_v10 = vld [vmem:[%s3684_s0 + $0x244] ss:$16 sps:$4 sm:$0xff]  }
  0x9e   :  { %1365 = vmatmul.mubr.bf16.gmra.mxu1 %v2633_v2 }
  0x9f   :  { %2143 = vmatprep.mubr.msk.bf16.mxu1 %vm381_vm0, %v2637_v4  ;;  %1732 = vmatpush1.bf16.msra.mxu1 %v2777_v8  ;;  %v2643_v8 = vld [vmem:[%s3684_s0 + $0x22c] ss:$16 sps:$4 sm:$0xff]  }
  0xa0   :  { %2461 = vmatpush3.bf16.msra.mxu0 %v2803_v12  ;;  %1733 = vmatprep.subr.bf16.mxu1 %v2706_v0  ;;  %v2649_v12 = vld [vmem:[%s3684_s0 + $0x24c] ss:$16 sps:$4 sm:$0xff]  }
  0xa1   :  { %2462 = vmatprep.subr.bf16.mxu0 %v2809_v13  ;;  %v2648_v13 = vld [vmem:[%s3684_s0 + $0x240] ss:$16 sps:$4 sm:$0xff]  }
  0xa3   :  { %1284 = vmatmul.mubr.bf16.gmra.mxu0 %v2636_v6  ;;  %1734 = vmatpush1.bf16.msra.mxu1 %v2796_v11  ;;  %v2645_v11 = vld [vmem:[%s3684_s0 + $0x228] ss:$16 sps:$4 sm:$0xff]  }
  0xa4   :  { %1291 = vmatprep.mubr.bf16.mxu0 %v2640_v5  ;;  %2463 = vmatpush3.bf16.msra.mxu0 %v2822_v15  ;;  %v2651_v15 = vld [vmem:[%s3684_s0 + $0x248] ss:$16 sps:$4 sm:$0xff]  }
  0xa5   :  { %1735 = vmatprep.subr.bf16.mxu1 %v2706_v0  ;;  %2464 = vmatprep.subr.bf16.mxu0 %v2828_v16  ;;  %v2655_v16 = vld [vmem:[%s3684_s0 + $0x26c] ss:$16 sps:$4 sm:$0xff]   ;;  %v2699_v6 = vld [vmem:[%s3684_s0 + $0x348] ss:$16 sps:$4 sm:$0xff]  }
  0xa6   :  { %1373 = vmatmul.mubr.bf16.gmra.mxu1 %v2639_v7  ;;  %v2703_v7 = vld [vmem:[%s3684_s0 + $0x36c] ss:$16 sps:$4 sm:$0xff]  }
  0xa7   :  { %2144 = vmatprep.mubr.msk.bf16.mxu1 %vm381_vm0, %v2643_v8  ;;  %1736 = vmatpush1.bf16.msra.mxu1 %v2815_v14  ;;  %v2652_v14 = vld [vmem:[%s3684_s0 + $0x264] ss:$16 sps:$4 sm:$0xff]  }
  0xa8   :  { %2465 = vmatpush3.bf16.msra.mxu0 %v2841_v18  ;;  %1737 = vmatprep.subr.bf16.mxu1 %v2706_v0  ;;  %v2658_v18 = vld [vmem:[%s3684_s0 + $0x284] ss:$16 sps:$4 sm:$0xff]  }
  0xa9   :  { %2466 = vmatprep.subr.bf16.mxu0 %v2847_v19  ;;  %v2657_v19 = vld [vmem:[%s3684_s0 + $0x268] ss:$16 sps:$4 sm:$0xff]  }
  0xab   :  { %1292 = vmatmul.mubr.bf16.gmra.mxu0 %v2642_v9  ;;  %1738 = vmatpush1.bf16.msra.mxu1 %v2834_v17  ;;  %v2654_v17 = vld [vmem:[%s3684_s0 + $0x260] ss:$16 sps:$4 sm:$0xff]  }
  0xac   :  { %1299 = vmatprep.mubr.bf16.mxu0 %v2646_v10  ;;  %1739 = vmatprep.subr.bf16.mxu1 %v2706_v0 }
  0xad   :  { %2467 = vmatpush3.bf16.msra.mxu0 %v2858_v21  ;;  %v2666_v21 = vld [vmem:[%s3684_s0 + $0x2a4] ss:$16 sps:$4 sm:$0xff]  }
  0xae   :  { %1381 = vmatmul.mubr.bf16.gmra.mxu1 %v2645_v11  ;;  %2468 = vmatprep.subr.bf16.mxu0 %v2865_v22  ;;  %v2663_v22 = vld [vmem:[%s3684_s0 + $0x288] ss:$16 sps:$4 sm:$0xff]  }
  0xaf   :  { %2145 = vmatprep.mubr.msk.bf16.mxu1 %vm381_vm0, %v2649_v12  ;;  %1740 = vmatpush1.bf16.msra.mxu1 %v2852_v20  ;;  %v2660_v20 = vld [vmem:[%s3684_s0 + $0x280] ss:$16 sps:$4 sm:$0xff]  }
  0xb0   :  { %1741 = vmatprep.subr.bf16.mxu1 %v2706_v0 }
  0xb1   :  { %2469 = vmatpush3.bf16.msra.mxu0 %v2885_v26  ;;  %v2664_v26 = vld [vmem:[%s3684_s0 + $0x2a0] ss:$16 sps:$4 sm:$0xff]  }
  0xb3   :  { %1300 = vmatmul.mubr.bf16.gmra.mxu0 %v2648_v13  ;;  %1742 = vmatpush1.bf16.msra.mxu1 %v2875_v24  ;;  %v2669_v24 = vld [vmem:[%s3684_s0 + $0x2ac] ss:$16 sps:$4 sm:$0xff]  }
  0xb4   :  { %1307 = vmatprep.mubr.bf16.mxu0 %v2652_v14  ;;  %1757 = vmatprep.subr.bf16.mxu1 %v2706_v0  ;;  %v2661_v0 = vld [vmem:[%s3684_s0 + $0x28c] ss:$16 sps:$4 sm:$0xff]   ;;  %v2702_v14 = vld [vmem:[%s3684_s0 + $0x360] ss:$16 sps:$4 sm:$0xff]  }
  0xb6   :  { %1389 = vmatmul.mubr.bf16.gmra.mxu1 %v2651_v15 }
  0xb7   :  { %2146 = vmatprep.mubr.msk.bf16.mxu1 %vm381_vm0, %v2655_v16  ;;  %1758 = vmatpush2.bf16.msra.mxu1 %v2896_v28  ;;  %v2670_v28 = vld [vmem:[%s3684_s0 + $0x2c4] ss:$16 sps:$4 sm:$0xff]  }
  0xbb   :  { %1308 = vmatmul.mubr.bf16.gmra.mxu0 %v2654_v17 }
  0xbc   :  { %1315 = vmatprep.mubr.bf16.mxu0 %v2658_v18 }
  0xbe   :  { %1397 = vmatmul.mubr.bf16.gmra.mxu1 %v2657_v19 }
  0xbf   :  { %2147 = vmatprep.mubr.msk.bf16.mxu1 %vm381_vm0, %v2661_v0  ;;  %v2705_v0 = vld [vmem:[%s3684_s0 + $0x368] ss:$16 sps:$4 sm:$0xff]  }
  0xc3   :  { %1316 = vmatmul.mubr.bf16.gmra.mxu0 %v2660_v20 }
  0xc4   :  { %1670 = vmatprep.mubr.bf16.mxu0 %v2666_v21 }
  0xc6   :  { %1405 = vmatmul.mubr.bf16.gmra.mxu1 %v2663_v22 }
  0xc7   :  { %2204 = vmatprep.mubr.msk.bf16.mxu1 %vm381_vm0, %v2669_v24 }
  0xcb   :  { %1671 = vmatmul.mubr.bf16.vlgmr.msra.gmra.mxu0 %v2664_v26 }
  0xcc   :  { %1678 = vmatprep.mubr.bf16.mxu0 %v2670_v28 }
  0xce   :  { %1760 = vmatmul.mubr.bf16.vlgmr.msra.gmra.mxu1 %v2667_v50 }
  0xcf   :  { %2205 = vmatprep.mubr.msk.bf16.mxu1 %vm381_vm0, %v2673_v51 }
  0xd3   :  { %1679 = vmatmul.mubr.bf16.gmra.mxu0 %v2672_v52 }
  0xd4   :  { %1686 = vmatprep.mubr.bf16.mxu0 %v2676_v53 }
  0xd6   :  { %1768 = vmatmul.mubr.bf16.gmra.mxu1 %v2675_v54 }
  0xd7   :  { %2206 = vmatprep.mubr.msk.bf16.mxu1 %vm381_vm0, %v2679_v55 }
  0xdb   :  { %1687 = vmatmul.mubr.bf16.gmra.mxu0 %v2678_v56 }
  0xdc   :  { %1694 = vmatprep.mubr.bf16.mxu0 %v2682_v57 }
  0xde   :  { %1776 = vmatmul.mubr.bf16.gmra.mxu1 %v2681_v58 }
  0xdf   :  { %2207 = vmatprep.mubr.msk.bf16.mxu1 %vm381_vm0, %v2685_v59 }
  0xe3   :  { %v2296_v63 = vpop.f32.mrf.mxu0  ;;  %1695 = vmatmul.mubr.bf16.gmra.mxu0 %v2684_v60 }
  0xe4   :  { %1702 = vmatprep.mubr.bf16.mxu0 %v2688_v61 }
  0xe5   :  { %v2297_v25 = vpop.f32.mrf.mxu0 }
  0xe6   :  { %v2298_v27 = vadd.f32 %v2297_v25, %v2296_v63  ;;  %v526_v29 = vpop.f32.mrf.mxu1  ;;  %1784 = vmatmul.mubr.bf16.gmra.mxu1 %v2687_v62 }
  0xe7   :  { %v2299_v30 = vpop.f32.mrf.mxu0  ;;  %2208 = vmatprep.mubr.msk.bf16.mxu1 %vm381_vm0, %v2691_v23 }
  0xe8   :  { %v3328_v32 = vadd.f32 %v2298_v27, %v526_v29  ;;  %v528_v33 = vpop.f32.mrf.mxu1 }
  0xe9   :  { %v2300_v35 = vpop.f32.mrf.mxu0 }
  0xea   :  { %v2301_v36 = vadd.f32 %v2300_v35, %v2299_v30  ;;  %v529_v37 = vpop.f32.mrf.mxu1 }
  0xeb   :  { %v2302_v1 = vpop.f32.mrf.mxu0  ;;  %1703 = vmatmul.mubr.bf16.gmra.mxu0 %v2690_v31 }
  0xec   :  { %v3339_v40 = vadd.f32 %v2301_v36, %v529_v37  ;;  %v531_v41 = vpop.f32.mrf.mxu1  ;;  %1710 = vmatprep.mubr.bf16.mxu0 %v2694_v34 }
  0xed   :  { %v2303_v42 = vpop.f32.mrf.mxu0 }
  0xee   :  { %v2304_v43 = vadd.f32 %v2303_v42, %v2302_v1  ;;  %v534_v44 = vpop.f32.mrf.mxu1  ;;  %1792 = vmatmul.mubr.bf16.gmra.mxu1 %v2693_v38 }
  0xef   :  { %v2305_v45 = vpop.f32.mrf.mxu0  ;;  %2209 = vmatprep.mubr.msk.bf16.mxu1 %vm381_vm0, %v2697_v39 }
  0xf0   :  { %v3345_v47 = vadd.f32 %v2304_v43, %v534_v44  ;;  %v536_v48 = vpop.f32.mrf.mxu1 }
  0xf1   :  { %v2306_v3 = vpop.f32.mrf.mxu0 }
  0xf2   :  { %v2307_v2 = vadd.f32 %v2306_v3, %v2305_v45  ;;  %v537_v4 = vpop.f32.mrf.mxu1 }
  0xf3   :  { %v2308_v5 = vpop.f32.mrf.mxu0  ;;  %1711 = vmatmul.mubr.bf16.gmra.mxu0 %v2696_v46 }
  0xf4   :  { %v3356_v8 = vadd.f32 %v2307_v2, %v537_v4  ;;  %v539_v9 = vpop.f32.mrf.mxu1  ;;  %1718 = vmatprep.mubr.bf16.mxu0 %v2700_v49 }
  0xf5   :  { %v2309_v10 = vpop.f32.mrf.mxu0 }
  0xf6   :  { %v2310_v11 = vadd.f32 %v2309_v10, %v2308_v5  ;;  %v542_v12 = vpop.f32.mrf.mxu1  ;;  %1800 = vmatmul.mubr.bf16.gmra.mxu1 %v2699_v6  ;;  %v3386_v5 = vld [vmem:[%s3685_s2] ss:$0 sm:$0xff] }
  0xf7   :  { %v2311_v13 = vpop.f32.mrf.mxu0  ;;  %2210 = vmatprep.mubr.msk.bf16.mxu1 %vm381_vm0, %v2703_v7 }
  0xf8   :  { %v3362_v15 = vadd.f32 %v2310_v11, %v542_v12  ;;  %v544_v16 = vpop.f32.mrf.mxu1 }
  0xf9   :  { %v2312_v17 = vpop.f32.mrf.mxu0  ;;  %v3395_v16 = vld [vmem:[%s3686_s3] ss:$0 sm:$0xff] }
  0xfa   :  { %v2313_v18 = vadd.f32 %v2312_v17, %v2311_v13  ;;  %v545_v19 = vpop.f32.mrf.mxu1  ;;  %v587_v13 = vmul.f32 %v3386_v5, %v3328_v32 }
  0xfb   :  { %v2314_v20 = vpop.f32.mrf.mxu0  ;;  %1719 = vmatmul.mubr.bf16.gmra.mxu0 %v2702_v14 }
  0xfc   :  { %v3367_v21 = vadd.f32 %v2313_v18, %v545_v19  ;;  %v547_v22 = vpop.f32.mrf.mxu1 }
  0xfd   :  { %v2315_v24 = vpop.f32.mrf.mxu0  ;;  %v607_v22 = vadd.f32 %v3395_v16, %v587_v13 }
  0xfe   :  { %v2316_v26 = vadd.f32 %v2315_v24, %v2314_v20  ;;  %v550_v28 = vpop.f32.mrf.mxu1  ;;  %1808 = vmatmul.mubr.bf16.gmra.mxu1 %v2705_v0 }
  0xff   :  { %v2317_v50 = vpop.f32.mrf.mxu0 }
 0x100   :  { %v3369_v51 = vadd.f32 %v2316_v26, %v550_v28  ;;  %v552_v52 = vpop.f32.mrf.mxu1  ;;  %v588_v26 = vmul.f32 %v3386_v5, %v3339_v40 }
 0x101   :  { %v2318_v53 = vpop.f32.mrf.mxu0 }
 0x102   :  { %v2319_v54 = vadd.f32 %v2318_v53, %v2317_v50  ;;  %v553_v55 = vpop.f32.mrf.mxu1 }
 0x103   :  { %v2320_v56 = vpop.f32.mrf.mxu0 }
 0x104   :  { %v3371_v57 = vadd.f32 %v2319_v54, %v553_v55  ;;  %v555_v58 = vpop.f32.mrf.mxu1 }
 0x105   :  { %v2321_v59 = vpop.f32.mrf.mxu0  ;;  %v589_v58 = vmul.f32 %v3386_v5, %v3345_v47  ;;  %v590_v47 = vmul.f32 %v3386_v5, %v3356_v8  ;;  %v591_v8 = vmul.f32 %v3386_v5, %v3362_v15 }
 0x106   :  { %v2322_v60 = vadd.f32 %v2321_v59, %v2320_v56  ;;  %v558_v61 = vpop.f32.mrf.mxu1  ;;  %v621_v56 = vmax.f32 %v607_v22, 0.0 }
 0x107   :  { %v2323_v62 = vpop.f32.mrf.mxu0  ;;  %v611_v22 = vadd.f32 %v3395_v16, %v591_v8 }
 0x108   :  { %v3373_v63 = vadd.f32 %v2322_v60, %v558_v61  ;;  %v560_v23 = vpop.f32.mrf.mxu1  ;;  %v608_v60 = vadd.f32 %v3395_v16, %v588_v26 }
 0x109   :  { %v2324_v25 = vpop.f32.mrf.mxu0 }
 0x10a   :  { %v2325_v27 = vadd.f32 %v2324_v25, %v2323_v62  ;;  %v561_v29 = vpop.f32.mrf.mxu1 }
 0x10b   :  { %v2326_v30 = vpop.f32.mrf.mxu0 }
 0x10c   :  { %v3375_v31 = vadd.f32 %v2325_v27, %v561_v29  ;;  %v563_v33 = vpop.f32.mrf.mxu1 }
 0x10d   :  { %v2327_v34 = vpop.f32.mrf.mxu0 }
 0x10e   :  { %v2328_v35 = vadd.f32 %v2327_v34, %v2326_v30  ;;  %v566_v36 = vpop.f32.mrf.mxu1  ;;  %v609_v34 = vadd.f32 %v3395_v16, %v589_v58  ;;  %v625_v58 = vmax.f32 %v611_v22, 0.0 }
 0x10f   :  { %v2329_v37 = vpop.f32.mrf.mxu0 }
 0x110   :  { %v3377_v38 = vadd.f32 %v2328_v35, %v566_v36  ;;  %v568_v1 = vpop.f32.mrf.mxu1  ;;  %v622_v36 = vmax.f32 %v608_v60, 0.0 }
 0x111   :  { %v2330_v39 = vpop.f32.mrf.mxu0 }
 0x112   :  { %v2331_v41 = vadd.f32 %v2330_v39, %v2329_v37  ;;  %v569_v42 = vpop.f32.mrf.mxu1 }
 0x113   :  { %v2332_v43 = vpop.f32.mrf.mxu0 }
 0x114   :  { %v3379_v44 = vadd.f32 %v2331_v41, %v569_v42  ;;  %v571_v45 = vpop.f32.mrf.mxu1 }
 0x115   :  { %v2333_v46 = vpop.f32.mrf.mxu0 }
 0x116   :  { %v2334_v48 = vadd.f32 %v2333_v46, %v2332_v43  ;;  %v574_v49 = vpop.f32.mrf.mxu1 }
 0x117   :  { %v2335_v3 = vpop.f32.mrf.mxu0 }
 0x118   :  { %v3381_v2 = vadd.f32 %v2334_v48, %v574_v49  ;;  %v576_v4 = vpop.f32.mrf.mxu1  ;;  %v623_v49 = vmax.f32 %v609_v34, 0.0 }
 0x119   :  { %v2336_v6 = vpop.f32.mrf.mxu0 }
 0x11a   :  { %v2337_v7 = vadd.f32 %v2336_v6, %v2335_v3  ;;  %v577_v9 = vpop.f32.mrf.mxu1  ;;  %v610_v3 = vadd.f32 %v3395_v16, %v590_v47 }
 0x11b   :  { %v2354_v10 = vpop.f32.mrf.mxu0 }
 0x11c   :  { %v3388_v11 = vadd.f32 %v2337_v7, %v577_v9  ;;  %v579_v12 = vpop.f32.mrf.mxu1 }
 0x11d   :  { %v2355_v14 = vpop.f32.mrf.mxu0 }
 0x11e   :  { %v2356_v17 = vadd.f32 %v2355_v14, %v2354_v10  ;;  %v941_v18 = vpop.f32.mrf.mxu1 }
 0x11f   :  { %v2357_v19 = vpop.f32.mrf.mxu0 }
 0x120   :  { %v942_v0 = vadd.f32 %v2356_v17, %v941_v18  ;;  %v943_v20 = vpop.f32.mrf.mxu1 }
 0x121   :  { %v2358_v24 = vpop.f32.mrf.mxu0 }
 0x122   :  { %v996_v28 = vmul.f32 %v3386_v5, %v942_v0  ;;  %v2359_v32 = vadd.f32 %v2358_v24, %v2357_v19  ;;  %v944_v50 = vpop.f32.mrf.mxu1  ;;  %v624_v19 = vmax.f32 %v610_v3, 0.0  ;;  %v592_v0 = vmul.f32 %v3386_v5, %v3367_v21 }
 0x123   :  { %v2360_v52 = vpop.f32.mrf.mxu0  ;;  %v593_v21 = vmul.f32 %v3386_v5, %v3369_v51  ;;  %v594_v51 = vmul.f32 %v3386_v5, %v3371_v57 }
 0x124   :  { %v1010_v53 = vadd.f32 %v3395_v16, %v996_v28  ;;  %v945_v54 = vadd.f32 %v2359_v32, %v944_v50  ;;  %v946_v55 = vpop.f32.mrf.mxu1 }
 0x125   :  { %v2361_v59 = vpop.f32.mrf.mxu0  ;;  %v612_v55 = vadd.f32 %v3395_v16, %v592_v0  ;;  %v613_v34 = vadd.f32 %v3395_v16, %v593_v21 }
 0x126   :  { %v1024_v61 = vmax.f32 %v1010_v53, 0.0  ;;  %v997_v62 = vmul.f32 %v3386_v5, %v945_v54  ;;  %v2362_v40 = vadd.f32 %v2361_v59, %v2360_v52  ;;  %v949_v23 = vpop.f32.mrf.mxu1 }
 0x127   :  { %v2363_v25 = vpop.f32.mrf.mxu0 }
 0x128   :  { %v3406_v27 = vmax.f32 %v621_v56, %v1024_v61  ;;  %v1011_v29 = vadd.f32 %v3395_v16, %v997_v62  ;;  %v950_v30 = vadd.f32 %v2362_v40, %v949_v23  ;;  %v951_v33 = vpop.f32.mrf.mxu1 }
 0x129   :  { %v2364_v35 = vpop.f32.mrf.mxu0  ;;  %v626_v33 = vmax.f32 %v612_v55, 0.0 }
 0x12a   :  { %v1025_v37 = vmax.f32 %v1011_v29, 0.0  ;;  %v998_v1 = vmul.f32 %v3386_v5, %v950_v30  ;;  %v2365_v39 = vadd.f32 %v2364_v35, %v2363_v25  ;;  %v952_v41 = vpop.f32.mrf.mxu1 }
 0x12b   :  { %v2366_v42 = vpop.f32.mrf.mxu0 }
 0x12c   :  { %v3413_v43 = vmax.f32 %v622_v36, %v1025_v37  ;;  %v1012_v45 = vadd.f32 %v3395_v16, %v998_v1  ;;  %v953_v46 = vadd.f32 %v2365_v39, %v952_v41  ;;  %v954_v48 = vpop.f32.mrf.mxu1 }
 0x12d   :  { %v2367_v4 = vpop.f32.mrf.mxu0  ;;  %v627_v48 = vmax.f32 %v613_v34, 0.0 }
 0x12e   :  { %v1026_v6 = vmax.f32 %v1012_v45, 0.0  ;;  %v999_v7 = vmul.f32 %v3386_v5, %v953_v46  ;;  %v2368_v9 = vadd.f32 %v2367_v4, %v2366_v42  ;;  %v957_v10 = vpop.f32.mrf.mxu1  ;;  %v614_v4 = vadd.f32 %v3395_v16, %v594_v51 }
 0x12f   :  { %v2369_v12 = vpop.f32.mrf.mxu0 }
 0x130   :  { %v3420_v13 = vmax.f32 %v623_v49, %v1026_v6  ;;  %v1013_v14 = vadd.f32 %v3395_v16, %v999_v7  ;;  %v958_v17 = vadd.f32 %v2368_v9, %v957_v10  ;;  %v959_v18 = vpop.f32.mrf.mxu1  ;;  %v595_v49 = vmul.f32 %v3386_v5, %v3373_v63 }
 0x131   :  { %v2370_v20 = vpop.f32.mrf.mxu0  ;;  %v596_v63 = vmul.f32 %v3386_v5, %v3375_v31  ;;  %v628_v0 = vmax.f32 %v614_v4, 0.0  ;;  %v597_v31 = vmul.f32 %v3386_v5, %v3377_v38 }
 0x132   :  { %v1027_v15 = vmax.f32 %v1013_v14, 0.0  ;;  %v1000_v24 = vmul.f32 %v3386_v5, %v958_v17  ;;  %v2371_v26 = vadd.f32 %v2370_v20, %v2369_v12  ;;  %v960_v28 = vpop.f32.mrf.mxu1  ;;  %v615_v18 = vadd.f32 %v3395_v16, %v595_v49 }
 0x133   :  { %v2372_v32 = vpop.f32.mrf.mxu0  ;;  %v616_v55 = vadd.f32 %v3395_v16, %v596_v63 }
 0x134   :  { %v3427_v50 = vmax.f32 %v624_v19, %v1027_v15  ;;  %v1014_v52 = vadd.f32 %v3395_v16, %v1000_v24  ;;  %v961_v53 = vadd.f32 %v2371_v26, %v960_v28  ;;  %v962_v54 = vpop.f32.mrf.mxu1 }
 0x135   :  { %v2373_v56 = vpop.f32.mrf.mxu0  ;;  %v629_v54 = vmax.f32 %v615_v18, 0.0 }
 0x136   :  { %v1028_v59 = vmax.f32 %v1014_v52, 0.0  ;;  %v1001_v60 = vmul.f32 %v3386_v5, %v961_v53  ;;  %v2374_v61 = vadd.f32 %v2373_v56, %v2372_v32  ;;  %v965_v62 = vpop.f32.mrf.mxu1 }
 0x137   :  { %v2375_v40 = vpop.f32.mrf.mxu0 }
 0x138   :  { %v3434_v23 = vmax.f32 %v625_v58, %v1028_v59  ;;  %v1015_v25 = vadd.f32 %v3395_v16, %v1001_v60  ;;  %v966_v29 = vadd.f32 %v2374_v61, %v965_v62  ;;  %v967_v30 = vpop.f32.mrf.mxu1 }
 0x139   :  { %v2376_v47 = vpop.f32.mrf.mxu0  ;;  %v630_v30 = vmax.f32 %v616_v55, 0.0 }
 0x13a   :  { %v1029_v35 = vmax.f32 %v1015_v25, 0.0  ;;  %v1002_v36 = vmul.f32 %v3386_v5, %v966_v29  ;;  %v2377_v37 = vadd.f32 %v2376_v47, %v2375_v40  ;;  %v968_v1 = vpop.f32.mrf.mxu1  ;;  %v617_v47 = vadd.f32 %v3395_v16, %v597_v31 }
 0x13b   :  { %v2378_v39 = vpop.f32.mrf.mxu0 }
 0x13c   :  { %v3441_v41 = vmax.f32 %v626_v33, %v1029_v35  ;;  %v1016_v42 = vadd.f32 %v3395_v16, %v1002_v36  ;;  %v969_v45 = vadd.f32 %v2377_v37, %v968_v1  ;;  %v970_v46 = vpop.f32.mrf.mxu1  ;;  %v598_v33 = vmul.f32 %v3386_v5, %v3379_v44 }
 0x13d   :  { %v2379_v3 = vpop.f32.mrf.mxu0  ;;  %v599_v44 = vmul.f32 %v3386_v5, %v3381_v2  ;;  %v631_v49 = vmax.f32 %v617_v47, 0.0  ;;  %v600_v2 = vmul.f32 %v3386_v5, %v3388_v11 }
 0x13e   :  { %v1030_v57 = vmax.f32 %v1016_v42, 0.0  ;;  %v1003_v8 = vmul.f32 %v3386_v5, %v969_v45  ;;  %v2380_v6 = vadd.f32 %v2379_v3, %v2378_v39  ;;  %v973_v7 = vpop.f32.mrf.mxu1  ;;  %v618_v46 = vadd.f32 %v3395_v16, %v598_v33 }
 0x13f   :  { %v2381_v9 = vpop.f32.mrf.mxu0  ;;  %v619_v18 = vadd.f32 %v3395_v16, %v599_v44  ;;  %v620_v55 = vadd.f32 %v3395_v16, %v600_v2 }
 0x140   :  { %v3448_v10 = vmax.f32 %v627_v48, %v1030_v57  ;;  %v1017_v12 = vadd.f32 %v3395_v16, %v1003_v8  ;;  %v974_v14 = vadd.f32 %v2380_v6, %v973_v7  ;;  %v975_v17 = vpop.f32.mrf.mxu1 }
 0x141   :  { %v2382_v19 = vpop.f32.mrf.mxu0  ;;  %v632_v17 = vmax.f32 %v618_v46, 0.0 }
 0x142   :  { %v1031_v20 = vmax.f32 %v1017_v12, 0.0  ;;  %v1004_v22 = vmul.f32 %v3386_v5, %v974_v14  ;;  %v2383_v15 = vadd.f32 %v2382_v19, %v2381_v9  ;;  %v976_v24 = vpop.f32.mrf.mxu1 }
 0x143   :  { %v2384_v26 = vpop.f32.mrf.mxu0 }
 0x144   :  { %v3455_v28 = vmax.f32 %v628_v0, %v1031_v20  ;;  %v1018_v32 = vadd.f32 %v3395_v16, %v1004_v22  ;;  %v977_v52 = vadd.f32 %v2383_v15, %v976_v24  ;;  %v978_v53 = vpop.f32.mrf.mxu1 }
 0x145   :  { %v2385_v21 = vpop.f32.mrf.mxu0 }
 0x146   :  { %v1032_v56 = vmax.f32 %v1018_v32, 0.0  ;;  %v1005_v58 = vmul.f32 %v3386_v5, %v977_v52  ;;  %v2386_v59 = vadd.f32 %v2385_v21, %v2384_v26  ;;  %v981_v60 = vpop.f32.mrf.mxu1 }
 0x147   :  { %v2387_v61 = vpop.f32.mrf.mxu0 }
 0x148   :  { %v3462_v62 = vmax.f32 %v629_v54, %v1032_v56  ;;  %v1019_v40 = vadd.f32 %v3395_v16, %v1005_v58  ;;  %v982_v25 = vadd.f32 %v2386_v59, %v981_v60  ;;  %v983_v29 = vpop.f32.mrf.mxu1  ;;  %v633_v54 = vmax.f32 %v619_v18, 0.0 }
 0x149   :  { %v2388_v34 = vpop.f32.mrf.mxu0 }
 0x14a   :  { %3688 = vst [vmem:[#allocation2_spill] sm:$0xff] %v3462_v62  ;;  %v1033_v38 = vmax.f32 %v1019_v40, 0.0  ;;  %v1006_v51 = vmul.f32 %v3386_v5, %v982_v25  ;;  %v2389_v35 = vadd.f32 %v2388_v34, %v2387_v61  ;;  %v984_v36 = vpop.f32.mrf.mxu1  ;;  %v634_v40 = vmax.f32 %v620_v55, 0.0 }
 0x14b   :  { %v2390_v37 = vpop.f32.mrf.mxu0 }
 0x14c   :  { %v3469_v1 = vmax.f32 %v630_v30, %v1033_v38  ;;  %v1020_v39 = vadd.f32 %v3395_v16, %v1006_v51  ;;  %v985_v42 = vadd.f32 %v2389_v35, %v984_v36  ;;  %v986_v45 = vpop.f32.mrf.mxu1 }
 0x14d   :  { %v2391_v48 = vpop.f32.mrf.mxu0 }
 0x14e   :  { %3689 = vst [vmem:[#allocation3_spill] sm:$0xff] %v3469_v1  ;;  %v1034_v3 = vmax.f32 %v1020_v39, 0.0  ;;  %v1007_v4 = vmul.f32 %v3386_v5, %v985_v42  ;;  %v2392_v57 = vadd.f32 %v2391_v48, %v2390_v37  ;;  %v989_v8 = vpop.f32.mrf.mxu1 }
 0x14f   :  { %v2393_v6 = vpop.f32.mrf.mxu0 }
 0x150   :  { %v3476_v7 = vmax.f32 %v631_v49, %v1034_v3  ;;  %v1021_v9 = vadd.f32 %v3395_v16, %v1007_v4  ;;  %v990_v12 = vadd.f32 %v2392_v57, %v989_v8  ;;  %v991_v14 = vpop.f32.mrf.mxu1 }
 0x151   :  { %v2394_v63 = vpop.f32.mrf.mxu0 }
 0x152   :  { %3690 = vst [vmem:[#allocation4_spill] sm:$0xff] %v3476_v7  ;;  %v1035_v19 = vmax.f32 %v1021_v9, 0.0  ;;  %v1008_v0 = vmul.f32 %v3386_v5, %v990_v12  ;;  %v2395_v20 = vadd.f32 %v2394_v63, %v2393_v6  ;;  %v992_v22 = vpop.f32.mrf.mxu1 }
 0x153   :  { %v3483_v15 = vpop.f32.mrf.mxu0 }
 0x154   :  { %v3485_v24 = vmax.f32 %v632_v17, %v1035_v19  ;;  %v1022_v26 = vadd.f32 %v3395_v16, %v1008_v0  ;;  %v993_v32 = vadd.f32 %v2395_v20, %v992_v22  ;;  %v994_v52 = vpop.f32.mrf.mxu1 }
 0x155   :  { %v2413_v53 = vpop.f32.mrf.mxu0 }
 0x156   :  { %3691 = vst [vmem:[#allocation5_spill] sm:$0xff] %v3485_v24  ;;  %v1036_v21 = vmax.f32 %v1022_v26, 0.0  ;;  %v1009_v11 = vmul.f32 %v3386_v5, %v993_v32  ;;  %v1358_v31 = vpop.f32.mrf.mxu1 }
 0x157   :  { %v2415_v56 = vpop.f32.mrf.mxu0 }
 0x158   :  { %v3490_v58 = vmax.f32 %v633_v54, %v1036_v21  ;;  %v1023_v59 = vadd.f32 %v3395_v16, %v1009_v11  ;;  %v1360_v60 = vpop.f32.mrf.mxu1 }
 0x159   :  { %v2416_v61 = vpop.f32.mrf.mxu0 }
 0x15a   :  { %3692 = vst [vmem:[#allocation6_spill] sm:$0xff] %v3490_v58  ;;  %v1037_v25 = vmax.f32 %v1023_v59, 0.0  ;;  %v1361_v29 = vpop.f32.mrf.mxu1 }
 0x15b   :  { %v2418_v30 = vpop.f32.mrf.mxu0 }
 0x15c   :  { %v3493_v33 = vmax.f32 %v634_v40, %v1037_v25  ;;  %v1363_v34 = vpop.f32.mrf.mxu1 }
 0x15d   :  { %v2419_v47 = vpop.f32.mrf.mxu0 }
 0x15e   :  { %3693 = vst [vmem:[#allocation7_spill] sm:$0xff] %v3493_v33  ;;  %v3495_v38 = vpop.f32.mrf.mxu1  ;;  %v2420_v62 = vadd.f32 %v2419_v47, %v2418_v30 }
 0x15f   :  { %v2421_v51 = vpop.f32.mrf.mxu0 }
 0x160   :  { %v1368_v35 = vpop.f32.mrf.mxu1 }
 0x161   :  { %v2422_v36 = vpop.f32.mrf.mxu0 }
 0x162   :  { %v3497_v37 = vpop.f32.mrf.mxu1 }
 0x163   :  { %v3499_v39 = vpop.f32.mrf.mxu0 }
 0x164   :  { %v1371_v42 = vpop.f32.mrf.mxu1 }
 0x165   :  { %v3501_v45 = vpop.f32.mrf.mxu0  ;;  %v2414_v42 = vadd.f32 %v2413_v53, %v3483_v15 }
 0x166   :  { %v3503_v46 = vpop.f32.mrf.mxu1 }
 0x167   :  { %v3505_v44 = vpop.f32.mrf.mxu0 }
 0x168   :  { %v1376_v48 = vpop.f32.mrf.mxu1 }
 0x169   :  { %v3507_v49 = vpop.f32.mrf.mxu0 }
 0x16a   :  { %v3509_v3 = vpop.f32.mrf.mxu1 }
 0x16b   :  { %v3511_v4 = vpop.f32.mrf.mxu0 }
 0x16c   :  { %v1379_v57 = vpop.f32.mrf.mxu1 }
 0x16d   :  { %v3513_v8 = vpop.f32.mrf.mxu0 }
 0x16e   :  { %v3515_v6 = vpop.f32.mrf.mxu1 }
 0x16f   :  { %v3517_v9 = vpop.f32.mrf.mxu0 }
 0x170   :  { %v1384_v12 = vpop.f32.mrf.mxu1 }
 0x171   :  { %v3519_v14 = vpop.f32.mrf.mxu0 }
 0x172   :  { %v3521_v17 = vpop.f32.mrf.mxu1 }
 0x173   :  { %v3523_v18 = vpop.f32.mrf.mxu0 }
 0x174   :  { %v1387_v63 = vpop.f32.mrf.mxu1 }
 0x175   :  { %v3525_v2 = vpop.f32.mrf.mxu0  ;;  %v2417_v63 = vadd.f32 %v2416_v61, %v2415_v56 }
 0x176   :  { %v3527_v19 = vpop.f32.mrf.mxu1 }
 0x177   :  { %v3529_v0 = vpop.f32.mrf.mxu0  ;;  %v1362_v24 = vadd.f32 %v2417_v63, %v1361_v29  ;;  %v1367_v29 = vadd.f32 %v2420_v62, %v3495_v38  ;;  %v2426_v62 = vadd.f32 %v3501_v45, %v3499_v39 }
 0x178   :  { %v1392_v20 = vpop.f32.mrf.mxu1 }
 0x179   :  { %v3531_v22 = vpop.f32.mrf.mxu0  ;;  %v1375_v45 = vadd.f32 %v2426_v62, %v3503_v46  ;;  %v2432_v62 = vadd.f32 %v3513_v8, %v3511_v4 }
 0x17a   :  { %v3533_v26 = vpop.f32.mrf.mxu1 }
 0x17b   :  { %v3535_v32 = vpop.f32.mrf.mxu0 }
 0x17c   :  { %v1395_v52 = vpop.f32.mrf.mxu1 }
 0x17d   :  { %v3537_v54 = vpop.f32.mrf.mxu0  ;;  %v1359_v52 = vadd.f32 %v2414_v42, %v1358_v31 }
 0x17e   :  { %v3539_v55 = vpop.f32.mrf.mxu1 }
 0x17f   :  { %v3541_v21 = vpop.f32.mrf.mxu0  ;;  %v1413_v1 = vmul.f32 %v3386_v5, %v1359_v52 }
 0x180   :  { %v1400_v11 = vpop.f32.mrf.mxu1 }
 0x181   :  { %v3543_v59 = vpop.f32.mrf.mxu0 }
 0x182   :  { %v3545_v60 = vpop.f32.mrf.mxu1 }
 0x183   :  { %v3547_v40 = vpop.f32.mrf.mxu0 }
 0x184   :  { %v1403_v25 = vpop.f32.mrf.mxu1 }
 0x185   :  { %v3549_v34 = vpop.f32.mrf.mxu0 }
 0x186   :  { %v3551_v35 = vpop.f32.mrf.mxu1 }
 0x187   :  { %3694 = vst [vmem:[#allocation8_spill] sm:$0xff] %v3551_v35  ;;  %v3554_v48 = vpop.f32.mrf.mxu0 }
 0x188   :  { %3695 = vst [vmem:[#allocation9_spill] sm:$0xff] %v3554_v48  ;;  %v1408_v57 = vpop.f32.mrf.mxu1  ;;  %v2423_v48 = vadd.f32 %v2422_v36, %v2421_v51 }
 0x189   :  { %v3556_v12 = vpop.f32.mrf.mxu0 }
 0x18a   :  { %3696 = vst [vmem:[#allocation10_spill] sm:$0xff] %v3556_v12  ;;  %v3558_v20 = vpop.f32.mrf.mxu1  ;;  %v1414_v12 = vmul.f32 %v3386_v5, %v1362_v24 }
 0x18b   :  { %v2470_v11 = vpop.f32.mrf.mxu0 }
 0x18c   :  { %v1411_v33 = vpop.f32.mrf.mxu1  ;;  %v1428_v51 = vadd.f32 %v3395_v16, %v1414_v12 }
 0x18d   :  { %v2471_v58 = vpop.f32.mrf.mxu0  ;;  %v1427_v33 = vadd.f32 %v3395_v16, %v1413_v1  ;;  %v1415_v1 = vmul.f32 %v3386_v5, %v1367_v29 }
 0x18e   :  { %v2472_v25 = vadd.f32 %v2471_v58, %v2470_v11  ;;  %v1761_v7 = vpop.f32.mrf.mxu1 }
 0x18f   :  { %v2473_v35 = vpop.f32.mrf.mxu0  ;;  %v1441_v11 = vmax.f32 %v1427_v33, 0.0  ;;  %v1429_v39 = vadd.f32 %v3395_v16, %v1415_v1  ;;  %v1417_v1 = vmul.f32 %v3386_v5, %v1375_v45 }
 0x190   :  { %v1762_v15 = vadd.f32 %v2472_v25, %v1761_v7  ;;  %v1763_v53 = vpop.f32.mrf.mxu1  ;;  %v1370_v7 = vadd.f32 %v2423_v48, %v3497_v37  ;;  %v2429_v48 = vadd.f32 %v3507_v49, %v3505_v44 }
 0x191   :  { %v2474_v57 = vpop.f32.mrf.mxu0 }
 0x192   :  { %v1816_v56 = vmul.f32 %v3386_v5, %v1762_v15  ;;  %v2475_v61 = vadd.f32 %v2474_v57, %v2473_v35  ;;  %v1764_v31 = vpop.f32.mrf.mxu1  ;;  %v1416_v37 = vmul.f32 %v3386_v5, %v1370_v7  ;;  %v1378_v49 = vadd.f32 %v2429_v48, %v3509_v3 }
 0x193   :  { %v2476_v58 = vpop.f32.mrf.mxu0 }
 0x194   :  { %v1830_v42 = vadd.f32 %v3395_v16, %v1816_v56  ;;  %v1765_v63 = vadd.f32 %v2475_v61, %v1764_v31  ;;  %v1766_v30 = vpop.f32.mrf.mxu1  ;;  %v1442_v56 = vmax.f32 %v1428_v51, 0.0  ;;  %v1430_v44 = vadd.f32 %v3395_v16, %v1416_v37 }
 0x195   :  { %v2477_v47 = vpop.f32.mrf.mxu0 }
 0x196   :  { %v1844_v36 = vmax.f32 %v1830_v42, 0.0  ;;  %v1817_v24 = vmul.f32 %v3386_v5, %v1765_v63  ;;  %v2478_v52 = vadd.f32 %v2477_v47, %v2476_v58  ;;  %v1769_v35 = vpop.f32.mrf.mxu1 }
 0x197   :  { %v2479_v38 = vpop.f32.mrf.mxu0 }
 0x198   :  { %v1831_v25 = vadd.f32 %v3395_v16, %v1817_v24  ;;  %v1770_v15 = vadd.f32 %v2478_v52, %v1769_v35  ;;  %v1771_v53 = vpop.f32.mrf.mxu1  ;;  %v1858_v12 = vmax.f32 %v1441_v11, %v1844_v36  ;;  %v1443_v11 = vmax.f32 %v1429_v39, 0.0 }
 0x199   :  { %v2480_v57 = vpop.f32.mrf.mxu0  ;;  %v1418_v53 = vmul.f32 %v3386_v5, %v1378_v49 }
 0x19a   :  { %v1845_v61 = vmax.f32 %v1831_v25, 0.0  ;;  %v1818_v31 = vmul.f32 %v3386_v5, %v1770_v15  ;;  %v2481_v33 = vadd.f32 %v2480_v57, %v2479_v38  ;;  %v1772_v29 = vpop.f32.mrf.mxu1  ;;  %v1872_v47 = vmax.f32 %v3406_v27, %v1858_v12 }
 0x19b   :  { %v2482_v58 = vpop.f32.mrf.mxu0  ;;  %v1444_v12 = vmax.f32 %v1430_v44, 0.0  ;;  %v1432_v45 = vadd.f32 %v3395_v16, %v1418_v53 }
 0x19c   :  { %v1859_v42 = vmax.f32 %v1442_v56, %v1845_v61  ;;  %v1832_v63 = vadd.f32 %v3395_v16, %v1818_v31  ;;  %v1773_v30 = vadd.f32 %v2481_v33, %v1772_v29  ;;  %v1774_v7 = vpop.f32.mrf.mxu1  ;;  %v1431_v61 = vadd.f32 %v3395_v16, %v1417_v1 }
 0x19d   :  { %v2483_v51 = vpop.f32.mrf.mxu0  ;;  %v1383_v31 = vadd.f32 %v2432_v62, %v3515_v6  ;;  %v1446_v62 = vmax.f32 %v1432_v45, 0.0 }
 0x19e   :  { %v1873_v36 = vmax.f32 %v3413_v43, %v1859_v42  ;;  %v1846_v24 = vmax.f32 %v1832_v63, 0.0  ;;  %v1819_v52 = vmul.f32 %v3386_v5, %v1773_v30  ;;  %v2484_v35 = vadd.f32 %v2483_v51, %v2482_v58  ;;  %v1777_v46 = vpop.f32.mrf.mxu1 }
 0x19f   :  { %v2485_v38 = vpop.f32.mrf.mxu0  ;;  %v2435_v43 = vadd.f32 %v3519_v14, %v3517_v9  ;;  %v1419_v51 = vmul.f32 %v3386_v5, %v1383_v31 }
 0x1a0   :  { %v2242_v25 = vpack.c.bf16 %v1873_v36, %v1872_v47  ;;  %v1833_v3 = vadd.f32 %v3395_v16, %v1819_v52  ;;  %v1778_v15 = vadd.f32 %v2484_v35, %v1777_v46  ;;  %v1779_v27 = vpop.f32.mrf.mxu1  ;;  %v1860_v37 = vmax.f32 %v1443_v11, %v1846_v24 }
 0x1a1   :  { %v2486_v48 = vpop.f32.mrf.mxu0  ;;  %v1386_v58 = vadd.f32 %v2435_v43, %v3521_v17  ;;  %v1445_v47 = vmax.f32 %v1431_v61, 0.0  ;;  %v2438_v36 = vadd.f32 %v3525_v2, %v3523_v18 }
 0x1a2   :  { %2243 = vst [vmem:[%s3687_s4] sm:$0xff] %v2242_v25   ;;  %v1847_v57 = vmax.f32 %v1833_v3, 0.0  ;;  %v1820_v4 = vmul.f32 %v3386_v5, %v1778_v15  ;;  %v2487_v8 = vadd.f32 %v2486_v48, %v2485_v38  ;;  %v1780_v56 = vpop.f32.mrf.mxu1  ;;  %v1874_v42 = vmax.f32 %v3420_v13, %v1860_v37 }
 0x1a3   :  { %v2488_v33 = vpop.f32.mrf.mxu0  ;;  %v1420_v46 = vmul.f32 %v3386_v5, %v1386_v58  ;;  %v1433_v3 = vadd.f32 %v3395_v16, %v1419_v51  ;;  %v1391_v15 = vadd.f32 %v2438_v36, %v3527_v19 }
 0x1a4   :  { %v1861_v29 = vmax.f32 %v1444_v12, %v1847_v57  ;;  %v1834_v9 = vadd.f32 %v3395_v16, %v1820_v4  ;;  %v1781_v14 = vadd.f32 %v2487_v8, %v1780_v56  ;;  %v1782_v39 = vpop.f32.mrf.mxu1 }
 0x1a5   :  { %v2489_v63 = vpop.f32.mrf.mxu0  ;;  %v1434_v37 = vadd.f32 %v3395_v16, %v1420_v46  ;;  %v1447_v31 = vmax.f32 %v1433_v3, 0.0  ;;  %v3698_v3 = vld [vmem:[#allocation10_spill] sm:$0xff] }
 0x1a6   :  { %v1875_v30 = vmax.f32 %v3427_v50, %v1861_v29  ;;  %v1848_v7 = vmax.f32 %v1834_v9, 0.0  ;;  %v1821_v44 = vmul.f32 %v3386_v5, %v1781_v14  ;;  %v2490_v49 = vadd.f32 %v2489_v63, %v2488_v33  ;;  %v1785_v6 = vpop.f32.mrf.mxu1 }
 0x1a7   :  { %v2491_v24 = vpop.f32.mrf.mxu0  ;;  %v2441_v50 = vadd.f32 %v3531_v22, %v3529_v0  ;;  %v1421_v33 = vmul.f32 %v3386_v5, %v1391_v15  ;;  %v2444_v29 = vadd.f32 %v3537_v54, %v3535_v32  ;;  %v1448_v63 = vmax.f32 %v1434_v37, 0.0 }
 0x1a8   :  { %v2247_v52 = vpack.c.bf16 %v1875_v30, %v1874_v42  ;;  %v1835_v17 = vadd.f32 %v3395_v16, %v1821_v44  ;;  %v1786_v35 = vadd.f32 %v2490_v49, %v1785_v6  ;;  %v1787_v13 = vpop.f32.mrf.mxu1  ;;  %v1862_v11 = vmax.f32 %v1445_v47, %v1848_v7 }
 0x1a9   :  { %v2492_v1 = vpop.f32.mrf.mxu0  ;;  %v1394_v48 = vadd.f32 %v2441_v50, %v3533_v26  ;;  %v1435_v44 = vadd.f32 %v3395_v16, %v1421_v33  ;;  %v1399_v49 = vadd.f32 %v2444_v29, %v3539_v55  ;;  %v3700_v33 = vld [vmem:[#allocation2_spill] sm:$0xff] }
 0x1aa   :  { %2274 = vst [vmem:[%s3687_s4 + $0x8] sm:$0xff] %v2247_v52   ;;  %v1849_v38 = vmax.f32 %v1835_v17, 0.0  ;;  %v1822_v18 = vmul.f32 %v3386_v5, %v1786_v35  ;;  %v2493_v2 = vadd.f32 %v2492_v1, %v2491_v24  ;;  %v1788_v25 = vpop.f32.mrf.mxu1  ;;  %v1876_v12 = vmax.f32 %v3434_v23, %v1862_v11 }
 0x1ab   :  { %v2494_v27 = vpop.f32.mrf.mxu0  ;;  %v1422_v45 = vmul.f32 %v3386_v5, %v1394_v48  ;;  %v1449_v11 = vmax.f32 %v1435_v44, 0.0  ;;  %v1423_v1 = vmul.f32 %v3386_v5, %v1399_v49 }
 0x1ac   :  { %v1863_v53 = vmax.f32 %v1446_v62, %v1849_v38  ;;  %v1836_v0 = vadd.f32 %v3395_v16, %v1822_v18  ;;  %v1789_v22 = vadd.f32 %v2493_v2, %v1788_v25  ;;  %v1790_v43 = vpop.f32.mrf.mxu1  ;;  %v2450_v38 = vadd.f32 %v3549_v34, %v3547_v40 }
 0x1ad   :  { %v2495_v57 = vpop.f32.mrf.mxu0  ;;  %v1436_v36 = vadd.f32 %v3395_v16, %v1422_v45  ;;  %v1437_v37 = vadd.f32 %v3395_v16, %v1423_v1 }
 0x1ae   :  { %v1877_v4 = vmax.f32 %v3441_v41, %v1863_v53  ;;  %v1850_v8 = vmax.f32 %v1836_v0, 0.0  ;;  %v1823_v56 = vmul.f32 %v3386_v5, %v1789_v22  ;;  %v2496_v61 = vadd.f32 %v2495_v57, %v2494_v27  ;;  %v1793_v19 = vpop.f32.mrf.mxu1 }
 0x1af   :  { %v2497_v9 = vpop.f32.mrf.mxu0  ;;  %v2447_v41 = vadd.f32 %v3543_v59, %v3541_v21  ;;  %v1450_v0 = vmax.f32 %v1436_v36, 0.0 }
 0x1b0   :  { %v2252_v14 = vpack.c.bf16 %v1877_v4, %v1876_v12  ;;  %v1837_v26 = vadd.f32 %v3395_v16, %v1823_v56  ;;  %v1794_v39 = vadd.f32 %v2496_v61, %v1793_v19  ;;  %v1795_v23 = vpop.f32.mrf.mxu1  ;;  %v1864_v58 = vmax.f32 %v1447_v31, %v1850_v8  ;;  %v3699_v12 = vld [vmem:[#allocation8_spill] sm:$0xff] }
 0x1b1   :  { %v2498_v42 = vpop.f32.mrf.mxu0  ;;  %v1402_v24 = vadd.f32 %v2447_v41, %v3545_v60  ;;  %v1407_v57 = vadd.f32 %v2450_v38, %v3699_v12 }
 0x1b2   :  { %2275 = vst [vmem:[%s3687_s4 + $0x10] sm:$0xff] %v2252_v14   ;;  %v1851_v30 = vmax.f32 %v1837_v26, 0.0  ;;  %v1824_v32 = vmul.f32 %v3386_v5, %v1794_v39  ;;  %v2499_v54 = vadd.f32 %v2498_v42, %v2497_v9  ;;  %v1796_v7 = vpop.f32.mrf.mxu1  ;;  %v1878_v52 = vmax.f32 %v3448_v10, %v1864_v58  ;;  %v3701_v14 = vld [vmem:[#allocation3_spill] sm:$0xff] }
 0x1b3   :  { %v2500_v6 = vpop.f32.mrf.mxu0  ;;  %v1424_v25 = vmul.f32 %v3386_v5, %v1402_v24  ;;  %v1451_v58 = vmax.f32 %v1437_v37, 0.0 }
 0x1b4   :  { %v1865_v47 = vmax.f32 %v1448_v63, %v1851_v30  ;;  %v1838_v21 = vadd.f32 %v3395_v16, %v1824_v32  ;;  %v1797_v59 = vadd.f32 %v2499_v54, %v1796_v7  ;;  %v1798_v51 = vpop.f32.mrf.mxu1  ;;  %v1425_v63 = vmul.f32 %v3386_v5, %v1407_v57 }
 0x1b5   :  { %v2501_v17 = vpop.f32.mrf.mxu0  ;;  %v1438_v19 = vadd.f32 %v3395_v16, %v1424_v25 }
 0x1b6   :  { %v1879_v35 = vmax.f32 %v3455_v28, %v1865_v47  ;;  %v1852_v13 = vmax.f32 %v1838_v21, 0.0  ;;  %v1825_v46 = vmul.f32 %v3386_v5, %v1797_v59  ;;  %v2502_v50 = vadd.f32 %v2501_v17, %v2500_v6  ;;  %v1801_v55 = vpop.f32.mrf.mxu1  ;;  %v3697_v28 = vld [vmem:[#allocation9_spill] sm:$0xff] }
 0x1b7   :  { %v2503_v62 = vpop.f32.mrf.mxu0  ;;  %v2453_v15 = vadd.f32 %v3698_v3, %v3697_v28  ;;  %v1439_v36 = vadd.f32 %v3395_v16, %v1425_v63  ;;  %v3704_v3 = vld [vmem:[#allocation6_spill] sm:$0xff] }
 0x1b8   :  { %v2257_v18 = vpack.c.bf16 %v1879_v35, %v1878_v52  ;;  %v1839_v60 = vadd.f32 %v3395_v16, %v1825_v46  ;;  %v1802_v2 = vadd.f32 %v2502_v50, %v1801_v55  ;;  %v1803_v10 = vpop.f32.mrf.mxu1  ;;  %v1866_v27 = vmax.f32 %v1449_v11, %v1852_v13  ;;  %v3702_v46 = vld [vmem:[#allocation4_spill] sm:$0xff]  ;;  %v3703_v55 = vld [vmem:[#allocation5_spill] sm:$0xff] }
 0x1b9   :  { %v2504_v53 = vpop.f32.mrf.mxu0  ;;  %v1410_v31 = vadd.f32 %v2453_v15, %v3558_v20  ;;  %v1452_v20 = vmax.f32 %v1438_v19, 0.0  ;;  %v1453_v38 = vmax.f32 %v1439_v36, 0.0 }
 0x1ba   :  { %2276 = vst [vmem:[%s3687_s4 + $0x18] sm:$0xff] %v2257_v18   ;;  %v1853_v22 = vmax.f32 %v1839_v60, 0.0  ;;  %v1826_v40 = vmul.f32 %v3386_v5, %v1802_v2  ;;  %v2505_v34 = vadd.f32 %v2504_v53, %v2503_v62  ;;  %v1804_v43 = vpop.f32.mrf.mxu1  ;;  %v1880_v29 = vmax.f32 %v3700_v33, %v1866_v27  ;;  %v3705_v27 = vld [vmem:[#allocation7_spill] sm:$0xff] }
 0x1bb   :  { %v2506_v48 = vpop.f32.mrf.mxu0  ;;  %v1426_v44 = vmul.f32 %v3386_v5, %v1410_v31 }
 0x1bc   :  { %v1867_v4 = vmax.f32 %v1450_v0, %v1853_v22  ;;  %v1840_v8 = vadd.f32 %v3395_v16, %v1826_v40  ;;  %v1805_v56 = vadd.f32 %v2505_v34, %v1804_v43  ;;  %v1806_v61 = vpop.f32.mrf.mxu1 }
 0x1bd   :  { %v2507_v9 = vpop.f32.mrf.mxu0  ;;  %v1440_v13 = vadd.f32 %v3395_v16, %v1426_v44 }
 0x1be   :  { %v1881_v26 = vmax.f32 %v3701_v14, %v1867_v4  ;;  %v1854_v39 = vmax.f32 %v1840_v8, 0.0  ;;  %v1827_v23 = vmul.f32 %v3386_v5, %v1805_v56  ;;  %v2508_v45 = vadd.f32 %v2507_v9, %v2506_v48  ;;  %v1809_v41 = vpop.f32.mrf.mxu1 }
 0x1bf   :  { %v2509_v42 = vpop.f32.mrf.mxu0  ;;  %v1454_v2 = vmax.f32 %v1440_v13, 0.0 }
 0x1c0   :  { %v2262_v30 = vpack.c.bf16 %v1881_v26, %v1880_v29  ;;  %v1841_v32 = vadd.f32 %v3395_v16, %v1827_v23  ;;  %v1810_v54 = vadd.f32 %v2508_v45, %v1809_v41  ;;  %v1811_v7 = vpop.f32.mrf.mxu1  ;;  %v1868_v6 = vmax.f32 %v1451_v58, %v1854_v39 }
 0x1c1   :  { %v2510_v49 = vpop.f32.mrf.mxu0 }
 0x1c2   :  { %2277 = vst [vmem:[%s3687_s4 + $0x20] sm:$0xff] %v2262_v30   ;;  %v1855_v47 = vmax.f32 %v1841_v32, 0.0  ;;  %v1828_v21 = vmul.f32 %v3386_v5, %v1810_v54  ;;  %v2511_v59 = vadd.f32 %v2510_v49, %v2509_v42  ;;  %v1812_v51 = vpop.f32.mrf.mxu1  ;;  %v1882_v50 = vmax.f32 %v3702_v46, %v1868_v6 }
 0x1c4   :  { %v1869_v24 = vmax.f32 %v1452_v20, %v1855_v47  ;;  %v1842_v52 = vadd.f32 %v3395_v16, %v1828_v21  ;;  %v1813_v17 = vadd.f32 %v2511_v59, %v1812_v51  ;;  %v1814_v35 = vpop.f32.mrf.mxu1 }
 0x1c6   :  { %v1883_v11 = vmax.f32 %v3703_v55, %v1869_v24  ;;  %v1856_v1 = vmax.f32 %v1842_v52, 0.0  ;;  %v1829_v62 = vmul.f32 %v3386_v5, %v1813_v17 }
 0x1c8   :  { %v2267_v18 = vpack.c.bf16 %v1883_v11, %v1882_v50  ;;  %v1843_v60 = vadd.f32 %v3395_v16, %v1829_v62  ;;  %v1870_v10 = vmax.f32 %v1453_v38, %v1856_v1 }
 0x1ca   :  { %2278 = vst [vmem:[%s3687_s4 + $0x28] sm:$0xff] %v2267_v18   ;;  %v1857_v25 = vmax.f32 %v1843_v60, 0.0  ;;  %v1884_v15 = vmax.f32 %v3704_v3, %v1870_v10 }
 0x1cc   :  { %v1871_v28 = vmax.f32 %v1454_v2, %v1857_v25 }
 0x1ce   :  { %v1885_v53 = vmax.f32 %v3705_v27, %v1871_v28 }
 0x1d0   :  { %v2272_v0 = vpack.c.bf16 %v1885_v53, %v1884_v15 }
 0x1d2   :  { %2279 = vst [vmem:[%s3687_s4 + $0x30] sm:$0xff] %v2272_v0  }

// kernel: cnn_fashion_mnist_forward.5
= control target key start
LH: loop header
LB: loop body
LE: loop exit
PB: predicated region body
PF: predicated region fallthrough
CT: control target
= control target key end

     0   :  { %vm1558_vm0 = vmmov 0   ;;  %vm885_vm1 = vcmask 261120   ;;  %s1921_s1 = inlined_call_operand.vmem [shape: bf16[1568,128], index: 1, kind: input, shape index: {}]   ;;  %s1922_s0 = inlined_call_operand.vmem [shape: bf16[16,1568], index: 0, kind: input, shape index: {}]   ;;  %s1923_s2 = inlined_call_operand.vmem [shape: f32[1,128], index: 2, kind: input, shape index: {}]   ;;  %s1924_s3 = inlined_call_operand.vmem [shape: f32[16,128], index: 3, kind: output, shape index: {}]  }
   0x1   :  { %v1440_v0 = vld [vmem:[%s1921_s1 + $0x78] sm:$0xff]   ;;  %v1444_v4 = vld [vmem:[%s1921_s1 + $0x70] sm:$0xff]   ;;  %v1448_v8 = vld [vmem:[%s1921_s1 + $0x68] sm:$0xff]  }
   0x2   :  { %v1441_v1 = vld [vmem:[%s1921_s1 + $0xf8] sm:$0xff]   ;;  %1295 = vmatprep.subr.bf16.mxu0 %v1440_v0  ;;  %v1445_v5 = vld [vmem:[%s1921_s1 + $0xf0] sm:$0xff]   ;;  %v1449_v9 = vld [vmem:[%s1921_s1 + $0xe8] sm:$0xff]  }
   0x3   :  { %v1442_v2 = vld [vmem:[%s1921_s1 + $0x38] sm:$0xff]   ;;  %1317 = vmatprep.subr.bf16.mxu1 %v1441_v1  ;;  %v1446_v6 = vld [vmem:[%s1921_s1 + $0x30] sm:$0xff]   ;;  %v1450_v10 = vld [vmem:[%s1921_s1 + $0x28] sm:$0xff]  }
   0x4   :  { %v1443_v3 = vld [vmem:[%s1921_s1 + $0xb8] sm:$0xff]   ;;  %1296 = vmatpush3.bf16.msra.mxu0 %v1442_v2  ;;  %v1447_v7 = vld [vmem:[%s1921_s1 + $0xb0] sm:$0xff]   ;;  %v1451_v11 = vld [vmem:[%s1921_s1 + $0xa8] sm:$0xff]  }
   0x5   :  { %1318 = vmatpush3.bf16.msra.mxu1 %v1443_v3  ;;  %1297 = vmatprep.subr.bf16.mxu0 %v1444_v4  ;;  %v1452_v12 = vld [vmem:[%s1921_s1 + $0x60] sm:$0xff]   ;;  %v1456_v16 = vld [vmem:[%s1921_s1 + $0x58] sm:$0xff]   ;;  %v1460_v20 = vld [vmem:[%s1921_s1 + $0x50] sm:$0xff]  }
   0x6   :  { %1319 = vmatprep.subr.bf16.mxu1 %v1445_v5  ;;  %v1453_v13 = vld [vmem:[%s1921_s1 + $0xe0] sm:$0xff]   ;;  %v1457_v17 = vld [vmem:[%s1921_s1 + $0xd8] sm:$0xff]   ;;  %v1461_v21 = vld [vmem:[%s1921_s1 + $0xd0] sm:$0xff]  }
   0x7   :  { %v1454_v14 = vld [vmem:[%s1921_s1 + $0x20] sm:$0xff]   ;;  %v1458_v18 = vld [vmem:[%s1921_s1 + $0x18] sm:$0xff]   ;;  %v1462_v22 = vld [vmem:[%s1921_s1 + $0x10] sm:$0xff]  }
   0x8   :  { %1298 = vmatpush3.bf16.msra.mxu0 %v1446_v6  ;;  %v1455_v15 = vld [vmem:[%s1921_s1 + $0xa0] sm:$0xff]   ;;  %v1459_v19 = vld [vmem:[%s1921_s1 + $0x98] sm:$0xff]   ;;  %v1463_v23 = vld [vmem:[%s1921_s1 + $0x90] sm:$0xff]  }
   0x9   :  { %1320 = vmatpush3.bf16.msra.mxu1 %v1447_v7  ;;  %1299 = vmatprep.subr.bf16.mxu0 %v1448_v8  ;;  %v1464_v24 = vld [vmem:[%s1921_s1 + $0x48] sm:$0xff]   ;;  %v1468_v28 = vld [vmem:[%s1921_s1 + $0x40] sm:$0xff]   ;;  %v1478_v36 = vld [vmem:[%s1921_s1 + $0x178] sm:$0xff]  }
   0xa   :  { %1321 = vmatprep.subr.bf16.mxu1 %v1449_v9  ;;  %v1465_v25 = vld [vmem:[%s1921_s1 + $0xc8] sm:$0xff]   ;;  %v1469_v29 = vld [vmem:[%s1921_s1 + $0xc0] sm:$0xff]   ;;  %v1479_v37 = vld [vmem:[%s1921_s1 + $0x1f8] sm:$0xff]  }
   0xb   :  { %v1466_v26 = vld [vmem:[%s1921_s1 + $0x8] sm:$0xff]   ;;  %v1470_v30 = vld [vmem:[%s1921_s1] sm:$0xff]   ;;  %v1480_v38 = vld [vmem:[%s1921_s1 + $0x138] sm:$0xff]  }
   0xc   :  { %1300 = vmatpush3.bf16.msra.mxu0 %v1450_v10  ;;  %v1467_v27 = vld [vmem:[%s1921_s1 + $0x88] sm:$0xff]   ;;  %v1471_v31 = vld [vmem:[%s1921_s1 + $0x80] sm:$0xff]   ;;  %v1481_v39 = vld [vmem:[%s1921_s1 + $0x1b8] sm:$0xff]  }
   0xd   :  { %1322 = vmatpush3.bf16.msra.mxu1 %v1451_v11  ;;  %1301 = vmatprep.subr.bf16.mxu0 %v1452_v12  ;;  %v1472_v32 = vld [vmem:[%s1922_s0] ss:$52 sps:$4 sm:$0xff]   ;;  %v1474_v33 = vld [vmem:[%s1922_s0 + $0x4] ss:$52 sps:$4 sm:$0xff]   ;;  %v1475_v34 = vld [vmem:[%s1922_s0 + $0x8] ss:$52 sps:$4 sm:$0xff]  }
   0xe   :  { %1323 = vmatprep.subr.bf16.mxu1 %v1453_v13  ;;  %v1477_v35 = vld [vmem:[%s1922_s0 + $0xc] ss:$52 sps:$4 sm:$0xff]   ;;  %921 = vmatprep.mubr.bf16.mxu0 %v1474_v33  ;;  %v1482_v40 = vld [vmem:[%s1921_s1 + $0x170] sm:$0xff]   ;;  %v1494_v52 = vld [vmem:[%s1921_s1 + $0x158] sm:$0xff]  }
   0xf   :  { %962 = vmatprep.mubr.bf16.mxu1 %v1477_v35  ;;  %v1483_v41 = vld [vmem:[%s1921_s1 + $0x1f0] sm:$0xff]   ;;  %v1486_v44 = vld [vmem:[%s1921_s1 + $0x168] sm:$0xff]   ;;  %v1490_v48 = vld [vmem:[%s1921_s1 + $0x160] sm:$0xff]  }
  0x10   :  { %1302 = vmatpush3.bf16.msra.mxu0 %v1454_v14  ;;  %v1484_v42 = vld [vmem:[%s1921_s1 + $0x130] sm:$0xff]   ;;  %v1487_v45 = vld [vmem:[%s1921_s1 + $0x1e8] sm:$0xff]   ;;  %v1491_v49 = vld [vmem:[%s1921_s1 + $0x1e0] sm:$0xff]  }
  0x11   :  { %1324 = vmatpush3.bf16.msra.mxu1 %v1455_v15  ;;  %1303 = vmatprep.subr.bf16.mxu0 %v1456_v16  ;;  %v1485_v43 = vld [vmem:[%s1921_s1 + $0x1b0] sm:$0xff]   ;;  %v1488_v46 = vld [vmem:[%s1921_s1 + $0x128] sm:$0xff]   ;;  %v1492_v50 = vld [vmem:[%s1921_s1 + $0x120] sm:$0xff]  }
  0x12   :  { %1325 = vmatprep.subr.bf16.mxu1 %v1457_v17  ;;  %v1489_v47 = vld [vmem:[%s1921_s1 + $0x1a8] sm:$0xff]   ;;  %v1493_v51 = vld [vmem:[%s1921_s1 + $0x1a0] sm:$0xff]   ;;  %v1495_v53 = vld [vmem:[%s1921_s1 + $0x1d8] sm:$0xff]  }
  0x13   :  { %v1496_v54 = vld [vmem:[%s1921_s1 + $0x118] sm:$0xff]   ;;  %v1498_v56 = vld [vmem:[%s1921_s1 + $0x150] sm:$0xff]   ;;  %v1502_v60 = vld [vmem:[%s1921_s1 + $0x148] sm:$0xff]  }
  0x14   :  { %1304 = vmatpush3.bf16.msra.mxu0 %v1458_v18  ;;  %v1497_v55 = vld [vmem:[%s1921_s1 + $0x198] sm:$0xff]   ;;  %v1499_v57 = vld [vmem:[%s1921_s1 + $0x1d0] sm:$0xff]   ;;  %v1503_v61 = vld [vmem:[%s1921_s1 + $0x1c8] sm:$0xff]  }
  0x15   :  { %1326 = vmatpush3.bf16.msra.mxu1 %v1459_v19  ;;  %1305 = vmatprep.subr.bf16.mxu0 %v1460_v20  ;;  %v1500_v58 = vld [vmem:[%s1921_s1 + $0x110] sm:$0xff]   ;;  %v1504_v62 = vld [vmem:[%s1921_s1 + $0x108] sm:$0xff]   ;;  %v1506_v0 = vld [vmem:[%s1921_s1 + $0x140] sm:$0xff]  }
  0x16   :  { %1327 = vmatprep.subr.bf16.mxu1 %v1461_v21  ;;  %v1501_v59 = vld [vmem:[%s1921_s1 + $0x190] sm:$0xff]   ;;  %v1505_v63 = vld [vmem:[%s1921_s1 + $0x188] sm:$0xff]   ;;  %v1507_v1 = vld [vmem:[%s1921_s1 + $0x1c0] sm:$0xff]  }
  0x17   :  { %v1508_v2 = vld [vmem:[%s1921_s1 + $0x100] sm:$0xff]   ;;  %v1512_v5 = vld [vmem:[%s1922_s0 + $0x14] ss:$52 sps:$4 sm:$0xff]   ;;  %v1513_v6 = vld [vmem:[%s1922_s0 + $0x18] ss:$52 sps:$4 sm:$0xff]  }
  0x18   :  { %1306 = vmatpush3.bf16.msra.mxu0 %v1462_v22  ;;  %v1509_v3 = vld [vmem:[%s1921_s1 + $0x180] sm:$0xff]   ;;  %v1515_v7 = vld [vmem:[%s1922_s0 + $0x1c] ss:$52 sps:$4 sm:$0xff]   ;;  %v1524_v16 = vld [vmem:[%s1921_s1 + $0x268] sm:$0xff]  }
  0x19   :  { %1328 = vmatpush3.bf16.msra.mxu1 %v1463_v23  ;;  %1307 = vmatprep.subr.bf16.mxu0 %v1464_v24  ;;  %v1510_v4 = vld [vmem:[%s1922_s0 + $0x10] ss:$52 sps:$4 sm:$0xff]   ;;  %v1516_v8 = vld [vmem:[%s1921_s1 + $0x278] sm:$0xff]   ;;  %v1525_v17 = vld [vmem:[%s1921_s1 + $0x2e8] sm:$0xff]  }
  0x1a   :  { %1329 = vmatprep.subr.bf16.mxu1 %v1465_v25  ;;  %v1517_v9 = vld [vmem:[%s1921_s1 + $0x2f8] sm:$0xff]   ;;  %v1520_v12 = vld [vmem:[%s1921_s1 + $0x270] sm:$0xff]   ;;  %v1526_v18 = vld [vmem:[%s1921_s1 + $0x228] sm:$0xff]  }
  0x1b   :  { %v1518_v10 = vld [vmem:[%s1921_s1 + $0x238] sm:$0xff]   ;;  %v1521_v13 = vld [vmem:[%s1921_s1 + $0x2f0] sm:$0xff]   ;;  %v1527_v19 = vld [vmem:[%s1921_s1 + $0x2a8] sm:$0xff]  }
  0x1c   :  { %1308 = vmatpush3.bf16.msra.mxu0 %v1466_v26  ;;  %v1519_v11 = vld [vmem:[%s1921_s1 + $0x2b8] sm:$0xff]   ;;  %v1522_v14 = vld [vmem:[%s1921_s1 + $0x230] sm:$0xff]   ;;  %v1528_v20 = vld [vmem:[%s1921_s1 + $0x260] sm:$0xff]  }
  0x1d   :  { %1330 = vmatpush3.bf16.msra.mxu1 %v1467_v27  ;;  %1309 = vmatprep.subr.bf16.mxu0 %v1468_v28  ;;  %v1523_v15 = vld [vmem:[%s1921_s1 + $0x2b0] sm:$0xff]   ;;  %v1529_v21 = vld [vmem:[%s1921_s1 + $0x2e0] sm:$0xff]   ;;  %v1532_v24 = vld [vmem:[%s1921_s1 + $0x258] sm:$0xff]  }
  0x1e   :  { %1331 = vmatprep.subr.bf16.mxu1 %v1469_v29  ;;  %v1530_v22 = vld [vmem:[%s1921_s1 + $0x220] sm:$0xff]   ;;  %v1533_v25 = vld [vmem:[%s1921_s1 + $0x2d8] sm:$0xff]   ;;  %v1536_v28 = vld [vmem:[%s1921_s1 + $0x250] sm:$0xff]  }
  0x1f   :  { %v1531_v23 = vld [vmem:[%s1921_s1 + $0x2a0] sm:$0xff]   ;;  %v1534_v26 = vld [vmem:[%s1921_s1 + $0x218] sm:$0xff]   ;;  %v1537_v29 = vld [vmem:[%s1921_s1 + $0x2d0] sm:$0xff]  }
  0x20   :  { %1310 = vmatpush3.bf16.msra.mxu0 %v1470_v30  ;;  %v1535_v27 = vld [vmem:[%s1921_s1 + $0x298] sm:$0xff]   ;;  %v1538_v30 = vld [vmem:[%s1921_s1 + $0x210] sm:$0xff]   ;;  %v1541_v33 = vld [vmem:[%s1921_s1 + $0x2c8] sm:$0xff]  }
  0x21   :  { %1332 = vmatpush3.bf16.msra.mxu1 %v1471_v31  ;;  %1339 = vmatprep.subr.bf16.mxu0 %v1478_v36  ;;  %v1539_v31 = vld [vmem:[%s1921_s1 + $0x290] sm:$0xff]   ;;  %v1543_v35 = vld [vmem:[%s1921_s1 + $0x288] sm:$0xff]   ;;  %v1544_v36 = vld [vmem:[%s1921_s1 + $0x240] sm:$0xff]  }
  0x22   :  { %1361 = vmatprep.subr.bf16.mxu1 %v1479_v37  ;;  %v1545_v37 = vld [vmem:[%s1921_s1 + $0x2c0] sm:$0xff]  }
  0x23   :  { %922 = vmatmul.mubr.bf16.vlgmr.msra.gmra.mxu0 %v1472_v32  ;;  %v1540_v32 = vld [vmem:[%s1921_s1 + $0x248] sm:$0xff]  }
  0x24   :  { %963 = vmatmul.mubr.bf16.vlgmr.msra.gmra.mxu1 %v1475_v34  ;;  %1340 = vmatpush3.bf16.msra.mxu0 %v1480_v38  ;;  %v1542_v34 = vld [vmem:[%s1921_s1 + $0x208] sm:$0xff]   ;;  %v1546_v38 = vld [vmem:[%s1921_s1 + $0x200] sm:$0xff]  }
  0x25   :  { %1362 = vmatpush3.bf16.msra.mxu1 %v1481_v39  ;;  %1341 = vmatprep.subr.bf16.mxu0 %v1482_v40  ;;  %v1547_v39 = vld [vmem:[%s1921_s1 + $0x280] sm:$0xff]  }
  0x26   :  { %1363 = vmatprep.subr.bf16.mxu1 %v1483_v41  ;;  %1003 = vmatprep.mubr.bf16.mxu0 %v1512_v5  ;;  %v1548_v40 = vld [vmem:[%s1922_s0 + $0x20] ss:$52 sps:$4 sm:$0xff]   ;;  %v1550_v41 = vld [vmem:[%s1922_s0 + $0x24] ss:$52 sps:$4 sm:$0xff]  }
  0x27   :  { %1044 = vmatprep.mubr.bf16.mxu1 %v1515_v7 }
  0x28   :  { %1342 = vmatpush3.bf16.msra.mxu0 %v1484_v42  ;;  %v1551_v42 = vld [vmem:[%s1922_s0 + $0x28] ss:$52 sps:$4 sm:$0xff]  }
  0x29   :  { %1364 = vmatpush3.bf16.msra.mxu1 %v1485_v43  ;;  %1343 = vmatprep.subr.bf16.mxu0 %v1486_v44  ;;  %v1553_v43 = vld [vmem:[%s1922_s0 + $0x2c] ss:$52 sps:$4 sm:$0xff]   ;;  %v1557_v44 = vmov 0.0  }
  0x2a   :  { %1365 = vmatprep.subr.bf16.mxu1 %v1487_v45  ;;  %v1554_v45 = vld [vmem:[%s1921_s1 + $0x308] sm:$0xff]  }
  0x2c   :  { %1344 = vmatpush3.bf16.msra.mxu0 %v1488_v46  ;;  %v1555_v46 = vld [vmem:[%s1921_s1 + $0x300] sm:$0xff]  }
  0x2d   :  { %1366 = vmatpush3.bf16.msra.mxu1 %v1489_v47  ;;  %1345 = vmatprep.subr.bf16.mxu0 %v1490_v48  ;;  %v1556_v47 = vld [vmem:[%s1922_s0 + $0x30] ss:$52 sps:$4 sm:$0xff]  }
  0x2e   :  { %1367 = vmatprep.subr.bf16.mxu1 %v1491_v49 }
  0x30   :  { %1346 = vmatpush3.bf16.msra.mxu0 %v1492_v50 }
  0x31   :  { %1368 = vmatpush3.bf16.msra.mxu1 %v1493_v51  ;;  %1347 = vmatprep.subr.bf16.mxu0 %v1494_v52 }
  0x32   :  { %1369 = vmatprep.subr.bf16.mxu1 %v1495_v53 }
  0x34   :  { %1348 = vmatpush3.bf16.msra.mxu0 %v1496_v54 }
  0x35   :  { %1370 = vmatpush3.bf16.msra.mxu1 %v1497_v55  ;;  %1349 = vmatprep.subr.bf16.mxu0 %v1498_v56 }
  0x36   :  { %1371 = vmatprep.subr.bf16.mxu1 %v1499_v57 }
  0x38   :  { %1350 = vmatpush3.bf16.msra.mxu0 %v1500_v58 }
  0x39   :  { %1372 = vmatpush3.bf16.msra.mxu1 %v1501_v59  ;;  %1351 = vmatprep.subr.bf16.mxu0 %v1502_v60  ;;  %v1182_v60 = vld [vmem:[%s1923_s2] ss:$0 sm:$0xff] }
  0x3a   :  { %1373 = vmatprep.subr.bf16.mxu1 %v1503_v61 }
  0x3c   :  { %1352 = vmatpush3.bf16.msra.mxu0 %v1504_v62 }
  0x3d   :  { %1374 = vmatpush3.bf16.msra.mxu1 %v1505_v63  ;;  %1353 = vmatprep.subr.bf16.mxu0 %v1506_v0 }
  0x3e   :  { %1375 = vmatprep.subr.bf16.mxu1 %v1507_v1 }
  0x40   :  { %1354 = vmatpush3.bf16.msra.mxu0 %v1508_v2 }
  0x41   :  { %1376 = vmatpush3.bf16.msra.mxu1 %v1509_v3  ;;  %1383 = vmatprep.subr.bf16.mxu0 %v1516_v8 }
  0x42   :  { %1405 = vmatprep.subr.bf16.mxu1 %v1517_v9 }
  0x43   :  { %1004 = vmatmul.mubr.bf16.vlgmr.msra.gmra.mxu0 %v1510_v4 }
  0x44   :  { %1045 = vmatmul.mubr.bf16.vlgmr.msra.gmra.mxu1 %v1513_v6  ;;  %1384 = vmatpush3.bf16.msra.mxu0 %v1518_v10 }
  0x45   :  { %1406 = vmatpush3.bf16.msra.mxu1 %v1519_v11  ;;  %1385 = vmatprep.subr.bf16.mxu0 %v1520_v12 }
  0x46   :  { %1407 = vmatprep.subr.bf16.mxu1 %v1521_v13  ;;  %1085 = vmatprep.mubr.bf16.mxu0 %v1550_v41 }
  0x47   :  { %1126 = vmatprep.mubr.bf16.mxu1 %v1553_v43 }
  0x48   :  { %1386 = vmatpush3.bf16.msra.mxu0 %v1522_v14 }
  0x49   :  { %1408 = vmatpush3.bf16.msra.mxu1 %v1523_v15  ;;  %1387 = vmatprep.subr.bf16.mxu0 %v1524_v16 }
  0x4a   :  { %1409 = vmatprep.subr.bf16.mxu1 %v1525_v17 }
  0x4c   :  { %1388 = vmatpush3.bf16.msra.mxu0 %v1526_v18 }
  0x4d   :  { %1410 = vmatpush3.bf16.msra.mxu1 %v1527_v19  ;;  %1389 = vmatprep.subr.bf16.mxu0 %v1528_v20 }
  0x4e   :  { %1411 = vmatprep.subr.bf16.mxu1 %v1529_v21 }
  0x50   :  { %1390 = vmatpush3.bf16.msra.mxu0 %v1530_v22 }
  0x51   :  { %1412 = vmatpush3.bf16.msra.mxu1 %v1531_v23  ;;  %1391 = vmatprep.subr.bf16.mxu0 %v1532_v24 }
  0x52   :  { %1413 = vmatprep.subr.bf16.mxu1 %v1533_v25 }
  0x54   :  { %1392 = vmatpush3.bf16.msra.mxu0 %v1534_v26 }
  0x55   :  { %1414 = vmatpush3.bf16.msra.mxu1 %v1535_v27  ;;  %1393 = vmatprep.subr.bf16.mxu0 %v1536_v28 }
  0x56   :  { %1415 = vmatprep.subr.bf16.mxu1 %v1537_v29 }
  0x58   :  { %1394 = vmatpush3.bf16.msra.mxu0 %v1538_v30 }
  0x59   :  { %1416 = vmatpush3.bf16.msra.mxu1 %v1539_v31  ;;  %1395 = vmatprep.subr.bf16.mxu0 %v1540_v32 }
  0x5a   :  { %1417 = vmatprep.subr.bf16.mxu1 %v1541_v33 }
  0x5c   :  { %1396 = vmatpush3.bf16.msra.mxu0 %v1542_v34 }
  0x5d   :  { %1418 = vmatpush3.bf16.msra.mxu1 %v1543_v35  ;;  %1397 = vmatprep.subr.bf16.mxu0 %v1544_v36 }
  0x5e   :  { %1419 = vmatprep.subr.bf16.mxu1 %v1545_v37 }
  0x60   :  { %1398 = vmatpush3.bf16.msra.mxu0 %v1546_v38 }
  0x61   :  { %1420 = vmatpush3.bf16.msra.mxu1 %v1547_v39  ;;  %1430 = vmatprep.subr.bf16.mxu0 %v1557_v44 }
  0x63   :  { %1086 = vmatmul.mubr.bf16.vlgmr.msra.gmra.mxu0 %v1548_v40 }
  0x64   :  { %1127 = vmatmul.mubr.bf16.vlgmr.msra.gmra.mxu1 %v1551_v42  ;;  %1431 = vmatpush3.bf16.msra.mxu0 %v1554_v45 }
  0x65   :  { %1432 = vmatprep.subr.bf16.mxu0 %v1557_v44  ;;  %1434 = vmatprep.mubr.msk.bf16.mxu0 %vm1558_vm0, %v1557_v44 }
  0x68   :  { %1433 = vmatpush3.bf16.msra.mxu0 %v1555_v46 }
  0x6b   :  { %1435 = vmatmul.mubr.msk.bf16.vlgmr.msra.gmra.mxu0 %vm885_vm1, %v1556_v47 }
  0xe3   :  { %v1311_v48 = vpop.f32.mrf.mxu0 }
  0xe4   :  { %v1333_v49 = vpop.f32.mrf.mxu1 }
  0xe5   :  { %v1312_v50 = vpop.f32.mrf.mxu0 }
  0xe6   :  { %v1334_v51 = vpop.f32.mrf.mxu1  ;;  %v1313_v59 = vadd.f32 %v1312_v50, %v1311_v48 }
  0xe7   :  { %v1314_v52 = vpop.f32.mrf.mxu0  ;;  %v1335_v0 = vadd.f32 %v1334_v51, %v1333_v49 }
  0xe8   :  { %v1336_v53 = vpop.f32.mrf.mxu1  ;;  %v924_v63 = vadd.f32 %v1313_v59, %v1182_v60 }
  0xe9   :  { %v1315_v54 = vpop.f32.mrf.mxu0 }
  0xea   :  { %v1337_v56 = vpop.f32.mrf.mxu1  ;;  %v1316_v1 = vadd.f32 %v1315_v54, %v1314_v52  ;;  %v965_v5 = vadd.f32 %v1335_v0, %v924_v63 }
  0xeb   :  { %v1338_v7 = vadd.f32 %v1337_v56, %v1336_v53 }
  0xec   :  { %v927_v6 = vadd.f32 %v1316_v1, %v1182_v60 }
  0xee   :  { %v968_v13 = vadd.f32 %v1338_v7, %v927_v6 }
 0x103   :  { %v1355_v55 = vpop.f32.mrf.mxu0 }
 0x104   :  { %v1377_v57 = vpop.f32.mrf.mxu1 }
 0x105   :  { %v1356_v58 = vpop.f32.mrf.mxu0 }
 0x106   :  { %v1378_v61 = vpop.f32.mrf.mxu1  ;;  %v1357_v2 = vadd.f32 %v1356_v58, %v1355_v55 }
 0x107   :  { %v1358_v62 = vpop.f32.mrf.mxu0  ;;  %v1379_v9 = vadd.f32 %v1378_v61, %v1377_v57 }
 0x108   :  { %v1380_v3 = vpop.f32.mrf.mxu1  ;;  %v1006_v8 = vadd.f32 %v1357_v2, %v965_v5 }
 0x109   :  { %v1359_v4 = vpop.f32.mrf.mxu0 }
 0x10a   :  { %v1360_v10 = vadd.f32 %v1359_v4, %v1358_v62  ;;  %v1381_v11 = vpop.f32.mrf.mxu1  ;;  %v1047_v16 = vadd.f32 %v1379_v9, %v1006_v8 }
 0x10b   :  { %v1382_v21 = vadd.f32 %v1381_v11, %v1380_v3 }
 0x10c   :  { %v1009_v17 = vadd.f32 %v1360_v10, %v968_v13 }
 0x10e   :  { %v1050_v26 = vadd.f32 %v1382_v21, %v1009_v17 }
 0x123   :  { %v1399_v12 = vpop.f32.mrf.mxu0 }
 0x124   :  { %v1421_v14 = vpop.f32.mrf.mxu1 }
 0x125   :  { %v1400_v15 = vpop.f32.mrf.mxu0 }
 0x126   :  { %v1401_v18 = vadd.f32 %v1400_v15, %v1399_v12  ;;  %v1422_v19 = vpop.f32.mrf.mxu1 }
 0x127   :  { %v1402_v20 = vpop.f32.mrf.mxu0  ;;  %v1423_v23 = vadd.f32 %v1422_v19, %v1421_v14 }
 0x128   :  { %v1088_v22 = vadd.f32 %v1401_v18, %v1047_v16  ;;  %v1424_v24 = vpop.f32.mrf.mxu1 }
 0x129   :  { %v1403_v25 = vpop.f32.mrf.mxu0 }
 0x12a   :  { %v1404_v27 = vadd.f32 %v1403_v25, %v1402_v20  ;;  %v1425_v28 = vpop.f32.mrf.mxu1  ;;  %v1129_v29 = vadd.f32 %v1423_v23, %v1088_v22 }
 0x12b   :  { %v1169_v30 = vpop.f32.mrf.mxu0  ;;  %v1426_v32 = vadd.f32 %v1425_v28, %v1424_v24 }
 0x12c   :  { %v1091_v31 = vadd.f32 %v1404_v27, %v1050_v26  ;;  %v1170_v33 = vadd.f32 %v1169_v30, %v1129_v29 }
 0x12d   :  { %v1436_v34 = vpop.f32.mrf.mxu0 }
 0x12e   :  { %1176 = vst [vmem:[%s1924_s3] sm:$0xff] %v1170_v33  ;;  %v1132_v35 = vadd.f32 %v1426_v32, %v1091_v31 }
 0x12f   :  { %v1172_v36 = vpop.f32.mrf.mxu0 }
 0x130   :  { %v1173_v37 = vadd.f32 %v1172_v36, %v1132_v35 }
 0x131   :  { %v1437_v38 = vpop.f32.mrf.mxu0 }
 0x132   :  { %1177 = vst [vmem:[%s1924_s3 + $0x8] sm:$0xff] %v1173_v37 }

</bundles_post_ra>
